<compile_context>
chip_gen: v5e
topology: v5e:2x2
jax: 0.10.0
libtpu: 0.0.40
codegen_flags: <defaults>
</compile_context>

<pallas_src>
import functools
import math

import jax
import jax.numpy as jnp
from jax.experimental import pallas as pl
from jax.experimental.pallas import tpu as pltpu


def _fused_lstm_cell(inp, h, c, w_ref, b_bcast, H):
    """One PyTorch-semantics LSTMCell step with fused weights.

    inp: (B, K_in)   h, c: (B, H)
    w_ref: VMEM ref of shape (K_in + H, 4H) = [W_ih^T ; W_hh^T]
    b_bcast: (B, 4H) pre-broadcast bias (b_ih + b_hh)
    Gate order along 4H matches PyTorch: [i, f, g, o].
    """
    xh = jnp.concatenate([inp, h], axis=1)                       # (B, K_in + H)
    gates = jnp.dot(xh, w_ref[...],
                    preferred_element_type=jnp.float32) + b_bcast  # (B, 4H)
    sig = jax.nn.sigmoid(gates)   # one full-width EUP pass
    th = jnp.tanh(gates)          # one full-width EUP pass
    i = sig[:, 0 * H:1 * H]
    f = sig[:, 1 * H:2 * H]
    g = th[:, 2 * H:3 * H]
    o = sig[:, 3 * H:4 * H]
    c_new = f * c + i * g
    h_new = o * jnp.tanh(c_new)
    return h_new, c_new


def pendulum_rnn3_kernel(x_ref,
                         w1_ref, b1_ref,
                         w2_ref, b2_ref,
                         w3_ref, b3_ref,
                         wlin_ref, blin_ref, wlin_blk_ref,
                         out_ref,
                         *, hidden_dim, seq_len, future):
    B = x_ref.shape[0]
    H = hidden_dim
    T = seq_len

    zero = jnp.zeros((B, H), jnp.float32)
    h1 = c1 = h2 = c2 = h3 = c3 = zero

    # Hoist bias broadcasts out of the unrolled loops.
    b1b = jnp.broadcast_to(b1_ref[...], (B, 4 * H))
    b2b = jnp.broadcast_to(b2_ref[...], (B, 4 * H))
    b3b = jnp.broadcast_to(b3_ref[...], (B, 4 * H))
    blinb = jnp.broadcast_to(blin_ref[...], (B, 1))

    # ---- teacher-forced part: wavefront pipeline across the 3 layers ----
    # Outer step s runs layer1 on t=s, layer2 on t=s-1, layer3 on t=s-2, so
    # the three cells inside one iteration have no data dependence on each
    # other (only on the previous iteration).
    h1_d = zero   # h1 produced last iteration -> feeds layer2 this iteration
    h2_d = zero   # h2 produced last iteration -> feeds layer3 this iteration
    h3_steps = []
    for s in range(T + 2):
        l2_in = h1_d
        l3_in = h2_d
        if s < T:                                   # layer1 @ t = s
            x_t = x_ref[:, s:s + 1]                 # (B, 1)
            h1, c1 = _fused_lstm_cell(x_t, h1, c1, w1_ref, b1b, H)
            h1_d = h1
        if 1 <= s <= T:                             # layer2 @ t = s - 1
            h2, c2 = _fused_lstm_cell(l2_in, h2, c2, w2_ref, b2b, H)
            h2_d = h2
        if 2 <= s:                                  # layer3 @ t = s - 2
            h3, c3 = _fused_lstm_cell(l3_in, h3, c3, w3_ref, b3b, H)
            h3_steps.append(h3)

    pieces = []
    if T > 0:
        # Batched linear head for all teacher-forced steps: one matmul against
        # a block-diagonal kron(I_T, w_lin) weight -> (B, T), lane-dense.
        h3_wide = jnp.concatenate(h3_steps, axis=1)                   # (B, T*H)
        teacher_out = (jnp.dot(h3_wide, wlin_blk_ref[...],
                               preferred_element_type=jnp.float32)
                       + blin_ref[...])                               # (B, T)
        pieces.append(teacher_out)
        # Seed for the autoregressive rollout = last teacher prediction
        # (computed directly from h3 so the rollout does not wait on the
        #  batched head above).
        out = jnp.dot(h3, wlin_ref[...],
                      preferred_element_type=jnp.float32) + blinb     # (B, 1)
    else:
        out = jnp.zeros((B, 1), jnp.float32)

    # ---- autoregressive rollout (inherently serial: out feeds back) ----
    auto = []
    for _ in range(future):
        h1, c1 = _fused_lstm_cell(out, h1, c1, w1_ref, b1b, H)
        h2, c2 = _fused_lstm_cell(h1, h2, c2, w2_ref, b2b, H)
        h3, c3 = _fused_lstm_cell(h2, h3, c3, w3_ref, b3b, H)
        out = jnp.dot(h3, wlin_ref[...],
                      preferred_element_type=jnp.float32) + blinb
        auto.append(out)
    if future > 0:
        pieces.append(auto[0] if len(auto) == 1
                      else jnp.concatenate(auto, axis=1))

    # Single lane-dense store of the whole output.
    out_ref[...] = pieces[0] if len(pieces) == 1 else jnp.concatenate(pieces,
                                                                      axis=1)


def init_params(key, hidden_dim):
    """PyTorch-shaped parameters, uniform(-1/sqrt(H), 1/sqrt(H)) like nn.LSTMCell."""
    H = hidden_dim
    bound = 1.0 / math.sqrt(H)
    keys = jax.random.split(key, 14)

    def u(k, shape):
        return jax.random.uniform(k, shape, jnp.float32, -bound, bound)

    return {
        "w_ih1": u(keys[0], (4 * H, 1)), "w_hh1": u(keys[1], (4 * H, H)),
        "b_ih1": u(keys[2], (4 * H,)),   "b_hh1": u(keys[3], (4 * H,)),
        "w_ih2": u(keys[4], (4 * H, H)), "w_hh2": u(keys[5], (4 * H, H)),
        "b_ih2": u(keys[6], (4 * H,)),   "b_hh2": u(keys[7], (4 * H,)),
        "w_ih3": u(keys[8], (4 * H, H)), "w_hh3": u(keys[9], (4 * H, H)),
        "b_ih3": u(keys[10], (4 * H,)),  "b_hh3": u(keys[11], (4 * H,)),
        "w_lin": u(keys[12], (1, H)),    "b_lin": u(keys[13], (1,)),
    }


def _prep_kernel_params(params, hidden_dim, seq_len):
    """Fuse PyTorch-shaped params into the kernel layout (all outside the kernel)."""
    H = hidden_dim

    def stack(w_ih, w_hh, b_ih, b_hh):
        w = jnp.concatenate([w_ih.T, w_hh.T], axis=0).astype(jnp.float32)  # (in+H, 4H)
        b = (b_ih + b_hh).reshape(1, 4 * H).astype(jnp.float32)
        return w, b

    w1, b1 = stack(params["w_ih1"], params["w_hh1"], params["b_ih1"], params["b_hh1"])
    w2, b2 = stack(params["w_ih2"], params["w_hh2"], params["b_ih2"], params["b_hh2"])
    w3, b3 = stack(params["w_ih3"], params["w_hh3"], params["b_ih3"], params["b_hh3"])
    wlin = params["w_lin"].T.astype(jnp.float32)                  # (H, 1)
    blin = params["b_lin"].reshape(1, 1).astype(jnp.float32)      # (1, 1)
    if seq_len > 0:
        # Block-diagonal head weight for the batched teacher-forced linear head.
        wlin_blk = jnp.kron(jnp.eye(seq_len, dtype=jnp.float32), wlin)  # (T*H, T)
    else:
        wlin_blk = jnp.zeros((1, 1), jnp.float32)
    return (w1, b1, w2, b2, w3, b3, wlin, blin, wlin_blk)


def pendulum_rnn3(x, params, hidden_dim, future=0):
    batch, seq_len = x.shape
    kparams = _prep_kernel_params(params, hidden_dim, seq_len)
    kernel = functools.partial(pendulum_rnn3_kernel,
                               hidden_dim=hidden_dim,
                               seq_len=seq_len,
                               future=future)
    # Everything is tiny (~a few hundred KB), so keep all operands fully
    # VMEM-resident; no grid / BlockSpec pipelining needed.
    # (For H >> 32 the 4H gate axis would need tiling / an explicit
    #  vmem_limit_bytes, and on v7x a parallel batch grid could use the
    #  second TensorCore for large batches.)
    vmem = pl.BlockSpec(memory_space=pltpu.MemorySpace.VMEM)
    args = (x.astype(jnp.float32),) + kparams
    return pl.pallas_call(
        kernel,
        out_shape=jax.ShapeDtypeStruct((batch, seq_len + future), jnp.float32),
        in_specs=[vmem] * len(args),
        out_specs=vmem,
    )(*args)


def pendulum_rnn3_ref(x, params, hidden_dim, future=0):
    """Pure-JAX reference with PyTorch LSTMCell semantics (for correctness check)."""
    B, T = x.shape
    H = hidden_dim
    z = jnp.zeros((B, H), jnp.float32)
    h1 = c1 = h2 = c2 = h3 = c3 = z

    def cell(xv, h, c, w_ih, w_hh, b_ih, b_hh):
        g = xv @ w_ih.T + h @ w_hh.T + b_ih + b_hh
        i = jax.nn.sigmoid(g[:, :H])
        f = jax.nn.sigmoid(g[:, H:2 * H])
        gg = jnp.tanh(g[:, 2 * H:3 * H])
        o = jax.nn.sigmoid(g[:, 3 * H:])
        c_new = f * c + i * gg
        return o * jnp.tanh(c_new), c_new

    outs = []
    out = jnp.zeros((B, 1), jnp.float32)
    for t in range(T):
        xt = x[:, t:t + 1]
        h1, c1 = cell(xt, h1, c1, params["w_ih1"], params["w_hh1"],
                      params["b_ih1"], params["b_hh1"])
        h2, c2 = cell(h1, h2, c2, params["w_ih2"], params["w_hh2"],
                      params["b_ih2"], params["b_hh2"])
        h3, c3 = cell(h2, h3, c3, params["w_ih3"], params["w_hh3"],
                      params["b_ih3"], params["b_hh3"])
        out = h3 @ params["w_lin"].T + params["b_lin"]
        outs.append(out)
    for _ in range(future):
        h1, c1 = cell(out, h1, c1, params["w_ih1"], params["w_hh1"],
                      params["b_ih1"], params["b_hh1"])
        h2, c2 = cell(h1, h2, c2, params["w_ih2"], params["w_hh2"],
                      params["b_ih2"], params["b_hh2"])
        h3, c3 = cell(h2, h3, c3, params["w_ih3"], params["w_hh3"],
                      params["b_ih3"], params["b_hh3"])
        out = h3 @ params["w_lin"].T + params["b_lin"]
        outs.append(out)
    return jnp.concatenate(outs, axis=1)


if __name__ == "__main__":
    HIDDEN = 32
    BATCH = 2
    SEQ = 8
    FUTURE = 4

    key = jax.random.PRNGKey(0)
    k_x, k_p = jax.random.split(key)
    x = jax.random.normal(k_x, (BATCH, SEQ), jnp.float32)
    params = init_params(k_p, HIDDEN)

    out = pendulum_rnn3(x, params, HIDDEN, future=FUTURE)
    out = jax.block_until_ready(out)

    ref = pendulum_rnn3_ref(x, params, HIDDEN, future=FUTURE)
    assert out.shape == (BATCH, SEQ + FUTURE)
    assert jnp.allclose(out, ref, atol=2e-5, rtol=1e-4), "mismatch vs reference"

    print("KERNEL_OK")
</pallas_src>

<mosaic_0001>
module attributes {stable_mosaic.version = 11 : i64} {
  func.func @pendulum_rnn3_kernel(%arg0: memref<2x8xf32, #tpu.memory_space<vmem>>, %arg1: memref<33x128xf32, #tpu.memory_space<vmem>>, %arg2: memref<1x128xf32, #tpu.memory_space<vmem>>, %arg3: memref<64x128xf32, #tpu.memory_space<vmem>>, %arg4: memref<1x128xf32, #tpu.memory_space<vmem>>, %arg5: memref<64x128xf32, #tpu.memory_space<vmem>>, %arg6: memref<1x128xf32, #tpu.memory_space<vmem>>, %arg7: memref<32x1xf32, #tpu.memory_space<vmem>>, %arg8: memref<1x1xf32, #tpu.memory_space<vmem>>, %arg9: memref<256x8xf32, #tpu.memory_space<vmem>>, %arg10: memref<2x12xf32, #tpu.memory_space<vmem>>) attributes {dimension_semantics = [], scalar_prefetch = 0 : i64, scratch_operands = 0 : i64, tpu.core_type = #tpu.core_type<tc>} {
    %cst = arith.constant 0.000000e+00 : f32
    %0 = vector.broadcast %cst : f32 to vector<2x32xf32>
    %c0 = arith.constant 0 : index
    %c0_0 = arith.constant 0 : index
    %1 = vector.load %arg2[%c0, %c0_0] : memref<1x128xf32, #tpu.memory_space<vmem>>, vector<1x128xf32>
    %2 = vector.shape_cast %1 : vector<1x128xf32> to vector<1x128xf32>
    %3 = vector.broadcast %2 : vector<1x128xf32> to vector<2x128xf32>
    %c0_1 = arith.constant 0 : index
    %c0_2 = arith.constant 0 : index
    %4 = vector.load %arg4[%c0_1, %c0_2] : memref<1x128xf32, #tpu.memory_space<vmem>>, vector<1x128xf32>
    %5 = vector.shape_cast %4 : vector<1x128xf32> to vector<1x128xf32>
    %6 = vector.broadcast %5 : vector<1x128xf32> to vector<2x128xf32>
    %c0_3 = arith.constant 0 : index
    %c0_4 = arith.constant 0 : index
    %7 = vector.load %arg6[%c0_3, %c0_4] : memref<1x128xf32, #tpu.memory_space<vmem>>, vector<1x128xf32>
    %8 = vector.shape_cast %7 : vector<1x128xf32> to vector<1x128xf32>
    %9 = vector.broadcast %8 : vector<1x128xf32> to vector<2x128xf32>
    %c0_5 = arith.constant 0 : index
    %c0_6 = arith.constant 0 : index
    %10 = vector.load %arg8[%c0_5, %c0_6] : memref<1x1xf32, #tpu.memory_space<vmem>>, vector<1x1xf32>
    %11 = vector.shape_cast %10 : vector<1x1xf32> to vector<1x1xf32>
    %12 = vector.broadcast %11 : vector<1x1xf32> to vector<2x1xf32>
    %c0_7 = arith.constant 0 : index
    %c0_8 = arith.constant 0 : index
    %13 = vector.load %arg0[%c0_7, %c0_8] : memref<2x8xf32, #tpu.memory_space<vmem>>, vector<2x1xf32>
    %14 = tpu.concatenate %13, %0 in 1 : vector<2x1xf32>, vector<2x32xf32> -> vector<2x33xf32>
    %c0_9 = arith.constant 0 : index
    %c0_10 = arith.constant 0 : index
    %15 = vector.load %arg1[%c0_9, %c0_10] : memref<33x128xf32, #tpu.memory_space<vmem>>, vector<33x128xf32>
    %cst_11 = arith.constant dense<0.000000e+00> : vector<2x128xf32>
    %16 = tpu.matmul %14, %15, %cst_11 {dimension_numbers = #tpu.dot_dimension_numbers<[1], [0], [0], [1], [0, 0, 1, 1], [], []>} : vector<2x33xf32>, vector<33x128xf32>, vector<2x128xf32> -> vector<2x128xf32>
    %17 = arith.addf %16, %3 : vector<2x128xf32>
    %18 = arith.negf %17 : vector<2x128xf32>
    %19 = math.exp %18 : vector<2x128xf32>
    %cst_12 = arith.constant 1.000000e+00 : f32
    %20 = vector.broadcast %cst_12 : f32 to vector<2x128xf32>
    %21 = arith.addf %20, %19 : vector<2x128xf32>
    %22 = arith.divf %20, %21 : vector<2x128xf32>
    %23 = math.tanh %17 : vector<2x128xf32>
    %24 = vector.extract_strided_slice %22 {offsets = [0, 0], sizes = [2, 32], strides = [1, 1]} : vector<2x128xf32> to vector<2x32xf32>
    %25 = vector.extract_strided_slice %22 {offsets = [0, 32], sizes = [2, 32], strides = [1, 1]} : vector<2x128xf32> to vector<2x32xf32>
    %26 = vector.extract_strided_slice %23 {offsets = [0, 64], sizes = [2, 32], strides = [1, 1]} : vector<2x128xf32> to vector<2x32xf32>
    %27 = vector.extract_strided_slice %22 {offsets = [0, 96], sizes = [2, 32], strides = [1, 1]} : vector<2x128xf32> to vector<2x32xf32>
    %28 = arith.mulf %25, %0 : vector<2x32xf32>
    %29 = arith.mulf %24, %26 : vector<2x32xf32>
    %30 = arith.addf %28, %29 : vector<2x32xf32>
    %31 = math.tanh %30 : vector<2x32xf32>
    %32 = arith.mulf %27, %31 : vector<2x32xf32>
    %c0_13 = arith.constant 0 : index
    %c1 = arith.constant 1 : index
    %33 = vector.load %arg0[%c0_13, %c1] : memref<2x8xf32, #tpu.memory_space<vmem>>, vector<2x1xf32>
    %34 = tpu.concatenate %33, %32 in 1 : vector<2x1xf32>, vector<2x32xf32> -> vector<2x33xf32>
    %c0_14 = arith.constant 0 : index
    %c0_15 = arith.constant 0 : index
    %35 = vector.load %arg1[%c0_14, %c0_15] : memref<33x128xf32, #tpu.memory_space<vmem>>, vector<33x128xf32>
    %cst_16 = arith.constant dense<0.000000e+00> : vector<2x128xf32>
    %36 = tpu.matmul %34, %35, %cst_16 {dimension_numbers = #tpu.dot_dimension_numbers<[1], [0], [0], [1], [0, 0, 1, 1], [], []>} : vector<2x33xf32>, vector<33x128xf32>, vector<2x128xf32> -> vector<2x128xf32>
    %37 = arith.addf %36, %3 : vector<2x128xf32>
    %38 = arith.negf %37 : vector<2x128xf32>
    %39 = math.exp %38 : vector<2x128xf32>
    %cst_17 = arith.constant 1.000000e+00 : f32
    %40 = vector.broadcast %cst_17 : f32 to vector<2x128xf32>
    %41 = arith.addf %40, %39 : vector<2x128xf32>
    %42 = arith.divf %40, %41 : vector<2x128xf32>
    %43 = math.tanh %37 : vector<2x128xf32>
    %44 = vector.extract_strided_slice %42 {offsets = [0, 0], sizes = [2, 32], strides = [1, 1]} : vector<2x128xf32> to vector<2x32xf32>
    %45 = vector.extract_strided_slice %42 {offsets = [0, 32], sizes = [2, 32], strides = [1, 1]} : vector<2x128xf32> to vector<2x32xf32>
    %46 = vector.extract_strided_slice %43 {offsets = [0, 64], sizes = [2, 32], strides = [1, 1]} : vector<2x128xf32> to vector<2x32xf32>
    %47 = vector.extract_strided_slice %42 {offsets = [0, 96], sizes = [2, 32], strides = [1, 1]} : vector<2x128xf32> to vector<2x32xf32>
    %48 = arith.mulf %45, %30 : vector<2x32xf32>
    %49 = arith.mulf %44, %46 : vector<2x32xf32>
    %50 = arith.addf %48, %49 : vector<2x32xf32>
    %51 = math.tanh %50 : vector<2x32xf32>
    %52 = arith.mulf %47, %51 : vector<2x32xf32>
    %53 = tpu.concatenate %32, %0 in 1 : vector<2x32xf32>, vector<2x32xf32> -> vector<2x64xf32>
    %c0_18 = arith.constant 0 : index
    %c0_19 = arith.constant 0 : index
    %54 = vector.load %arg3[%c0_18, %c0_19] : memref<64x128xf32, #tpu.memory_space<vmem>>, vector<64x128xf32>
    %cst_20 = arith.constant dense<0.000000e+00> : vector<2x128xf32>
    %55 = tpu.matmul %53, %54, %cst_20 {dimension_numbers = #tpu.dot_dimension_numbers<[1], [0], [0], [1], [0, 0, 1, 1], [], []>} : vector<2x64xf32>, vector<64x128xf32>, vector<2x128xf32> -> vector<2x128xf32>
    %56 = arith.addf %55, %6 : vector<2x128xf32>
    %57 = arith.negf %56 : vector<2x128xf32>
    %58 = math.exp %57 : vector<2x128xf32>
    %cst_21 = arith.constant 1.000000e+00 : f32
    %59 = vector.broadcast %cst_21 : f32 to vector<2x128xf32>
    %60 = arith.addf %59, %58 : vector<2x128xf32>
    %61 = arith.divf %59, %60 : vector<2x128xf32>
    %62 = math.tanh %56 : vector<2x128xf32>
    %63 = vector.extract_strided_slice %61 {offsets = [0, 0], sizes = [2, 32], strides = [1, 1]} : vector<2x128xf32> to vector<2x32xf32>
    %64 = vector.extract_strided_slice %61 {offsets = [0, 32], sizes = [2, 32], strides = [1, 1]} : vector<2x128xf32> to vector<2x32xf32>
    %65 = vector.extract_strided_slice %62 {offsets = [0, 64], sizes = [2, 32], strides = [1, 1]} : vector<2x128xf32> to vector<2x32xf32>
    %66 = vector.extract_strided_slice %61 {offsets = [0, 96], sizes = [2, 32], strides = [1, 1]} : vector<2x128xf32> to vector<2x32xf32>
    %67 = arith.mulf %64, %0 : vector<2x32xf32>
    %68 = arith.mulf %63, %65 : vector<2x32xf32>
    %69 = arith.addf %67, %68 : vector<2x32xf32>
    %70 = math.tanh %69 : vector<2x32xf32>
    %71 = arith.mulf %66, %70 : vector<2x32xf32>
    %c0_22 = arith.constant 0 : index
    %c2 = arith.constant 2 : index
    %72 = vector.load %arg0[%c0_22, %c2] : memref<2x8xf32, #tpu.memory_space<vmem>>, vector<2x1xf32>
    %73 = tpu.concatenate %72, %52 in 1 : vector<2x1xf32>, vector<2x32xf32> -> vector<2x33xf32>
    %c0_23 = arith.constant 0 : index
    %c0_24 = arith.constant 0 : index
    %74 = vector.load %arg1[%c0_23, %c0_24] : memref<33x128xf32, #tpu.memory_space<vmem>>, vector<33x128xf32>
    %cst_25 = arith.constant dense<0.000000e+00> : vector<2x128xf32>
    %75 = tpu.matmul %73, %74, %cst_25 {dimension_numbers = #tpu.dot_dimension_numbers<[1], [0], [0], [1], [0, 0, 1, 1], [], []>} : vector<2x33xf32>, vector<33x128xf32>, vector<2x128xf32> -> vector<2x128xf32>
    %76 = arith.addf %75, %3 : vector<2x128xf32>
    %77 = arith.negf %76 : vector<2x128xf32>
    %78 = math.exp %77 : vector<2x128xf32>
    %cst_26 = arith.constant 1.000000e+00 : f32
    %79 = vector.broadcast %cst_26 : f32 to vector<2x128xf32>
    %80 = arith.addf %79, %78 : vector<2x128xf32>
    %81 = arith.divf %79, %80 : vector<2x128xf32>
    %82 = math.tanh %76 : vector<2x128xf32>
    %83 = vector.extract_strided_slice %81 {offsets = [0, 0], sizes = [2, 32], strides = [1, 1]} : vector<2x128xf32> to vector<2x32xf32>
    %84 = vector.extract_strided_slice %81 {offsets = [0, 32], sizes = [2, 32], strides = [1, 1]} : vector<2x128xf32> to vector<2x32xf32>
    %85 = vector.extract_strided_slice %82 {offsets = [0, 64], sizes = [2, 32], strides = [1, 1]} : vector<2x128xf32> to vector<2x32xf32>
    %86 = vector.extract_strided_slice %81 {offsets = [0, 96], sizes = [2, 32], strides = [1, 1]} : vector<2x128xf32> to vector<2x32xf32>
    %87 = arith.mulf %84, %50 : vector<2x32xf32>
    %88 = arith.mulf %83, %85 : vector<2x32xf32>
    %89 = arith.addf %87, %88 : vector<2x32xf32>
    %90 = math.tanh %89 : vector<2x32xf32>
    %91 = arith.mulf %86, %90 : vector<2x32xf32>
    %92 = tpu.concatenate %52, %71 in 1 : vector<2x32xf32>, vector<2x32xf32> -> vector<2x64xf32>
    %c0_27 = arith.constant 0 : index
    %c0_28 = arith.constant 0 : index
    %93 = vector.load %arg3[%c0_27, %c0_28] : memref<64x128xf32, #tpu.memory_space<vmem>>, vector<64x128xf32>
    %cst_29 = arith.constant dense<0.000000e+00> : vector<2x128xf32>
    %94 = tpu.matmul %92, %93, %cst_29 {dimension_numbers = #tpu.dot_dimension_numbers<[1], [0], [0], [1], [0, 0, 1, 1], [], []>} : vector<2x64xf32>, vector<64x128xf32>, vector<2x128xf32> -> vector<2x128xf32>
    %95 = arith.addf %94, %6 : vector<2x128xf32>
    %96 = arith.negf %95 : vector<2x128xf32>
    %97 = math.exp %96 : vector<2x128xf32>
    %cst_30 = arith.constant 1.000000e+00 : f32
    %98 = vector.broadcast %cst_30 : f32 to vector<2x128xf32>
    %99 = arith.addf %98, %97 : vector<2x128xf32>
    %100 = arith.divf %98, %99 : vector<2x128xf32>
    %101 = math.tanh %95 : vector<2x128xf32>
    %102 = vector.extract_strided_slice %100 {offsets = [0, 0], sizes = [2, 32], strides = [1, 1]} : vector<2x128xf32> to vector<2x32xf32>
    %103 = vector.extract_strided_slice %100 {offsets = [0, 32], sizes = [2, 32], strides = [1, 1]} : vector<2x128xf32> to vector<2x32xf32>
    %104 = vector.extract_strided_slice %101 {offsets = [0, 64], sizes = [2, 32], strides = [1, 1]} : vector<2x128xf32> to vector<2x32xf32>
    %105 = vector.extract_strided_slice %100 {offsets = [0, 96], sizes = [2, 32], strides = [1, 1]} : vector<2x128xf32> to vector<2x32xf32>
    %106 = arith.mulf %103, %69 : vector<2x32xf32>
    %107 = arith.mulf %102, %104 : vector<2x32xf32>
    %108 = arith.addf %106, %107 : vector<2x32xf32>
    %109 = math.tanh %108 : vector<2x32xf32>
    %110 = arith.mulf %105, %109 : vector<2x32xf32>
    %111 = tpu.concatenate %71, %0 in 1 : vector<2x32xf32>, vector<2x32xf32> -> vector<2x64xf32>
    %c0_31 = arith.constant 0 : index
    %c0_32 = arith.constant 0 : index
    %112 = vector.load %arg5[%c0_31, %c0_32] : memref<64x128xf32, #tpu.memory_space<vmem>>, vector<64x128xf32>
    %cst_33 = arith.constant dense<0.000000e+00> : vector<2x128xf32>
    %113 = tpu.matmul %111, %112, %cst_33 {dimension_numbers = #tpu.dot_dimension_numbers<[1], [0], [0], [1], [0, 0, 1, 1], [], []>} : vector<2x64xf32>, vector<64x128xf32>, vector<2x128xf32> -> vector<2x128xf32>
    %114 = arith.addf %113, %9 : vector<2x128xf32>
    %115 = arith.negf %114 : vector<2x128xf32>
    %116 = math.exp %115 : vector<2x128xf32>
    %cst_34 = arith.constant 1.000000e+00 : f32
    %117 = vector.broadcast %cst_34 : f32 to vector<2x128xf32>
    %118 = arith.addf %117, %116 : vector<2x128xf32>
    %119 = arith.divf %117, %118 : vector<2x128xf32>
    %120 = math.tanh %114 : vector<2x128xf32>
    %121 = vector.extract_strided_slice %119 {offsets = [0, 0], sizes = [2, 32], strides = [1, 1]} : vector<2x128xf32> to vector<2x32xf32>
    %122 = vector.extract_strided_slice %119 {offsets = [0, 32], sizes = [2, 32], strides = [1, 1]} : vector<2x128xf32> to vector<2x32xf32>
    %123 = vector.extract_strided_slice %120 {offsets = [0, 64], sizes = [2, 32], strides = [1, 1]} : vector<2x128xf32> to vector<2x32xf32>
    %124 = vector.extract_strided_slice %119 {offsets = [0, 96], sizes = [2, 32], strides = [1, 1]} : vector<2x128xf32> to vector<2x32xf32>
    %125 = arith.mulf %122, %0 : vector<2x32xf32>
    %126 = arith.mulf %121, %123 : vector<2x32xf32>
    %127 = arith.addf %125, %126 : vector<2x32xf32>
    %128 = math.tanh %127 : vector<2x32xf32>
    %129 = arith.mulf %124, %128 : vector<2x32xf32>
    %c0_35 = arith.constant 0 : index
    %c3 = arith.constant 3 : index
    %130 = vector.load %arg0[%c0_35, %c3] : memref<2x8xf32, #tpu.memory_space<vmem>>, vector<2x1xf32>
    %131 = tpu.concatenate %130, %91 in 1 : vector<2x1xf32>, vector<2x32xf32> -> vector<2x33xf32>
    %c0_36 = arith.constant 0 : index
    %c0_37 = arith.constant 0 : index
    %132 = vector.load %arg1[%c0_36, %c0_37] : memref<33x128xf32, #tpu.memory_space<vmem>>, vector<33x128xf32>
    %cst_38 = arith.constant dense<0.000000e+00> : vector<2x128xf32>
    %133 = tpu.matmul %131, %132, %cst_38 {dimension_numbers = #tpu.dot_dimension_numbers<[1], [0], [0], [1], [0, 0, 1, 1], [], []>} : vector<2x33xf32>, vector<33x128xf32>, vector<2x128xf32> -> vector<2x128xf32>
    %134 = arith.addf %133, %3 : vector<2x128xf32>
    %135 = arith.negf %134 : vector<2x128xf32>
    %136 = math.exp %135 : vector<2x128xf32>
    %cst_39 = arith.constant 1.000000e+00 : f32
    %137 = vector.broadcast %cst_39 : f32 to vector<2x128xf32>
    %138 = arith.addf %137, %136 : vector<2x128xf32>
    %139 = arith.divf %137, %138 : vector<2x128xf32>
    %140 = math.tanh %134 : vector<2x128xf32>
    %141 = vector.extract_strided_slice %139 {offsets = [0, 0], sizes = [2, 32], strides = [1, 1]} : vector<2x128xf32> to vector<2x32xf32>
    %142 = vector.extract_strided_slice %139 {offsets = [0, 32], sizes = [2, 32], strides = [1, 1]} : vector<2x128xf32> to vector<2x32xf32>
    %143 = vector.extract_strided_slice %140 {offsets = [0, 64], sizes = [2, 32], strides = [1, 1]} : vector<2x128xf32> to vector<2x32xf32>
    %144 = vector.extract_strided_slice %139 {offsets = [0, 96], sizes = [2, 32], strides = [1, 1]} : vector<2x128xf32> to vector<2x32xf32>
    %145 = arith.mulf %142, %89 : vector<2x32xf32>
    %146 = arith.mulf %141, %143 : vector<2x32xf32>
    %147 = arith.addf %145, %146 : vector<2x32xf32>
    %148 = math.tanh %147 : vector<2x32xf32>
    %149 = arith.mulf %144, %148 : vector<2x32xf32>
    %150 = tpu.concatenate %91, %110 in 1 : vector<2x32xf32>, vector<2x32xf32> -> vector<2x64xf32>
    %c0_40 = arith.constant 0 : index
    %c0_41 = arith.constant 0 : index
    %151 = vector.load %arg3[%c0_40, %c0_41] : memref<64x128xf32, #tpu.memory_space<vmem>>, vector<64x128xf32>
    %cst_42 = arith.constant dense<0.000000e+00> : vector<2x128xf32>
    %152 = tpu.matmul %150, %151, %cst_42 {dimension_numbers = #tpu.dot_dimension_numbers<[1], [0], [0], [1], [0, 0, 1, 1], [], []>} : vector<2x64xf32>, vector<64x128xf32>, vector<2x128xf32> -> vector<2x128xf32>
    %153 = arith.addf %152, %6 : vector<2x128xf32>
    %154 = arith.negf %153 : vector<2x128xf32>
    %155 = math.exp %154 : vector<2x128xf32>
    %cst_43 = arith.constant 1.000000e+00 : f32
    %156 = vector.broadcast %cst_43 : f32 to vector<2x128xf32>
    %157 = arith.addf %156, %155 : vector<2x128xf32>
    %158 = arith.divf %156, %157 : vector<2x128xf32>
    %159 = math.tanh %153 : vector<2x128xf32>
    %160 = vector.extract_strided_slice %158 {offsets = [0, 0], sizes = [2, 32], strides = [1, 1]} : vector<2x128xf32> to vector<2x32xf32>
    %161 = vector.extract_strided_slice %158 {offsets = [0, 32], sizes = [2, 32], strides = [1, 1]} : vector<2x128xf32> to vector<2x32xf32>
    %162 = vector.extract_strided_slice %159 {offsets = [0, 64], sizes = [2, 32], strides = [1, 1]} : vector<2x128xf32> to vector<2x32xf32>
    %163 = vector.extract_strided_slice %158 {offsets = [0, 96], sizes = [2, 32], strides = [1, 1]} : vector<2x128xf32> to vector<2x32xf32>
    %164 = arith.mulf %161, %108 : vector<2x32xf32>
    %165 = arith.mulf %160, %162 : vector<2x32xf32>
    %166 = arith.addf %164, %165 : vector<2x32xf32>
    %167 = math.tanh %166 : vector<2x32xf32>
    %168 = arith.mulf %163, %167 : vector<2x32xf32>
    %169 = tpu.concatenate %110, %129 in 1 : vector<2x32xf32>, vector<2x32xf32> -> vector<2x64xf32>
    %c0_44 = arith.constant 0 : index
    %c0_45 = arith.constant 0 : index
    %170 = vector.load %arg5[%c0_44, %c0_45] : memref<64x128xf32, #tpu.memory_space<vmem>>, vector<64x128xf32>
    %cst_46 = arith.constant dense<0.000000e+00> : vector<2x128xf32>
    %171 = tpu.matmul %169, %170, %cst_46 {dimension_numbers = #tpu.dot_dimension_numbers<[1], [0], [0], [1], [0, 0, 1, 1], [], []>} : vector<2x64xf32>, vector<64x128xf32>, vector<2x128xf32> -> vector<2x128xf32>
    %172 = arith.addf %171, %9 : vector<2x128xf32>
    %173 = arith.negf %172 : vector<2x128xf32>
    %174 = math.exp %173 : vector<2x128xf32>
    %cst_47 = arith.constant 1.000000e+00 : f32
    %175 = vector.broadcast %cst_47 : f32 to vector<2x128xf32>
    %176 = arith.addf %175, %174 : vector<2x128xf32>
    %177 = arith.divf %175, %176 : vector<2x128xf32>
    %178 = math.tanh %172 : vector<2x128xf32>
    %179 = vector.extract_strided_slice %177 {offsets = [0, 0], sizes = [2, 32], strides = [1, 1]} : vector<2x128xf32> to vector<2x32xf32>
    %180 = vector.extract_strided_slice %177 {offsets = [0, 32], sizes = [2, 32], strides = [1, 1]} : vector<2x128xf32> to vector<2x32xf32>
    %181 = vector.extract_strided_slice %178 {offsets = [0, 64], sizes = [2, 32], strides = [1, 1]} : vector<2x128xf32> to vector<2x32xf32>
    %182 = vector.extract_strided_slice %177 {offsets = [0, 96], sizes = [2, 32], strides = [1, 1]} : vector<2x128xf32> to vector<2x32xf32>
    %183 = arith.mulf %180, %127 : vector<2x32xf32>
    %184 = arith.mulf %179, %181 : vector<2x32xf32>
    %185 = arith.addf %183, %184 : vector<2x32xf32>
    %186 = math.tanh %185 : vector<2x32xf32>
    %187 = arith.mulf %182, %186 : vector<2x32xf32>
    %c0_48 = arith.constant 0 : index
    %c4 = arith.constant 4 : index
    %188 = vector.load %arg0[%c0_48, %c4] : memref<2x8xf32, #tpu.memory_space<vmem>>, vector<2x1xf32>
    %189 = tpu.concatenate %188, %149 in 1 : vector<2x1xf32>, vector<2x32xf32> -> vector<2x33xf32>
    %c0_49 = arith.constant 0 : index
    %c0_50 = arith.constant 0 : index
    %190 = vector.load %arg1[%c0_49, %c0_50] : memref<33x128xf32, #tpu.memory_space<vmem>>, vector<33x128xf32>
    %cst_51 = arith.constant dense<0.000000e+00> : vector<2x128xf32>
    %191 = tpu.matmul %189, %190, %cst_51 {dimension_numbers = #tpu.dot_dimension_numbers<[1], [0], [0], [1], [0, 0, 1, 1], [], []>} : vector<2x33xf32>, vector<33x128xf32>, vector<2x128xf32> -> vector<2x128xf32>
    %192 = arith.addf %191, %3 : vector<2x128xf32>
    %193 = arith.negf %192 : vector<2x128xf32>
    %194 = math.exp %193 : vector<2x128xf32>
    %cst_52 = arith.constant 1.000000e+00 : f32
    %195 = vector.broadcast %cst_52 : f32 to vector<2x128xf32>
    %196 = arith.addf %195, %194 : vector<2x128xf32>
    %197 = arith.divf %195, %196 : vector<2x128xf32>
    %198 = math.tanh %192 : vector<2x128xf32>
    %199 = vector.extract_strided_slice %197 {offsets = [0, 0], sizes = [2, 32], strides = [1, 1]} : vector<2x128xf32> to vector<2x32xf32>
    %200 = vector.extract_strided_slice %197 {offsets = [0, 32], sizes = [2, 32], strides = [1, 1]} : vector<2x128xf32> to vector<2x32xf32>
    %201 = vector.extract_strided_slice %198 {offsets = [0, 64], sizes = [2, 32], strides = [1, 1]} : vector<2x128xf32> to vector<2x32xf32>
    %202 = vector.extract_strided_slice %197 {offsets = [0, 96], sizes = [2, 32], strides = [1, 1]} : vector<2x128xf32> to vector<2x32xf32>
    %203 = arith.mulf %200, %147 : vector<2x32xf32>
    %204 = arith.mulf %199, %201 : vector<2x32xf32>
    %205 = arith.addf %203, %204 : vector<2x32xf32>
    %206 = math.tanh %205 : vector<2x32xf32>
    %207 = arith.mulf %202, %206 : vector<2x32xf32>
    %208 = tpu.concatenate %149, %168 in 1 : vector<2x32xf32>, vector<2x32xf32> -> vector<2x64xf32>
    %c0_53 = arith.constant 0 : index
    %c0_54 = arith.constant 0 : index
    %209 = vector.load %arg3[%c0_53, %c0_54] : memref<64x128xf32, #tpu.memory_space<vmem>>, vector<64x128xf32>
    %cst_55 = arith.constant dense<0.000000e+00> : vector<2x128xf32>
    %210 = tpu.matmul %208, %209, %cst_55 {dimension_numbers = #tpu.dot_dimension_numbers<[1], [0], [0], [1], [0, 0, 1, 1], [], []>} : vector<2x64xf32>, vector<64x128xf32>, vector<2x128xf32> -> vector<2x128xf32>
    %211 = arith.addf %210, %6 : vector<2x128xf32>
    %212 = arith.negf %211 : vector<2x128xf32>
    %213 = math.exp %212 : vector<2x128xf32>
    %cst_56 = arith.constant 1.000000e+00 : f32
    %214 = vector.broadcast %cst_56 : f32 to vector<2x128xf32>
    %215 = arith.addf %214, %213 : vector<2x128xf32>
    %216 = arith.divf %214, %215 : vector<2x128xf32>
    %217 = math.tanh %211 : vector<2x128xf32>
    %218 = vector.extract_strided_slice %216 {offsets = [0, 0], sizes = [2, 32], strides = [1, 1]} : vector<2x128xf32> to vector<2x32xf32>
    %219 = vector.extract_strided_slice %216 {offsets = [0, 32], sizes = [2, 32], strides = [1, 1]} : vector<2x128xf32> to vector<2x32xf32>
    %220 = vector.extract_strided_slice %217 {offsets = [0, 64], sizes = [2, 32], strides = [1, 1]} : vector<2x128xf32> to vector<2x32xf32>
    %221 = vector.extract_strided_slice %216 {offsets = [0, 96], sizes = [2, 32], strides = [1, 1]} : vector<2x128xf32> to vector<2x32xf32>
    %222 = arith.mulf %219, %166 : vector<2x32xf32>
    %223 = arith.mulf %218, %220 : vector<2x32xf32>
    %224 = arith.addf %222, %223 : vector<2x32xf32>
    %225 = math.tanh %224 : vector<2x32xf32>
    %226 = arith.mulf %221, %225 : vector<2x32xf32>
    %227 = tpu.concatenate %168, %187 in 1 : vector<2x32xf32>, vector<2x32xf32> -> vector<2x64xf32>
    %c0_57 = arith.constant 0 : index
    %c0_58 = arith.constant 0 : index
    %228 = vector.load %arg5[%c0_57, %c0_58] : memref<64x128xf32, #tpu.memory_space<vmem>>, vector<64x128xf32>
    %cst_59 = arith.constant dense<0.000000e+00> : vector<2x128xf32>
    %229 = tpu.matmul %227, %228, %cst_59 {dimension_numbers = #tpu.dot_dimension_numbers<[1], [0], [0], [1], [0, 0, 1, 1], [], []>} : vector<2x64xf32>, vector<64x128xf32>, vector<2x128xf32> -> vector<2x128xf32>
    %230 = arith.addf %229, %9 : vector<2x128xf32>
    %231 = arith.negf %230 : vector<2x128xf32>
    %232 = math.exp %231 : vector<2x128xf32>
    %cst_60 = arith.constant 1.000000e+00 : f32
    %233 = vector.broadcast %cst_60 : f32 to vector<2x128xf32>
    %234 = arith.addf %233, %232 : vector<2x128xf32>
    %235 = arith.divf %233, %234 : vector<2x128xf32>
    %236 = math.tanh %230 : vector<2x128xf32>
    %237 = vector.extract_strided_slice %235 {offsets = [0, 0], sizes = [2, 32], strides = [1, 1]} : vector<2x128xf32> to vector<2x32xf32>
    %238 = vector.extract_strided_slice %235 {offsets = [0, 32], sizes = [2, 32], strides = [1, 1]} : vector<2x128xf32> to vector<2x32xf32>
    %239 = vector.extract_strided_slice %236 {offsets = [0, 64], sizes = [2, 32], strides = [1, 1]} : vector<2x128xf32> to vector<2x32xf32>
    %240 = vector.extract_strided_slice %235 {offsets = [0, 96], sizes = [2, 32], strides = [1, 1]} : vector<2x128xf32> to vector<2x32xf32>
    %241 = arith.mulf %238, %185 : vector<2x32xf32>
    %242 = arith.mulf %237, %239 : vector<2x32xf32>
    %243 = arith.addf %241, %242 : vector<2x32xf32>
    %244 = math.tanh %243 : vector<2x32xf32>
    %245 = arith.mulf %240, %244 : vector<2x32xf32>
    %c0_61 = arith.constant 0 : index
    %c5 = arith.constant 5 : index
    %246 = vector.load %arg0[%c0_61, %c5] : memref<2x8xf32, #tpu.memory_space<vmem>>, vector<2x1xf32>
    %247 = tpu.concatenate %246, %207 in 1 : vector<2x1xf32>, vector<2x32xf32> -> vector<2x33xf32>
    %c0_62 = arith.constant 0 : index
    %c0_63 = arith.constant 0 : index
    %248 = vector.load %arg1[%c0_62, %c0_63] : memref<33x128xf32, #tpu.memory_space<vmem>>, vector<33x128xf32>
    %cst_64 = arith.constant dense<0.000000e+00> : vector<2x128xf32>
    %249 = tpu.matmul %247, %248, %cst_64 {dimension_numbers = #tpu.dot_dimension_numbers<[1], [0], [0], [1], [0, 0, 1, 1], [], []>} : vector<2x33xf32>, vector<33x128xf32>, vector<2x128xf32> -> vector<2x128xf32>
    %250 = arith.addf %249, %3 : vector<2x128xf32>
    %251 = arith.negf %250 : vector<2x128xf32>
    %252 = math.exp %251 : vector<2x128xf32>
    %cst_65 = arith.constant 1.000000e+00 : f32
    %253 = vector.broadcast %cst_65 : f32 to vector<2x128xf32>
    %254 = arith.addf %253, %252 : vector<2x128xf32>
    %255 = arith.divf %253, %254 : vector<2x128xf32>
    %256 = math.tanh %250 : vector<2x128xf32>
    %257 = vector.extract_strided_slice %255 {offsets = [0, 0], sizes = [2, 32], strides = [1, 1]} : vector<2x128xf32> to vector<2x32xf32>
    %258 = vector.extract_strided_slice %255 {offsets = [0, 32], sizes = [2, 32], strides = [1, 1]} : vector<2x128xf32> to vector<2x32xf32>
    %259 = vector.extract_strided_slice %256 {offsets = [0, 64], sizes = [2, 32], strides = [1, 1]} : vector<2x128xf32> to vector<2x32xf32>
    %260 = vector.extract_strided_slice %255 {offsets = [0, 96], sizes = [2, 32], strides = [1, 1]} : vector<2x128xf32> to vector<2x32xf32>
    %261 = arith.mulf %258, %205 : vector<2x32xf32>
    %262 = arith.mulf %257, %259 : vector<2x32xf32>
    %263 = arith.addf %261, %262 : vector<2x32xf32>
    %264 = math.tanh %263 : vector<2x32xf32>
    %265 = arith.mulf %260, %264 : vector<2x32xf32>
    %266 = tpu.concatenate %207, %226 in 1 : vector<2x32xf32>, vector<2x32xf32> -> vector<2x64xf32>
    %c0_66 = arith.constant 0 : index
    %c0_67 = arith.constant 0 : index
    %267 = vector.load %arg3[%c0_66, %c0_67] : memref<64x128xf32, #tpu.memory_space<vmem>>, vector<64x128xf32>
    %cst_68 = arith.constant dense<0.000000e+00> : vector<2x128xf32>
    %268 = tpu.matmul %266, %267, %cst_68 {dimension_numbers = #tpu.dot_dimension_numbers<[1], [0], [0], [1], [0, 0, 1, 1], [], []>} : vector<2x64xf32>, vector<64x128xf32>, vector<2x128xf32> -> vector<2x128xf32>
    %269 = arith.addf %268, %6 : vector<2x128xf32>
    %270 = arith.negf %269 : vector<2x128xf32>
    %271 = math.exp %270 : vector<2x128xf32>
    %cst_69 = arith.constant 1.000000e+00 : f32
    %272 = vector.broadcast %cst_69 : f32 to vector<2x128xf32>
    %273 = arith.addf %272, %271 : vector<2x128xf32>
    %274 = arith.divf %272, %273 : vector<2x128xf32>
    %275 = math.tanh %269 : vector<2x128xf32>
    %276 = vector.extract_strided_slice %274 {offsets = [0, 0], sizes = [2, 32], strides = [1, 1]} : vector<2x128xf32> to vector<2x32xf32>
    %277 = vector.extract_strided_slice %274 {offsets = [0, 32], sizes = [2, 32], strides = [1, 1]} : vector<2x128xf32> to vector<2x32xf32>
    %278 = vector.extract_strided_slice %275 {offsets = [0, 64], sizes = [2, 32], strides = [1, 1]} : vector<2x128xf32> to vector<2x32xf32>
    %279 = vector.extract_strided_slice %274 {offsets = [0, 96], sizes = [2, 32], strides = [1, 1]} : vector<2x128xf32> to vector<2x32xf32>
    %280 = arith.mulf %277, %224 : vector<2x32xf32>
    %281 = arith.mulf %276, %278 : vector<2x32xf32>
    %282 = arith.addf %280, %281 : vector<2x32xf32>
    %283 = math.tanh %282 : vector<2x32xf32>
    %284 = arith.mulf %279, %283 : vector<2x32xf32>
    %285 = tpu.concatenate %226, %245 in 1 : vector<2x32xf32>, vector<2x32xf32> -> vector<2x64xf32>
    %c0_70 = arith.constant 0 : index
    %c0_71 = arith.constant 0 : index
    %286 = vector.load %arg5[%c0_70, %c0_71] : memref<64x128xf32, #tpu.memory_space<vmem>>, vector<64x128xf32>
    %cst_72 = arith.constant dense<0.000000e+00> : vector<2x128xf32>
    %287 = tpu.matmul %285, %286, %cst_72 {dimension_numbers = #tpu.dot_dimension_numbers<[1], [0], [0], [1], [0, 0, 1, 1], [], []>} : vector<2x64xf32>, vector<64x128xf32>, vector<2x128xf32> -> vector<2x128xf32>
    %288 = arith.addf %287, %9 : vector<2x128xf32>
    %289 = arith.negf %288 : vector<2x128xf32>
    %290 = math.exp %289 : vector<2x128xf32>
    %cst_73 = arith.constant 1.000000e+00 : f32
    %291 = vector.broadcast %cst_73 : f32 to vector<2x128xf32>
    %292 = arith.addf %291, %290 : vector<2x128xf32>
    %293 = arith.divf %291, %292 : vector<2x128xf32>
    %294 = math.tanh %288 : vector<2x128xf32>
    %295 = vector.extract_strided_slice %293 {offsets = [0, 0], sizes = [2, 32], strides = [1, 1]} : vector<2x128xf32> to vector<2x32xf32>
    %296 = vector.extract_strided_slice %293 {offsets = [0, 32], sizes = [2, 32], strides = [1, 1]} : vector<2x128xf32> to vector<2x32xf32>
    %297 = vector.extract_strided_slice %294 {offsets = [0, 64], sizes = [2, 32], strides = [1, 1]} : vector<2x128xf32> to vector<2x32xf32>
    %298 = vector.extract_strided_slice %293 {offsets = [0, 96], sizes = [2, 32], strides = [1, 1]} : vector<2x128xf32> to vector<2x32xf32>
    %299 = arith.mulf %296, %243 : vector<2x32xf32>
    %300 = arith.mulf %295, %297 : vector<2x32xf32>
    %301 = arith.addf %299, %300 : vector<2x32xf32>
    %302 = math.tanh %301 : vector<2x32xf32>
    %303 = arith.mulf %298, %302 : vector<2x32xf32>
    %c0_74 = arith.constant 0 : index
    %c6 = arith.constant 6 : index
    %304 = vector.load %arg0[%c0_74, %c6] : memref<2x8xf32, #tpu.memory_space<vmem>>, vector<2x1xf32>
    %305 = tpu.concatenate %304, %265 in 1 : vector<2x1xf32>, vector<2x32xf32> -> vector<2x33xf32>
    %c0_75 = arith.constant 0 : index
    %c0_76 = arith.constant 0 : index
    %306 = vector.load %arg1[%c0_75, %c0_76] : memref<33x128xf32, #tpu.memory_space<vmem>>, vector<33x128xf32>
    %cst_77 = arith.constant dense<0.000000e+00> : vector<2x128xf32>
    %307 = tpu.matmul %305, %306, %cst_77 {dimension_numbers = #tpu.dot_dimension_numbers<[1], [0], [0], [1], [0, 0, 1, 1], [], []>} : vector<2x33xf32>, vector<33x128xf32>, vector<2x128xf32> -> vector<2x128xf32>
    %308 = arith.addf %307, %3 : vector<2x128xf32>
    %309 = arith.negf %308 : vector<2x128xf32>
    %310 = math.exp %309 : vector<2x128xf32>
    %cst_78 = arith.constant 1.000000e+00 : f32
    %311 = vector.broadcast %cst_78 : f32 to vector<2x128xf32>
    %312 = arith.addf %311, %310 : vector<2x128xf32>
    %313 = arith.divf %311, %312 : vector<2x128xf32>
    %314 = math.tanh %308 : vector<2x128xf32>
    %315 = vector.extract_strided_slice %313 {offsets = [0, 0], sizes = [2, 32], strides = [1, 1]} : vector<2x128xf32> to vector<2x32xf32>
    %316 = vector.extract_strided_slice %313 {offsets = [0, 32], sizes = [2, 32], strides = [1, 1]} : vector<2x128xf32> to vector<2x32xf32>
    %317 = vector.extract_strided_slice %314 {offsets = [0, 64], sizes = [2, 32], strides = [1, 1]} : vector<2x128xf32> to vector<2x32xf32>
    %318 = vector.extract_strided_slice %313 {offsets = [0, 96], sizes = [2, 32], strides = [1, 1]} : vector<2x128xf32> to vector<2x32xf32>
    %319 = arith.mulf %316, %263 : vector<2x32xf32>
    %320 = arith.mulf %315, %317 : vector<2x32xf32>
    %321 = arith.addf %319, %320 : vector<2x32xf32>
    %322 = math.tanh %321 : vector<2x32xf32>
    %323 = arith.mulf %318, %322 : vector<2x32xf32>
    %324 = tpu.concatenate %265, %284 in 1 : vector<2x32xf32>, vector<2x32xf32> -> vector<2x64xf32>
    %c0_79 = arith.constant 0 : index
    %c0_80 = arith.constant 0 : index
    %325 = vector.load %arg3[%c0_79, %c0_80] : memref<64x128xf32, #tpu.memory_space<vmem>>, vector<64x128xf32>
    %cst_81 = arith.constant dense<0.000000e+00> : vector<2x128xf32>
    %326 = tpu.matmul %324, %325, %cst_81 {dimension_numbers = #tpu.dot_dimension_numbers<[1], [0], [0], [1], [0, 0, 1, 1], [], []>} : vector<2x64xf32>, vector<64x128xf32>, vector<2x128xf32> -> vector<2x128xf32>
    %327 = arith.addf %326, %6 : vector<2x128xf32>
    %328 = arith.negf %327 : vector<2x128xf32>
    %329 = math.exp %328 : vector<2x128xf32>
    %cst_82 = arith.constant 1.000000e+00 : f32
    %330 = vector.broadcast %cst_82 : f32 to vector<2x128xf32>
    %331 = arith.addf %330, %329 : vector<2x128xf32>
    %332 = arith.divf %330, %331 : vector<2x128xf32>
    %333 = math.tanh %327 : vector<2x128xf32>
    %334 = vector.extract_strided_slice %332 {offsets = [0, 0], sizes = [2, 32], strides = [1, 1]} : vector<2x128xf32> to vector<2x32xf32>
    %335 = vector.extract_strided_slice %332 {offsets = [0, 32], sizes = [2, 32], strides = [1, 1]} : vector<2x128xf32> to vector<2x32xf32>
    %336 = vector.extract_strided_slice %333 {offsets = [0, 64], sizes = [2, 32], strides = [1, 1]} : vector<2x128xf32> to vector<2x32xf32>
    %337 = vector.extract_strided_slice %332 {offsets = [0, 96], sizes = [2, 32], strides = [1, 1]} : vector<2x128xf32> to vector<2x32xf32>
    %338 = arith.mulf %335, %282 : vector<2x32xf32>
    %339 = arith.mulf %334, %336 : vector<2x32xf32>
    %340 = arith.addf %338, %339 : vector<2x32xf32>
    %341 = math.tanh %340 : vector<2x32xf32>
    %342 = arith.mulf %337, %341 : vector<2x32xf32>
    %343 = tpu.concatenate %284, %303 in 1 : vector<2x32xf32>, vector<2x32xf32> -> vector<2x64xf32>
    %c0_83 = arith.constant 0 : index
    %c0_84 = arith.constant 0 : index
    %344 = vector.load %arg5[%c0_83, %c0_84] : memref<64x128xf32, #tpu.memory_space<vmem>>, vector<64x128xf32>
    %cst_85 = arith.constant dense<0.000000e+00> : vector<2x128xf32>
    %345 = tpu.matmul %343, %344, %cst_85 {dimension_numbers = #tpu.dot_dimension_numbers<[1], [0], [0], [1], [0, 0, 1, 1], [], []>} : vector<2x64xf32>, vector<64x128xf32>, vector<2x128xf32> -> vector<2x128xf32>
    %346 = arith.addf %345, %9 : vector<2x128xf32>
    %347 = arith.negf %346 : vector<2x128xf32>
    %348 = math.exp %347 : vector<2x128xf32>
    %cst_86 = arith.constant 1.000000e+00 : f32
    %349 = vector.broadcast %cst_86 : f32 to vector<2x128xf32>
    %350 = arith.addf %349, %348 : vector<2x128xf32>
    %351 = arith.divf %349, %350 : vector<2x128xf32>
    %352 = math.tanh %346 : vector<2x128xf32>
    %353 = vector.extract_strided_slice %351 {offsets = [0, 0], sizes = [2, 32], strides = [1, 1]} : vector<2x128xf32> to vector<2x32xf32>
    %354 = vector.extract_strided_slice %351 {offsets = [0, 32], sizes = [2, 32], strides = [1, 1]} : vector<2x128xf32> to vector<2x32xf32>
    %355 = vector.extract_strided_slice %352 {offsets = [0, 64], sizes = [2, 32], strides = [1, 1]} : vector<2x128xf32> to vector<2x32xf32>
    %356 = vector.extract_strided_slice %351 {offsets = [0, 96], sizes = [2, 32], strides = [1, 1]} : vector<2x128xf32> to vector<2x32xf32>
    %357 = arith.mulf %354, %301 : vector<2x32xf32>
    %358 = arith.mulf %353, %355 : vector<2x32xf32>
    %359 = arith.addf %357, %358 : vector<2x32xf32>
    %360 = math.tanh %359 : vector<2x32xf32>
    %361 = arith.mulf %356, %360 : vector<2x32xf32>
    %c0_87 = arith.constant 0 : index
    %c7 = arith.constant 7 : index
    %362 = vector.load %arg0[%c0_87, %c7] : memref<2x8xf32, #tpu.memory_space<vmem>>, vector<2x1xf32>
    %363 = tpu.concatenate %362, %323 in 1 : vector<2x1xf32>, vector<2x32xf32> -> vector<2x33xf32>
    %c0_88 = arith.constant 0 : index
    %c0_89 = arith.constant 0 : index
    %364 = vector.load %arg1[%c0_88, %c0_89] : memref<33x128xf32, #tpu.memory_space<vmem>>, vector<33x128xf32>
    %cst_90 = arith.constant dense<0.000000e+00> : vector<2x128xf32>
    %365 = tpu.matmul %363, %364, %cst_90 {dimension_numbers = #tpu.dot_dimension_numbers<[1], [0], [0], [1], [0, 0, 1, 1], [], []>} : vector<2x33xf32>, vector<33x128xf32>, vector<2x128xf32> -> vector<2x128xf32>
    %366 = arith.addf %365, %3 : vector<2x128xf32>
    %367 = arith.negf %366 : vector<2x128xf32>
    %368 = math.exp %367 : vector<2x128xf32>
    %cst_91 = arith.constant 1.000000e+00 : f32
    %369 = vector.broadcast %cst_91 : f32 to vector<2x128xf32>
    %370 = arith.addf %369, %368 : vector<2x128xf32>
    %371 = arith.divf %369, %370 : vector<2x128xf32>
    %372 = math.tanh %366 : vector<2x128xf32>
    %373 = vector.extract_strided_slice %371 {offsets = [0, 0], sizes = [2, 32], strides = [1, 1]} : vector<2x128xf32> to vector<2x32xf32>
    %374 = vector.extract_strided_slice %371 {offsets = [0, 32], sizes = [2, 32], strides = [1, 1]} : vector<2x128xf32> to vector<2x32xf32>
    %375 = vector.extract_strided_slice %372 {offsets = [0, 64], sizes = [2, 32], strides = [1, 1]} : vector<2x128xf32> to vector<2x32xf32>
    %376 = vector.extract_strided_slice %371 {offsets = [0, 96], sizes = [2, 32], strides = [1, 1]} : vector<2x128xf32> to vector<2x32xf32>
    %377 = arith.mulf %374, %321 : vector<2x32xf32>
    %378 = arith.mulf %373, %375 : vector<2x32xf32>
    %379 = arith.addf %377, %378 : vector<2x32xf32>
    %380 = math.tanh %379 : vector<2x32xf32>
    %381 = arith.mulf %376, %380 : vector<2x32xf32>
    %382 = tpu.concatenate %323, %342 in 1 : vector<2x32xf32>, vector<2x32xf32> -> vector<2x64xf32>
    %c0_92 = arith.constant 0 : index
    %c0_93 = arith.constant 0 : index
    %383 = vector.load %arg3[%c0_92, %c0_93] : memref<64x128xf32, #tpu.memory_space<vmem>>, vector<64x128xf32>
    %cst_94 = arith.constant dense<0.000000e+00> : vector<2x128xf32>
    %384 = tpu.matmul %382, %383, %cst_94 {dimension_numbers = #tpu.dot_dimension_numbers<[1], [0], [0], [1], [0, 0, 1, 1], [], []>} : vector<2x64xf32>, vector<64x128xf32>, vector<2x128xf32> -> vector<2x128xf32>
    %385 = arith.addf %384, %6 : vector<2x128xf32>
    %386 = arith.negf %385 : vector<2x128xf32>
    %387 = math.exp %386 : vector<2x128xf32>
    %cst_95 = arith.constant 1.000000e+00 : f32
    %388 = vector.broadcast %cst_95 : f32 to vector<2x128xf32>
    %389 = arith.addf %388, %387 : vector<2x128xf32>
    %390 = arith.divf %388, %389 : vector<2x128xf32>
    %391 = math.tanh %385 : vector<2x128xf32>
    %392 = vector.extract_strided_slice %390 {offsets = [0, 0], sizes = [2, 32], strides = [1, 1]} : vector<2x128xf32> to vector<2x32xf32>
    %393 = vector.extract_strided_slice %390 {offsets = [0, 32], sizes = [2, 32], strides = [1, 1]} : vector<2x128xf32> to vector<2x32xf32>
    %394 = vector.extract_strided_slice %391 {offsets = [0, 64], sizes = [2, 32], strides = [1, 1]} : vector<2x128xf32> to vector<2x32xf32>
    %395 = vector.extract_strided_slice %390 {offsets = [0, 96], sizes = [2, 32], strides = [1, 1]} : vector<2x128xf32> to vector<2x32xf32>
    %396 = arith.mulf %393, %340 : vector<2x32xf32>
    %397 = arith.mulf %392, %394 : vector<2x32xf32>
    %398 = arith.addf %396, %397 : vector<2x32xf32>
    %399 = math.tanh %398 : vector<2x32xf32>
    %400 = arith.mulf %395, %399 : vector<2x32xf32>
    %401 = tpu.concatenate %342, %361 in 1 : vector<2x32xf32>, vector<2x32xf32> -> vector<2x64xf32>
    %c0_96 = arith.constant 0 : index
    %c0_97 = arith.constant 0 : index
    %402 = vector.load %arg5[%c0_96, %c0_97] : memref<64x128xf32, #tpu.memory_space<vmem>>, vector<64x128xf32>
    %cst_98 = arith.constant dense<0.000000e+00> : vector<2x128xf32>
    %403 = tpu.matmul %401, %402, %cst_98 {dimension_numbers = #tpu.dot_dimension_numbers<[1], [0], [0], [1], [0, 0, 1, 1], [], []>} : vector<2x64xf32>, vector<64x128xf32>, vector<2x128xf32> -> vector<2x128xf32>
    %404 = arith.addf %403, %9 : vector<2x128xf32>
    %405 = arith.negf %404 : vector<2x128xf32>
    %406 = math.exp %405 : vector<2x128xf32>
    %cst_99 = arith.constant 1.000000e+00 : f32
    %407 = vector.broadcast %cst_99 : f32 to vector<2x128xf32>
    %408 = arith.addf %407, %406 : vector<2x128xf32>
    %409 = arith.divf %407, %408 : vector<2x128xf32>
    %410 = math.tanh %404 : vector<2x128xf32>
    %411 = vector.extract_strided_slice %409 {offsets = [0, 0], sizes = [2, 32], strides = [1, 1]} : vector<2x128xf32> to vector<2x32xf32>
    %412 = vector.extract_strided_slice %409 {offsets = [0, 32], sizes = [2, 32], strides = [1, 1]} : vector<2x128xf32> to vector<2x32xf32>
    %413 = vector.extract_strided_slice %410 {offsets = [0, 64], sizes = [2, 32], strides = [1, 1]} : vector<2x128xf32> to vector<2x32xf32>
    %414 = vector.extract_strided_slice %409 {offsets = [0, 96], sizes = [2, 32], strides = [1, 1]} : vector<2x128xf32> to vector<2x32xf32>
    %415 = arith.mulf %412, %359 : vector<2x32xf32>
    %416 = arith.mulf %411, %413 : vector<2x32xf32>
    %417 = arith.addf %415, %416 : vector<2x32xf32>
    %418 = math.tanh %417 : vector<2x32xf32>
    %419 = arith.mulf %414, %418 : vector<2x32xf32>
    %420 = tpu.concatenate %381, %400 in 1 : vector<2x32xf32>, vector<2x32xf32> -> vector<2x64xf32>
    %c0_100 = arith.constant 0 : index
    %c0_101 = arith.constant 0 : index
    %421 = vector.load %arg3[%c0_100, %c0_101] : memref<64x128xf32, #tpu.memory_space<vmem>>, vector<64x128xf32>
    %cst_102 = arith.constant dense<0.000000e+00> : vector<2x128xf32>
    %422 = tpu.matmul %420, %421, %cst_102 {dimension_numbers = #tpu.dot_dimension_numbers<[1], [0], [0], [1], [0, 0, 1, 1], [], []>} : vector<2x64xf32>, vector<64x128xf32>, vector<2x128xf32> -> vector<2x128xf32>
    %423 = arith.addf %422, %6 : vector<2x128xf32>
    %424 = arith.negf %423 : vector<2x128xf32>
    %425 = math.exp %424 : vector<2x128xf32>
    %cst_103 = arith.constant 1.000000e+00 : f32
    %426 = vector.broadcast %cst_103 : f32 to vector<2x128xf32>
    %427 = arith.addf %426, %425 : vector<2x128xf32>
    %428 = arith.divf %426, %427 : vector<2x128xf32>
    %429 = math.tanh %423 : vector<2x128xf32>
    %430 = vector.extract_strided_slice %428 {offsets = [0, 0], sizes = [2, 32], strides = [1, 1]} : vector<2x128xf32> to vector<2x32xf32>
    %431 = vector.extract_strided_slice %428 {offsets = [0, 32], sizes = [2, 32], strides = [1, 1]} : vector<2x128xf32> to vector<2x32xf32>
    %432 = vector.extract_strided_slice %429 {offsets = [0, 64], sizes = [2, 32], strides = [1, 1]} : vector<2x128xf32> to vector<2x32xf32>
    %433 = vector.extract_strided_slice %428 {offsets = [0, 96], sizes = [2, 32], strides = [1, 1]} : vector<2x128xf32> to vector<2x32xf32>
    %434 = arith.mulf %431, %398 : vector<2x32xf32>
    %435 = arith.mulf %430, %432 : vector<2x32xf32>
    %436 = arith.addf %434, %435 : vector<2x32xf32>
    %437 = math.tanh %436 : vector<2x32xf32>
    %438 = arith.mulf %433, %437 : vector<2x32xf32>
    %439 = tpu.concatenate %400, %419 in 1 : vector<2x32xf32>, vector<2x32xf32> -> vector<2x64xf32>
    %c0_104 = arith.constant 0 : index
    %c0_105 = arith.constant 0 : index
    %440 = vector.load %arg5[%c0_104, %c0_105] : memref<64x128xf32, #tpu.memory_space<vmem>>, vector<64x128xf32>
    %cst_106 = arith.constant dense<0.000000e+00> : vector<2x128xf32>
    %441 = tpu.matmul %439, %440, %cst_106 {dimension_numbers = #tpu.dot_dimension_numbers<[1], [0], [0], [1], [0, 0, 1, 1], [], []>} : vector<2x64xf32>, vector<64x128xf32>, vector<2x128xf32> -> vector<2x128xf32>
    %442 = arith.addf %441, %9 : vector<2x128xf32>
    %443 = arith.negf %442 : vector<2x128xf32>
    %444 = math.exp %443 : vector<2x128xf32>
    %cst_107 = arith.constant 1.000000e+00 : f32
    %445 = vector.broadcast %cst_107 : f32 to vector<2x128xf32>
    %446 = arith.addf %445, %444 : vector<2x128xf32>
    %447 = arith.divf %445, %446 : vector<2x128xf32>
    %448 = math.tanh %442 : vector<2x128xf32>
    %449 = vector.extract_strided_slice %447 {offsets = [0, 0], sizes = [2, 32], strides = [1, 1]} : vector<2x128xf32> to vector<2x32xf32>
    %450 = vector.extract_strided_slice %447 {offsets = [0, 32], sizes = [2, 32], strides = [1, 1]} : vector<2x128xf32> to vector<2x32xf32>
    %451 = vector.extract_strided_slice %448 {offsets = [0, 64], sizes = [2, 32], strides = [1, 1]} : vector<2x128xf32> to vector<2x32xf32>
    %452 = vector.extract_strided_slice %447 {offsets = [0, 96], sizes = [2, 32], strides = [1, 1]} : vector<2x128xf32> to vector<2x32xf32>
    %453 = arith.mulf %450, %417 : vector<2x32xf32>
    %454 = arith.mulf %449, %451 : vector<2x32xf32>
    %455 = arith.addf %453, %454 : vector<2x32xf32>
    %456 = math.tanh %455 : vector<2x32xf32>
    %457 = arith.mulf %452, %456 : vector<2x32xf32>
    %458 = tpu.concatenate %438, %457 in 1 : vector<2x32xf32>, vector<2x32xf32> -> vector<2x64xf32>
    %c0_108 = arith.constant 0 : index
    %c0_109 = arith.constant 0 : index
    %459 = vector.load %arg5[%c0_108, %c0_109] : memref<64x128xf32, #tpu.memory_space<vmem>>, vector<64x128xf32>
    %cst_110 = arith.constant dense<0.000000e+00> : vector<2x128xf32>
    %460 = tpu.matmul %458, %459, %cst_110 {dimension_numbers = #tpu.dot_dimension_numbers<[1], [0], [0], [1], [0, 0, 1, 1], [], []>} : vector<2x64xf32>, vector<64x128xf32>, vector<2x128xf32> -> vector<2x128xf32>
    %461 = arith.addf %460, %9 : vector<2x128xf32>
    %462 = arith.negf %461 : vector<2x128xf32>
    %463 = math.exp %462 : vector<2x128xf32>
    %cst_111 = arith.constant 1.000000e+00 : f32
    %464 = vector.broadcast %cst_111 : f32 to vector<2x128xf32>
    %465 = arith.addf %464, %463 : vector<2x128xf32>
    %466 = arith.divf %464, %465 : vector<2x128xf32>
    %467 = math.tanh %461 : vector<2x128xf32>
    %468 = vector.extract_strided_slice %466 {offsets = [0, 0], sizes = [2, 32], strides = [1, 1]} : vector<2x128xf32> to vector<2x32xf32>
    %469 = vector.extract_strided_slice %466 {offsets = [0, 32], sizes = [2, 32], strides = [1, 1]} : vector<2x128xf32> to vector<2x32xf32>
    %470 = vector.extract_strided_slice %467 {offsets = [0, 64], sizes = [2, 32], strides = [1, 1]} : vector<2x128xf32> to vector<2x32xf32>
    %471 = vector.extract_strided_slice %466 {offsets = [0, 96], sizes = [2, 32], strides = [1, 1]} : vector<2x128xf32> to vector<2x32xf32>
    %472 = arith.mulf %469, %455 : vector<2x32xf32>
    %473 = arith.mulf %468, %470 : vector<2x32xf32>
    %474 = arith.addf %472, %473 : vector<2x32xf32>
    %475 = math.tanh %474 : vector<2x32xf32>
    %476 = arith.mulf %471, %475 : vector<2x32xf32>
    %477 = tpu.concatenate %129, %187, %245, %303, %361, %419, %457, %476 in 1 : vector<2x32xf32>, vector<2x32xf32>, vector<2x32xf32>, vector<2x32xf32>, vector<2x32xf32>, vector<2x32xf32>, vector<2x32xf32>, vector<2x32xf32> -> vector<2x256xf32>
    %c0_112 = arith.constant 0 : index
    %c0_113 = arith.constant 0 : index
    %478 = vector.load %arg9[%c0_112, %c0_113] : memref<256x8xf32, #tpu.memory_space<vmem>>, vector<256x8xf32>
    %cst_114 = arith.constant dense<0.000000e+00> : vector<2x8xf32>
    %479 = tpu.matmul %477, %478, %cst_114 {dimension_numbers = #tpu.dot_dimension_numbers<[1], [0], [0], [1], [0, 0, 1, 1], [], []>} : vector<2x256xf32>, vector<256x8xf32>, vector<2x8xf32> -> vector<2x8xf32>
    %c0_115 = arith.constant 0 : index
    %c0_116 = arith.constant 0 : index
    %480 = vector.load %arg8[%c0_115, %c0_116] : memref<1x1xf32, #tpu.memory_space<vmem>>, vector<1x1xf32>
    %481 = vector.broadcast %480 : vector<1x1xf32> to vector<2x8xf32>
    %482 = arith.addf %479, %481 : vector<2x8xf32>
    %c0_117 = arith.constant 0 : index
    %c0_118 = arith.constant 0 : index
    %483 = vector.load %arg7[%c0_117, %c0_118] : memref<32x1xf32, #tpu.memory_space<vmem>>, vector<32x1xf32>
    %cst_119 = arith.constant dense<0.000000e+00> : vector<2x1xf32>
    %484 = tpu.matmul %476, %483, %cst_119 {dimension_numbers = #tpu.dot_dimension_numbers<[1], [0], [0], [1], [0, 0, 1, 1], [], []>} : vector<2x32xf32>, vector<32x1xf32>, vector<2x1xf32> -> vector<2x1xf32>
    %485 = arith.addf %484, %12 : vector<2x1xf32>
    %486 = tpu.concatenate %485, %381 in 1 : vector<2x1xf32>, vector<2x32xf32> -> vector<2x33xf32>
    %c0_120 = arith.constant 0 : index
    %c0_121 = arith.constant 0 : index
    %487 = vector.load %arg1[%c0_120, %c0_121] : memref<33x128xf32, #tpu.memory_space<vmem>>, vector<33x128xf32>
    %cst_122 = arith.constant dense<0.000000e+00> : vector<2x128xf32>
    %488 = tpu.matmul %486, %487, %cst_122 {dimension_numbers = #tpu.dot_dimension_numbers<[1], [0], [0], [1], [0, 0, 1, 1], [], []>} : vector<2x33xf32>, vector<33x128xf32>, vector<2x128xf32> -> vector<2x128xf32>
    %489 = arith.addf %488, %3 : vector<2x128xf32>
    %490 = arith.negf %489 : vector<2x128xf32>
    %491 = math.exp %490 : vector<2x128xf32>
    %cst_123 = arith.constant 1.000000e+00 : f32
    %492 = vector.broadcast %cst_123 : f32 to vector<2x128xf32>
    %493 = arith.addf %492, %491 : vector<2x128xf32>
    %494 = arith.divf %492, %493 : vector<2x128xf32>
    %495 = math.tanh %489 : vector<2x128xf32>
    %496 = vector.extract_strided_slice %494 {offsets = [0, 0], sizes = [2, 32], strides = [1, 1]} : vector<2x128xf32> to vector<2x32xf32>
    %497 = vector.extract_strided_slice %494 {offsets = [0, 32], sizes = [2, 32], strides = [1, 1]} : vector<2x128xf32> to vector<2x32xf32>
    %498 = vector.extract_strided_slice %495 {offsets = [0, 64], sizes = [2, 32], strides = [1, 1]} : vector<2x128xf32> to vector<2x32xf32>
    %499 = vector.extract_strided_slice %494 {offsets = [0, 96], sizes = [2, 32], strides = [1, 1]} : vector<2x128xf32> to vector<2x32xf32>
    %500 = arith.mulf %497, %379 : vector<2x32xf32>
    %501 = arith.mulf %496, %498 : vector<2x32xf32>
    %502 = arith.addf %500, %501 : vector<2x32xf32>
    %503 = math.tanh %502 : vector<2x32xf32>
    %504 = arith.mulf %499, %503 : vector<2x32xf32>
    %505 = tpu.concatenate %504, %438 in 1 : vector<2x32xf32>, vector<2x32xf32> -> vector<2x64xf32>
    %c0_124 = arith.constant 0 : index
    %c0_125 = arith.constant 0 : index
    %506 = vector.load %arg3[%c0_124, %c0_125] : memref<64x128xf32, #tpu.memory_space<vmem>>, vector<64x128xf32>
    %cst_126 = arith.constant dense<0.000000e+00> : vector<2x128xf32>
    %507 = tpu.matmul %505, %506, %cst_126 {dimension_numbers = #tpu.dot_dimension_numbers<[1], [0], [0], [1], [0, 0, 1, 1], [], []>} : vector<2x64xf32>, vector<64x128xf32>, vector<2x128xf32> -> vector<2x128xf32>
    %508 = arith.addf %507, %6 : vector<2x128xf32>
    %509 = arith.negf %508 : vector<2x128xf32>
    %510 = math.exp %509 : vector<2x128xf32>
    %cst_127 = arith.constant 1.000000e+00 : f32
    %511 = vector.broadcast %cst_127 : f32 to vector<2x128xf32>
    %512 = arith.addf %511, %510 : vector<2x128xf32>
    %513 = arith.divf %511, %512 : vector<2x128xf32>
    %514 = math.tanh %508 : vector<2x128xf32>
    %515 = vector.extract_strided_slice %513 {offsets = [0, 0], sizes = [2, 32], strides = [1, 1]} : vector<2x128xf32> to vector<2x32xf32>
    %516 = vector.extract_strided_slice %513 {offsets = [0, 32], sizes = [2, 32], strides = [1, 1]} : vector<2x128xf32> to vector<2x32xf32>
    %517 = vector.extract_strided_slice %514 {offsets = [0, 64], sizes = [2, 32], strides = [1, 1]} : vector<2x128xf32> to vector<2x32xf32>
    %518 = vector.extract_strided_slice %513 {offsets = [0, 96], sizes = [2, 32], strides = [1, 1]} : vector<2x128xf32> to vector<2x32xf32>
    %519 = arith.mulf %516, %436 : vector<2x32xf32>
    %520 = arith.mulf %515, %517 : vector<2x32xf32>
    %521 = arith.addf %519, %520 : vector<2x32xf32>
    %522 = math.tanh %521 : vector<2x32xf32>
    %523 = arith.mulf %518, %522 : vector<2x32xf32>
    %524 = tpu.concatenate %523, %476 in 1 : vector<2x32xf32>, vector<2x32xf32> -> vector<2x64xf32>
    %c0_128 = arith.constant 0 : index
    %c0_129 = arith.constant 0 : index
    %525 = vector.load %arg5[%c0_128, %c0_129] : memref<64x128xf32, #tpu.memory_space<vmem>>, vector<64x128xf32>
    %cst_130 = arith.constant dense<0.000000e+00> : vector<2x128xf32>
    %526 = tpu.matmul %524, %525, %cst_130 {dimension_numbers = #tpu.dot_dimension_numbers<[1], [0], [0], [1], [0, 0, 1, 1], [], []>} : vector<2x64xf32>, vector<64x128xf32>, vector<2x128xf32> -> vector<2x128xf32>
    %527 = arith.addf %526, %9 : vector<2x128xf32>
    %528 = arith.negf %527 : vector<2x128xf32>
    %529 = math.exp %528 : vector<2x128xf32>
    %cst_131 = arith.constant 1.000000e+00 : f32
    %530 = vector.broadcast %cst_131 : f32 to vector<2x128xf32>
    %531 = arith.addf %530, %529 : vector<2x128xf32>
    %532 = arith.divf %530, %531 : vector<2x128xf32>
    %533 = math.tanh %527 : vector<2x128xf32>
    %534 = vector.extract_strided_slice %532 {offsets = [0, 0], sizes = [2, 32], strides = [1, 1]} : vector<2x128xf32> to vector<2x32xf32>
    %535 = vector.extract_strided_slice %532 {offsets = [0, 32], sizes = [2, 32], strides = [1, 1]} : vector<2x128xf32> to vector<2x32xf32>
    %536 = vector.extract_strided_slice %533 {offsets = [0, 64], sizes = [2, 32], strides = [1, 1]} : vector<2x128xf32> to vector<2x32xf32>
    %537 = vector.extract_strided_slice %532 {offsets = [0, 96], sizes = [2, 32], strides = [1, 1]} : vector<2x128xf32> to vector<2x32xf32>
    %538 = arith.mulf %535, %474 : vector<2x32xf32>
    %539 = arith.mulf %534, %536 : vector<2x32xf32>
    %540 = arith.addf %538, %539 : vector<2x32xf32>
    %541 = math.tanh %540 : vector<2x32xf32>
    %542 = arith.mulf %537, %541 : vector<2x32xf32>
    %c0_132 = arith.constant 0 : index
    %c0_133 = arith.constant 0 : index
    %543 = vector.load %arg7[%c0_132, %c0_133] : memref<32x1xf32, #tpu.memory_space<vmem>>, vector<32x1xf32>
    %cst_134 = arith.constant dense<0.000000e+00> : vector<2x1xf32>
    %544 = tpu.matmul %542, %543, %cst_134 {dimension_numbers = #tpu.dot_dimension_numbers<[1], [0], [0], [1], [0, 0, 1, 1], [], []>} : vector<2x32xf32>, vector<32x1xf32>, vector<2x1xf32> -> vector<2x1xf32>
    %545 = arith.addf %544, %12 : vector<2x1xf32>
    %546 = tpu.concatenate %545, %504 in 1 : vector<2x1xf32>, vector<2x32xf32> -> vector<2x33xf32>
    %c0_135 = arith.constant 0 : index
    %c0_136 = arith.constant 0 : index
    %547 = vector.load %arg1[%c0_135, %c0_136] : memref<33x128xf32, #tpu.memory_space<vmem>>, vector<33x128xf32>
    %cst_137 = arith.constant dense<0.000000e+00> : vector<2x128xf32>
    %548 = tpu.matmul %546, %547, %cst_137 {dimension_numbers = #tpu.dot_dimension_numbers<[1], [0], [0], [1], [0, 0, 1, 1], [], []>} : vector<2x33xf32>, vector<33x128xf32>, vector<2x128xf32> -> vector<2x128xf32>
    %549 = arith.addf %548, %3 : vector<2x128xf32>
    %550 = arith.negf %549 : vector<2x128xf32>
    %551 = math.exp %550 : vector<2x128xf32>
    %cst_138 = arith.constant 1.000000e+00 : f32
    %552 = vector.broadcast %cst_138 : f32 to vector<2x128xf32>
    %553 = arith.addf %552, %551 : vector<2x128xf32>
    %554 = arith.divf %552, %553 : vector<2x128xf32>
    %555 = math.tanh %549 : vector<2x128xf32>
    %556 = vector.extract_strided_slice %554 {offsets = [0, 0], sizes = [2, 32], strides = [1, 1]} : vector<2x128xf32> to vector<2x32xf32>
    %557 = vector.extract_strided_slice %554 {offsets = [0, 32], sizes = [2, 32], strides = [1, 1]} : vector<2x128xf32> to vector<2x32xf32>
    %558 = vector.extract_strided_slice %555 {offsets = [0, 64], sizes = [2, 32], strides = [1, 1]} : vector<2x128xf32> to vector<2x32xf32>
    %559 = vector.extract_strided_slice %554 {offsets = [0, 96], sizes = [2, 32], strides = [1, 1]} : vector<2x128xf32> to vector<2x32xf32>
    %560 = arith.mulf %557, %502 : vector<2x32xf32>
    %561 = arith.mulf %556, %558 : vector<2x32xf32>
    %562 = arith.addf %560, %561 : vector<2x32xf32>
    %563 = math.tanh %562 : vector<2x32xf32>
    %564 = arith.mulf %559, %563 : vector<2x32xf32>
    %565 = tpu.concatenate %564, %523 in 1 : vector<2x32xf32>, vector<2x32xf32> -> vector<2x64xf32>
    %c0_139 = arith.constant 0 : index
    %c0_140 = arith.constant 0 : index
    %566 = vector.load %arg3[%c0_139, %c0_140] : memref<64x128xf32, #tpu.memory_space<vmem>>, vector<64x128xf32>
    %cst_141 = arith.constant dense<0.000000e+00> : vector<2x128xf32>
    %567 = tpu.matmul %565, %566, %cst_141 {dimension_numbers = #tpu.dot_dimension_numbers<[1], [0], [0], [1], [0, 0, 1, 1], [], []>} : vector<2x64xf32>, vector<64x128xf32>, vector<2x128xf32> -> vector<2x128xf32>
    %568 = arith.addf %567, %6 : vector<2x128xf32>
    %569 = arith.negf %568 : vector<2x128xf32>
    %570 = math.exp %569 : vector<2x128xf32>
    %cst_142 = arith.constant 1.000000e+00 : f32
    %571 = vector.broadcast %cst_142 : f32 to vector<2x128xf32>
    %572 = arith.addf %571, %570 : vector<2x128xf32>
    %573 = arith.divf %571, %572 : vector<2x128xf32>
    %574 = math.tanh %568 : vector<2x128xf32>
    %575 = vector.extract_strided_slice %573 {offsets = [0, 0], sizes = [2, 32], strides = [1, 1]} : vector<2x128xf32> to vector<2x32xf32>
    %576 = vector.extract_strided_slice %573 {offsets = [0, 32], sizes = [2, 32], strides = [1, 1]} : vector<2x128xf32> to vector<2x32xf32>
    %577 = vector.extract_strided_slice %574 {offsets = [0, 64], sizes = [2, 32], strides = [1, 1]} : vector<2x128xf32> to vector<2x32xf32>
    %578 = vector.extract_strided_slice %573 {offsets = [0, 96], sizes = [2, 32], strides = [1, 1]} : vector<2x128xf32> to vector<2x32xf32>
    %579 = arith.mulf %576, %521 : vector<2x32xf32>
    %580 = arith.mulf %575, %577 : vector<2x32xf32>
    %581 = arith.addf %579, %580 : vector<2x32xf32>
    %582 = math.tanh %581 : vector<2x32xf32>
    %583 = arith.mulf %578, %582 : vector<2x32xf32>
    %584 = tpu.concatenate %583, %542 in 1 : vector<2x32xf32>, vector<2x32xf32> -> vector<2x64xf32>
    %c0_143 = arith.constant 0 : index
    %c0_144 = arith.constant 0 : index
    %585 = vector.load %arg5[%c0_143, %c0_144] : memref<64x128xf32, #tpu.memory_space<vmem>>, vector<64x128xf32>
    %cst_145 = arith.constant dense<0.000000e+00> : vector<2x128xf32>
    %586 = tpu.matmul %584, %585, %cst_145 {dimension_numbers = #tpu.dot_dimension_numbers<[1], [0], [0], [1], [0, 0, 1, 1], [], []>} : vector<2x64xf32>, vector<64x128xf32>, vector<2x128xf32> -> vector<2x128xf32>
    %587 = arith.addf %586, %9 : vector<2x128xf32>
    %588 = arith.negf %587 : vector<2x128xf32>
    %589 = math.exp %588 : vector<2x128xf32>
    %cst_146 = arith.constant 1.000000e+00 : f32
    %590 = vector.broadcast %cst_146 : f32 to vector<2x128xf32>
    %591 = arith.addf %590, %589 : vector<2x128xf32>
    %592 = arith.divf %590, %591 : vector<2x128xf32>
    %593 = math.tanh %587 : vector<2x128xf32>
    %594 = vector.extract_strided_slice %592 {offsets = [0, 0], sizes = [2, 32], strides = [1, 1]} : vector<2x128xf32> to vector<2x32xf32>
    %595 = vector.extract_strided_slice %592 {offsets = [0, 32], sizes = [2, 32], strides = [1, 1]} : vector<2x128xf32> to vector<2x32xf32>
    %596 = vector.extract_strided_slice %593 {offsets = [0, 64], sizes = [2, 32], strides = [1, 1]} : vector<2x128xf32> to vector<2x32xf32>
    %597 = vector.extract_strided_slice %592 {offsets = [0, 96], sizes = [2, 32], strides = [1, 1]} : vector<2x128xf32> to vector<2x32xf32>
    %598 = arith.mulf %595, %540 : vector<2x32xf32>
    %599 = arith.mulf %594, %596 : vector<2x32xf32>
    %600 = arith.addf %598, %599 : vector<2x32xf32>
    %601 = math.tanh %600 : vector<2x32xf32>
    %602 = arith.mulf %597, %601 : vector<2x32xf32>
    %c0_147 = arith.constant 0 : index
    %c0_148 = arith.constant 0 : index
    %603 = vector.load %arg7[%c0_147, %c0_148] : memref<32x1xf32, #tpu.memory_space<vmem>>, vector<32x1xf32>
    %cst_149 = arith.constant dense<0.000000e+00> : vector<2x1xf32>
    %604 = tpu.matmul %602, %603, %cst_149 {dimension_numbers = #tpu.dot_dimension_numbers<[1], [0], [0], [1], [0, 0, 1, 1], [], []>} : vector<2x32xf32>, vector<32x1xf32>, vector<2x1xf32> -> vector<2x1xf32>
    %605 = arith.addf %604, %12 : vector<2x1xf32>
    %606 = tpu.concatenate %605, %564 in 1 : vector<2x1xf32>, vector<2x32xf32> -> vector<2x33xf32>
    %c0_150 = arith.constant 0 : index
    %c0_151 = arith.constant 0 : index
    %607 = vector.load %arg1[%c0_150, %c0_151] : memref<33x128xf32, #tpu.memory_space<vmem>>, vector<33x128xf32>
    %cst_152 = arith.constant dense<0.000000e+00> : vector<2x128xf32>
    %608 = tpu.matmul %606, %607, %cst_152 {dimension_numbers = #tpu.dot_dimension_numbers<[1], [0], [0], [1], [0, 0, 1, 1], [], []>} : vector<2x33xf32>, vector<33x128xf32>, vector<2x128xf32> -> vector<2x128xf32>
    %609 = arith.addf %608, %3 : vector<2x128xf32>
    %610 = arith.negf %609 : vector<2x128xf32>
    %611 = math.exp %610 : vector<2x128xf32>
    %cst_153 = arith.constant 1.000000e+00 : f32
    %612 = vector.broadcast %cst_153 : f32 to vector<2x128xf32>
    %613 = arith.addf %612, %611 : vector<2x128xf32>
    %614 = arith.divf %612, %613 : vector<2x128xf32>
    %615 = math.tanh %609 : vector<2x128xf32>
    %616 = vector.extract_strided_slice %614 {offsets = [0, 0], sizes = [2, 32], strides = [1, 1]} : vector<2x128xf32> to vector<2x32xf32>
    %617 = vector.extract_strided_slice %614 {offsets = [0, 32], sizes = [2, 32], strides = [1, 1]} : vector<2x128xf32> to vector<2x32xf32>
    %618 = vector.extract_strided_slice %615 {offsets = [0, 64], sizes = [2, 32], strides = [1, 1]} : vector<2x128xf32> to vector<2x32xf32>
    %619 = vector.extract_strided_slice %614 {offsets = [0, 96], sizes = [2, 32], strides = [1, 1]} : vector<2x128xf32> to vector<2x32xf32>
    %620 = arith.mulf %617, %562 : vector<2x32xf32>
    %621 = arith.mulf %616, %618 : vector<2x32xf32>
    %622 = arith.addf %620, %621 : vector<2x32xf32>
    %623 = math.tanh %622 : vector<2x32xf32>
    %624 = arith.mulf %619, %623 : vector<2x32xf32>
    %625 = tpu.concatenate %624, %583 in 1 : vector<2x32xf32>, vector<2x32xf32> -> vector<2x64xf32>
    %c0_154 = arith.constant 0 : index
    %c0_155 = arith.constant 0 : index
    %626 = vector.load %arg3[%c0_154, %c0_155] : memref<64x128xf32, #tpu.memory_space<vmem>>, vector<64x128xf32>
    %cst_156 = arith.constant dense<0.000000e+00> : vector<2x128xf32>
    %627 = tpu.matmul %625, %626, %cst_156 {dimension_numbers = #tpu.dot_dimension_numbers<[1], [0], [0], [1], [0, 0, 1, 1], [], []>} : vector<2x64xf32>, vector<64x128xf32>, vector<2x128xf32> -> vector<2x128xf32>
    %628 = arith.addf %627, %6 : vector<2x128xf32>
    %629 = arith.negf %628 : vector<2x128xf32>
    %630 = math.exp %629 : vector<2x128xf32>
    %cst_157 = arith.constant 1.000000e+00 : f32
    %631 = vector.broadcast %cst_157 : f32 to vector<2x128xf32>
    %632 = arith.addf %631, %630 : vector<2x128xf32>
    %633 = arith.divf %631, %632 : vector<2x128xf32>
    %634 = math.tanh %628 : vector<2x128xf32>
    %635 = vector.extract_strided_slice %633 {offsets = [0, 0], sizes = [2, 32], strides = [1, 1]} : vector<2x128xf32> to vector<2x32xf32>
    %636 = vector.extract_strided_slice %633 {offsets = [0, 32], sizes = [2, 32], strides = [1, 1]} : vector<2x128xf32> to vector<2x32xf32>
    %637 = vector.extract_strided_slice %634 {offsets = [0, 64], sizes = [2, 32], strides = [1, 1]} : vector<2x128xf32> to vector<2x32xf32>
    %638 = vector.extract_strided_slice %633 {offsets = [0, 96], sizes = [2, 32], strides = [1, 1]} : vector<2x128xf32> to vector<2x32xf32>
    %639 = arith.mulf %636, %581 : vector<2x32xf32>
    %640 = arith.mulf %635, %637 : vector<2x32xf32>
    %641 = arith.addf %639, %640 : vector<2x32xf32>
    %642 = math.tanh %641 : vector<2x32xf32>
    %643 = arith.mulf %638, %642 : vector<2x32xf32>
    %644 = tpu.concatenate %643, %602 in 1 : vector<2x32xf32>, vector<2x32xf32> -> vector<2x64xf32>
    %c0_158 = arith.constant 0 : index
    %c0_159 = arith.constant 0 : index
    %645 = vector.load %arg5[%c0_158, %c0_159] : memref<64x128xf32, #tpu.memory_space<vmem>>, vector<64x128xf32>
    %cst_160 = arith.constant dense<0.000000e+00> : vector<2x128xf32>
    %646 = tpu.matmul %644, %645, %cst_160 {dimension_numbers = #tpu.dot_dimension_numbers<[1], [0], [0], [1], [0, 0, 1, 1], [], []>} : vector<2x64xf32>, vector<64x128xf32>, vector<2x128xf32> -> vector<2x128xf32>
    %647 = arith.addf %646, %9 : vector<2x128xf32>
    %648 = arith.negf %647 : vector<2x128xf32>
    %649 = math.exp %648 : vector<2x128xf32>
    %cst_161 = arith.constant 1.000000e+00 : f32
    %650 = vector.broadcast %cst_161 : f32 to vector<2x128xf32>
    %651 = arith.addf %650, %649 : vector<2x128xf32>
    %652 = arith.divf %650, %651 : vector<2x128xf32>
    %653 = math.tanh %647 : vector<2x128xf32>
    %654 = vector.extract_strided_slice %652 {offsets = [0, 0], sizes = [2, 32], strides = [1, 1]} : vector<2x128xf32> to vector<2x32xf32>
    %655 = vector.extract_strided_slice %652 {offsets = [0, 32], sizes = [2, 32], strides = [1, 1]} : vector<2x128xf32> to vector<2x32xf32>
    %656 = vector.extract_strided_slice %653 {offsets = [0, 64], sizes = [2, 32], strides = [1, 1]} : vector<2x128xf32> to vector<2x32xf32>
    %657 = vector.extract_strided_slice %652 {offsets = [0, 96], sizes = [2, 32], strides = [1, 1]} : vector<2x128xf32> to vector<2x32xf32>
    %658 = arith.mulf %655, %600 : vector<2x32xf32>
    %659 = arith.mulf %654, %656 : vector<2x32xf32>
    %660 = arith.addf %658, %659 : vector<2x32xf32>
    %661 = math.tanh %660 : vector<2x32xf32>
    %662 = arith.mulf %657, %661 : vector<2x32xf32>
    %c0_162 = arith.constant 0 : index
    %c0_163 = arith.constant 0 : index
    %663 = vector.load %arg7[%c0_162, %c0_163] : memref<32x1xf32, #tpu.memory_space<vmem>>, vector<32x1xf32>
    %cst_164 = arith.constant dense<0.000000e+00> : vector<2x1xf32>
    %664 = tpu.matmul %662, %663, %cst_164 {dimension_numbers = #tpu.dot_dimension_numbers<[1], [0], [0], [1], [0, 0, 1, 1], [], []>} : vector<2x32xf32>, vector<32x1xf32>, vector<2x1xf32> -> vector<2x1xf32>
    %665 = arith.addf %664, %12 : vector<2x1xf32>
    %666 = tpu.concatenate %665, %624 in 1 : vector<2x1xf32>, vector<2x32xf32> -> vector<2x33xf32>
    %c0_165 = arith.constant 0 : index
    %c0_166 = arith.constant 0 : index
    %667 = vector.load %arg1[%c0_165, %c0_166] : memref<33x128xf32, #tpu.memory_space<vmem>>, vector<33x128xf32>
    %cst_167 = arith.constant dense<0.000000e+00> : vector<2x128xf32>
    %668 = tpu.matmul %666, %667, %cst_167 {dimension_numbers = #tpu.dot_dimension_numbers<[1], [0], [0], [1], [0, 0, 1, 1], [], []>} : vector<2x33xf32>, vector<33x128xf32>, vector<2x128xf32> -> vector<2x128xf32>
    %669 = arith.addf %668, %3 : vector<2x128xf32>
    %670 = arith.negf %669 : vector<2x128xf32>
    %671 = math.exp %670 : vector<2x128xf32>
    %cst_168 = arith.constant 1.000000e+00 : f32
    %672 = vector.broadcast %cst_168 : f32 to vector<2x128xf32>
    %673 = arith.addf %672, %671 : vector<2x128xf32>
    %674 = arith.divf %672, %673 : vector<2x128xf32>
    %675 = math.tanh %669 : vector<2x128xf32>
    %676 = vector.extract_strided_slice %674 {offsets = [0, 0], sizes = [2, 32], strides = [1, 1]} : vector<2x128xf32> to vector<2x32xf32>
    %677 = vector.extract_strided_slice %674 {offsets = [0, 32], sizes = [2, 32], strides = [1, 1]} : vector<2x128xf32> to vector<2x32xf32>
    %678 = vector.extract_strided_slice %675 {offsets = [0, 64], sizes = [2, 32], strides = [1, 1]} : vector<2x128xf32> to vector<2x32xf32>
    %679 = vector.extract_strided_slice %674 {offsets = [0, 96], sizes = [2, 32], strides = [1, 1]} : vector<2x128xf32> to vector<2x32xf32>
    %680 = arith.mulf %677, %622 : vector<2x32xf32>
    %681 = arith.mulf %676, %678 : vector<2x32xf32>
    %682 = arith.addf %680, %681 : vector<2x32xf32>
    %683 = math.tanh %682 : vector<2x32xf32>
    %684 = arith.mulf %679, %683 : vector<2x32xf32>
    %685 = tpu.concatenate %684, %643 in 1 : vector<2x32xf32>, vector<2x32xf32> -> vector<2x64xf32>
    %c0_169 = arith.constant 0 : index
    %c0_170 = arith.constant 0 : index
    %686 = vector.load %arg3[%c0_169, %c0_170] : memref<64x128xf32, #tpu.memory_space<vmem>>, vector<64x128xf32>
    %cst_171 = arith.constant dense<0.000000e+00> : vector<2x128xf32>
    %687 = tpu.matmul %685, %686, %cst_171 {dimension_numbers = #tpu.dot_dimension_numbers<[1], [0], [0], [1], [0, 0, 1, 1], [], []>} : vector<2x64xf32>, vector<64x128xf32>, vector<2x128xf32> -> vector<2x128xf32>
    %688 = arith.addf %687, %6 : vector<2x128xf32>
    %689 = arith.negf %688 : vector<2x128xf32>
    %690 = math.exp %689 : vector<2x128xf32>
    %cst_172 = arith.constant 1.000000e+00 : f32
    %691 = vector.broadcast %cst_172 : f32 to vector<2x128xf32>
    %692 = arith.addf %691, %690 : vector<2x128xf32>
    %693 = arith.divf %691, %692 : vector<2x128xf32>
    %694 = math.tanh %688 : vector<2x128xf32>
    %695 = vector.extract_strided_slice %693 {offsets = [0, 0], sizes = [2, 32], strides = [1, 1]} : vector<2x128xf32> to vector<2x32xf32>
    %696 = vector.extract_strided_slice %693 {offsets = [0, 32], sizes = [2, 32], strides = [1, 1]} : vector<2x128xf32> to vector<2x32xf32>
    %697 = vector.extract_strided_slice %694 {offsets = [0, 64], sizes = [2, 32], strides = [1, 1]} : vector<2x128xf32> to vector<2x32xf32>
    %698 = vector.extract_strided_slice %693 {offsets = [0, 96], sizes = [2, 32], strides = [1, 1]} : vector<2x128xf32> to vector<2x32xf32>
    %699 = arith.mulf %696, %641 : vector<2x32xf32>
    %700 = arith.mulf %695, %697 : vector<2x32xf32>
    %701 = arith.addf %699, %700 : vector<2x32xf32>
    %702 = math.tanh %701 : vector<2x32xf32>
    %703 = arith.mulf %698, %702 : vector<2x32xf32>
    %704 = tpu.concatenate %703, %662 in 1 : vector<2x32xf32>, vector<2x32xf32> -> vector<2x64xf32>
    %c0_173 = arith.constant 0 : index
    %c0_174 = arith.constant 0 : index
    %705 = vector.load %arg5[%c0_173, %c0_174] : memref<64x128xf32, #tpu.memory_space<vmem>>, vector<64x128xf32>
    %cst_175 = arith.constant dense<0.000000e+00> : vector<2x128xf32>
    %706 = tpu.matmul %704, %705, %cst_175 {dimension_numbers = #tpu.dot_dimension_numbers<[1], [0], [0], [1], [0, 0, 1, 1], [], []>} : vector<2x64xf32>, vector<64x128xf32>, vector<2x128xf32> -> vector<2x128xf32>
    %707 = arith.addf %706, %9 : vector<2x128xf32>
    %708 = arith.negf %707 : vector<2x128xf32>
    %709 = math.exp %708 : vector<2x128xf32>
    %cst_176 = arith.constant 1.000000e+00 : f32
    %710 = vector.broadcast %cst_176 : f32 to vector<2x128xf32>
    %711 = arith.addf %710, %709 : vector<2x128xf32>
    %712 = arith.divf %710, %711 : vector<2x128xf32>
    %713 = math.tanh %707 : vector<2x128xf32>
    %714 = vector.extract_strided_slice %712 {offsets = [0, 0], sizes = [2, 32], strides = [1, 1]} : vector<2x128xf32> to vector<2x32xf32>
    %715 = vector.extract_strided_slice %712 {offsets = [0, 32], sizes = [2, 32], strides = [1, 1]} : vector<2x128xf32> to vector<2x32xf32>
    %716 = vector.extract_strided_slice %713 {offsets = [0, 64], sizes = [2, 32], strides = [1, 1]} : vector<2x128xf32> to vector<2x32xf32>
    %717 = vector.extract_strided_slice %712 {offsets = [0, 96], sizes = [2, 32], strides = [1, 1]} : vector<2x128xf32> to vector<2x32xf32>
    %718 = arith.mulf %715, %660 : vector<2x32xf32>
    %719 = arith.mulf %714, %716 : vector<2x32xf32>
    %720 = arith.addf %718, %719 : vector<2x32xf32>
    %721 = math.tanh %720 : vector<2x32xf32>
    %722 = arith.mulf %717, %721 : vector<2x32xf32>
    %c0_177 = arith.constant 0 : index
    %c0_178 = arith.constant 0 : index
    %723 = vector.load %arg7[%c0_177, %c0_178] : memref<32x1xf32, #tpu.memory_space<vmem>>, vector<32x1xf32>
    %cst_179 = arith.constant dense<0.000000e+00> : vector<2x1xf32>
    %724 = tpu.matmul %722, %723, %cst_179 {dimension_numbers = #tpu.dot_dimension_numbers<[1], [0], [0], [1], [0, 0, 1, 1], [], []>} : vector<2x32xf32>, vector<32x1xf32>, vector<2x1xf32> -> vector<2x1xf32>
    %725 = arith.addf %724, %12 : vector<2x1xf32>
    %726 = tpu.concatenate %545, %605, %665, %725 in 1 : vector<2x1xf32>, vector<2x1xf32>, vector<2x1xf32>, vector<2x1xf32> -> vector<2x4xf32>
    %727 = tpu.concatenate %482, %726 in 1 : vector<2x8xf32>, vector<2x4xf32> -> vector<2x12xf32>
    %c0_180 = arith.constant 0 : index
    %c0_181 = arith.constant 0 : index
    %728 = vector.load %arg10[%c0_180, %c0_181] : memref<2x12xf32, #tpu.memory_space<vmem>>, vector<2x12xf32>
    tpu.vector_store %arg10[%c0_180, %c0_181], %727 {strides = array<i32>} : memref<2x12xf32, #tpu.memory_space<vmem>>, vector<2x12xf32>,
    return
  }
}

</mosaic_0001>

<bundles_post_ra>
// kernel: tpu_custom_call.1
= control target key start
LH: loop header
LB: loop body
LE: loop exit
PB: predicated region body
PF: predicated region fallthrough
CT: control target
= control target key end

     0   :  { %s4571_s0 = inlined_call_operand.vmem [shape: f32[2,8], index: 0, kind: input, shape index: {}]   ;;  %s4572_s1 = inlined_call_operand.vmem [shape: f32[33,128], index: 1, kind: input, shape index: {}]   ;;  %s4573_s2 = inlined_call_operand.vmem [shape: f32[1,128], index: 2, kind: input, shape index: {}]   ;;  %s4574_s3 = inlined_call_operand.vmem [shape: f32[64,128], index: 3, kind: input, shape index: {}]   ;;  %s4575_s4 = inlined_call_operand.vmem [shape: f32[1,128], index: 4, kind: input, shape index: {}]   ;;  %s4576_s5 = inlined_call_operand.vmem [shape: f32[64,128], index: 5, kind: input, shape index: {}]   ;;  %s4577_s6 = inlined_call_operand.vmem [shape: f32[1,128], index: 6, kind: input, shape index: {}]   ;;  %s4578_s7 = inlined_call_operand.vmem [shape: f32[32,1], index: 7, kind: input, shape index: {}]   ;;  %s4579_s8 = inlined_call_operand.<no memory space> [shape: f32[1,1], index: 8, kind: input, shape index: {}]   ;;  %s4580_s9 = inlined_call_operand.vmem [shape: f32[256,8], index: 9, kind: input, shape index: {}]   ;;  %s4581_s10 = inlined_call_operand.hbm [shape: f32[2,12], index: 10, kind: output, shape index: {}]  }
   0x1   :  { %v15_v0 = vstv %s4579_s8 }
   0x2   :  { %16 = vst [vmem:[#allocation2] sm:$0x1] %v15_v0 }
   0x3   :  { %v3317_v1 = vld [vmem:[%s4572_s1 + $0x20] sm:$0x1]  ;;  %vm66_vm0 = vcmask 1040384   ;;  %v3322_v2 = vld [vmem:[%s4572_s1 + $0x18] sm:$0xff]  ;;  %v3331_v3 = vld [vmem:[%s4572_s1 + $0x10] sm:$0xff]  ;;  %vm55_vm1 = vcmask 7168  }
   0x4   :  { %2769 = vmatpush.msk.msra.mxu0 %vm66_vm0, %v3317_v1  ;;  %2772 = vmatpush.msk.msra.mxu1 %vm66_vm0, %v3317_v1  ;;  %v3340_v4 = vld [vmem:[%s4572_s1 + $0x8] sm:$0xff]  ;;  %v3345_v5 = vld [vmem:[%s4571_s0] sm:$0x3] }
   0x5   :  { %2777 = vmatpush.msk.msra.mxu3 %vm66_vm0, %v3317_v1 }
   0x6   :  { %82 = vmatpush.msra.mxu0 %v3322_v2  ;;  %151 = vmatpush.msra.mxu1 %v3322_v2 }
   0x7   :  { %293 = vmatpush.msra.mxu3 %v3322_v2 }
   0x8   :  { %17 = vsyncpa [#allocation4], 0  ;;  %83 = vmatpush.msra.mxu0 %v3331_v3  ;;  %152 = vmatpush.msra.mxu1 %v3331_v3  ;;  %v3353_v6 = vld [vmem:[%s4572_s1] sm:$0xff]  ;;  %v56_v7 = vsel %vm55_vm1, %v3345_v5, 0.0  ;;  %vm62_vm2 = vcmask 269312   ;;  %s3239_s28 = smov 64  }
   0x9   :  { %294 = vmatpush.msra.mxu3 %v3331_v3  ;;  %v3374_v8 = vld [vmem:[%s4573_s2] ss:$0 sm:$0xff]  ;;  %s3240_s29 = smov 32   ;;  %s3241_s30 = smov 127   ;;  %v3387_v31 = vld [vmem:[%s4574_s3 + $0x38] sm:$0xff]  ;;  %v3392_v32 = vld [vmem:[%s4574_s3 + $0x30] sm:$0xff] }
   0xa   :  { %84 = vmatpush.msra.mxu0 %v3340_v4  ;;  %153 = vmatpush.msra.mxu1 %v3340_v4  ;;  %v3399_v33 = vld [vmem:[%s4574_s3 + $0x28] sm:$0xff]  ;;  %s3242_s17 = smov 33   ;;  %v3410_v36 = vld [vmem:[%s4574_s3 + $0x20] sm:$0xff]  ;;  %v3417_v37 = vld [vmem:[%s4574_s3 + $0x18] sm:$0xff]  ;;  %vm199_vm7 = vcmask 261120   ;;  %vm209_vm8 = vcmask 523264  }
   0xb   :  { %295 = vmatpush.msra.mxu3 %v3340_v4  ;;  %221 = vmatpush.msra.mxu2 %v3387_v31  ;;  %v3422_v38 = vld [vmem:[%s4574_s3 + $0x10] sm:$0xff]  ;;  %v3429_v39 = vld [vmem:[%s4574_s3 + $0x8] sm:$0xff]  ;;  %v3438_v40 = vld [vmem:[%s4574_s3] sm:$0xff]  ;;  %s3243_s11 = smov 126   ;;  %s3244_s12 = smov 125  }
   0xc   :  { %85 = vmatpush.msra.mxu0 %v3353_v6  ;;  %154 = vmatpush.msra.mxu1 %v3353_v6  ;;  %v3465_v49 = vld [vmem:[%s4575_s4] ss:$0 sm:$0xff]  ;;  %s3245_s13 = smov 124   ;;  %s3249_s21 = smov 96  }
   0xd   :  { %2770 = vmatmul.msk.f32.vlgmr.msra.gmra.mxu0 %vm62_vm2, %v56_v7  ;;  %296 = vmatpush.msra.mxu3 %v3353_v6  ;;  %s3252_s26 = smov 2   ;;  %s3253_s27 = smov 3  }
   0xe   :  { %357 = vmatpush.msrb.mxu0 %v3387_v31  ;;  %222 = vmatpush.msra.mxu2 %v3392_v32 }
   0xf   :  { %2784 = vmatpush.msk.msrb.mxu3 %vm66_vm0, %v3317_v1 }
  0x10   :  { %358 = vmatpush.msrb.mxu0 %v3392_v32  ;;  %223 = vmatpush.msra.mxu2 %v3399_v33 }
  0x11   :  { %501 = vmatpush.msrb.mxu3 %v3322_v2 }
  0x12   :  { %359 = vmatpush.msrb.mxu0 %v3399_v33  ;;  %224 = vmatpush.msra.mxu2 %v3410_v36 }
  0x13   :  { %502 = vmatpush.msrb.mxu3 %v3331_v3 }
  0x14   :  { %360 = vmatpush.msrb.mxu0 %v3410_v36  ;;  %225 = vmatpush.msra.mxu2 %v3417_v37 }
  0x15   :  { %503 = vmatpush.msrb.mxu3 %v3340_v4 }
  0x16   :  { %361 = vmatpush.msrb.mxu0 %v3417_v37  ;;  %226 = vmatpush.msra.mxu2 %v3422_v38 }
  0x17   :  { %504 = vmatpush.msrb.mxu3 %v3353_v6 }
  0x18   :  { %362 = vmatpush.msrb.mxu0 %v3422_v38  ;;  %227 = vmatpush.msra.mxu2 %v3429_v39 }
  0x1a   :  { %363 = vmatpush.msrb.mxu0 %v3429_v39  ;;  %228 = vmatpush.msra.mxu2 %v3438_v40 }
  0x1c   :  { %364 = vmatpush.msrb.mxu0 %v3438_v40  ;;  %565 = vmatpush.msrb.mxu2 %v3387_v31 }
  0x1e   :  { %2791 = vmatpush.msk.msra.mxu0 %vm66_vm0, %v3317_v1  ;;  %566 = vmatpush.msrb.mxu2 %v3392_v32 }
  0x20   :  { %705 = vmatpush.msra.mxu0 %v3322_v2  ;;  %567 = vmatpush.msrb.mxu2 %v3399_v33 }
  0x22   :  { %706 = vmatpush.msra.mxu0 %v3331_v3  ;;  %568 = vmatpush.msrb.mxu2 %v3410_v36 }
  0x24   :  { %707 = vmatpush.msra.mxu0 %v3340_v4  ;;  %569 = vmatpush.msrb.mxu2 %v3417_v37 }
  0x26   :  { %708 = vmatpush.msra.mxu0 %v3353_v6  ;;  %570 = vmatpush.msrb.mxu2 %v3422_v38 }
  0x28   :  { %571 = vmatpush.msrb.mxu2 %v3429_v39 }
  0x2a   :  { %572 = vmatpush.msrb.mxu2 %v3438_v40 }
  0x8a   :  { %v87_v9 = vpop.f32.mrf.mxu0 }
  0x8b   :  { %v88_v10 = vadd.f32 %v3374_v8, %v87_v9 }
  0x8d   :  { %2881 = vtanh.f32 %v88_v10  ;;  %v2771_v12 = vmul.f32 -1.442695, %v88_v10 }
  0x8f   :  { %2883 = vpow2.f32 %v2771_v12 }
  0x93   :  { %v2882_v11 = vpop.eup %2881 }
  0x94   :  { %112 = vrot.lane.b32.xlu0 %v2882_v11, %s3239_s28 }
  0x95   :  { %v2884_v13 = vpop.eup %2883 }
  0x96   :  { %v93_v14 = vadd.f32 1.0, %v2884_v13 }
  0x98   :  { %2885 = vrcp.f32 %v93_v14  ;;  %v105_v20 = vand.u32 2147483648, %v93_v14  ;;  %vm99_vm4 = vweird.f32 %v93_v14  ;;  %v103_v21 = vand.u32 2147483647, %v93_v14 }
  0x9a   :  { %v106_v23 = vor.u32 1.1754944e-38, %v105_v20  ;;  %vm104_vm6 = vcmp.eq.f32.partialorder %v103_v21, 8.507059e+37 }
  0x9e   :  { %v2886_v15 = vpop.eup %2885 }
  0x9f   :  { %v95_v16 = vmul.f32 %v2886_v15, %v93_v14  ;;  %vm100_vm3 = vweird.f32 %v2886_v15 }
  0xa0   :  { %vm101_vm5 = vmor %vm99_vm4, %vm100_vm3 }
  0xa1   :  { %v96_v17 = vsub.f32 1.0, %v95_v16 }
  0xa3   :  { %v97_v18 = vmul.f32 %v2886_v15, %v96_v17 }
  0xa5   :  { %v98_v19 = vadd.f32 %v2886_v15, %v97_v18 }
  0xa7   :  { %v102_v22 = vsel %vm101_vm5, %v2886_v15, %v98_v19 }
  0xa8   :  { %v107_v25 = vsel %vm104_vm6, %v106_v23, %v102_v22 }
  0xa9   :  { %v110_v27 = vmul.f32 0.0, %v107_v25 }
 0x106   :  { %v113_v24 = vpop.permute.xlu0 %112 }
 0x107   :  { %v115_v26 = vmul.f32 %v113_v24, %v107_v25 }
 0x109   :  { %117 = vrot.lane.b32.xlu0 %v115_v26, %s3240_s29 }
 0x17b   :  { %v118_v28 = vpop.permute.xlu0 %117 }
 0x17c   :  { %v3379_v29 = vadd.f32 %v118_v28, %v110_v27 }
 0x17e   :  { %2887 = vtanh.f32 %v3379_v29 }
 0x184   :  { %v2888_v30 = vpop.eup %2887 }
 0x185   :  { %123 = vrot.lane.b32.xlu1 %v2888_v30, %s3239_s28 }
 0x18d   :  { %128 = vrot.lane.b32.xlu1 %v3345_v5, %s3241_s30  ;;  %s3246_s30 = smov 123  }
 0x1f7   :  { %v124_v34 = vpop.permute.xlu1 %123 }
 0x1f8   :  { %v126_v35 = vmul.f32 %v124_v34, %v107_v25 }
 0x1fa   :  { %132 = vrot.lane.b32.xlu2 %v126_v35, %s3242_s17 }
 0x1ff   :  { %v129_v41 = vpop.permute.xlu1 %128 }
 0x202   :  { %196 = vrot.lane.b32.xlu2 %v126_v35, %s3240_s29 }
 0x254   :  { %v133_v42 = vpop.permute.xlu2 %132 }
 0x255   :  { %v135_v43 = vsel %vm55_vm1, %v129_v41, %v133_v42 }
 0x256   :  { %2773 = vmatmul.msk.f32.vlgmr.msra.gmra.mxu1 %vm62_vm2, %v135_v43 }
 0x25c   :  { %v197_v44 = vpop.permute.xlu2 %196 }
 0x25d   :  { %v200_v45 = vsel %vm199_vm7, %v197_v44, 0.0 }
 0x25e   :  { %2775 = vmatmul.msk.f32.vlgmr.msra.gmra.mxu2 %vm209_vm8, %v200_v45 }
 0x2d3   :  { %v156_v46 = vpop.f32.mrf.mxu1 }
 0x2d4   :  { %v157_v47 = vadd.f32 %v3374_v8, %v156_v46  ;;  %v3488_v46 = vld [vmem:[%s4576_s5 + $0x38] sm:$0xff] }
 0x2d5   :  { %429 = vmatpush.msrb.mxu1 %v3488_v46  ;;  %837 = vmatpush.msra.mxu2 %v3488_v46 }
 0x2d6   :  { %2889 = vtanh.f32 %v157_v47  ;;  %v2774_v53 = vmul.f32 -1.442695, %v157_v47  ;;  %v3495_v47 = vld [vmem:[%s4576_s5 + $0x30] sm:$0xff] }
 0x2d7   :  { %430 = vmatpush.msrb.mxu1 %v3495_v47  ;;  %838 = vmatpush.msra.mxu2 %v3495_v47 }
 0x2dc   :  { %v2890_v48 = vpop.eup %2889 }
 0x2dd   :  { %181 = vrot.lane.b32.xlu0 %v2890_v48, %s3239_s28  ;;  %v3500_v48 = vld [vmem:[%s4576_s5 + $0x28] sm:$0xff] }
 0x2de   :  { %431 = vmatpush.msrb.mxu1 %v3500_v48  ;;  %839 = vmatpush.msra.mxu2 %v3500_v48 }
 0x2e1   :  { %v230_v50 = vpop.f32.mrf.mxu2 }
 0x2e2   :  { %v231_v51 = vadd.f32 %v3465_v49, %v230_v50  ;;  %v3507_v50 = vld [vmem:[%s4576_s5 + $0x20] sm:$0xff] }
 0x2e3   :  { %432 = vmatpush.msrb.mxu1 %v3507_v50  ;;  %840 = vmatpush.msra.mxu2 %v3507_v50 }
 0x2e4   :  { %2891 = vtanh.f32 %v231_v51  ;;  %v2776_v56 = vmul.f32 -1.442695, %v231_v51  ;;  %v3514_v51 = vld [vmem:[%s4576_s5 + $0x18] sm:$0xff] }
 0x2e5   :  { %2893 = vpow2.f32 %v2774_v53  ;;  %433 = vmatpush.msrb.mxu1 %v3514_v51  ;;  %841 = vmatpush.msra.mxu2 %v3514_v51  ;;  %v3528_v53 = vld [vmem:[%s4576_s5 + $0x8] sm:$0xff] }
 0x2ea   :  { %v2892_v52 = vpop.eup %2891 }
 0x2eb   :  { %255 = vrot.lane.b32.xlu1 %v2892_v52, %s3239_s28  ;;  %v2894_v54 = vpop.eup %2893  ;;  %v3521_v52 = vld [vmem:[%s4576_s5 + $0x10] sm:$0xff] }
 0x2ec   :  { %v162_v55 = vadd.f32 1.0, %v2894_v54  ;;  %434 = vmatpush.msrb.mxu1 %v3521_v52  ;;  %842 = vmatpush.msra.mxu2 %v3521_v52  ;;  %v3537_v54 = vld [vmem:[%s4576_s5] sm:$0xff] }
 0x2ee   :  { %2895 = vrcp.f32 %v162_v55  ;;  %v174_v7 = vand.u32 2147483648, %v162_v55  ;;  %vm168_vm10 = vweird.f32 %v162_v55  ;;  %v172_v9 = vand.u32 2147483647, %v162_v55  ;;  %435 = vmatpush.msrb.mxu1 %v3528_v53  ;;  %843 = vmatpush.msra.mxu2 %v3528_v53 }
 0x2ef   :  { %2897 = vpow2.f32 %v2776_v56 }
 0x2f0   :  { %v175_v12 = vor.u32 1.1754944e-38, %v174_v7  ;;  %vm173_vm12 = vcmp.eq.f32.partialorder %v172_v9, 8.507059e+37  ;;  %436 = vmatpush.msrb.mxu1 %v3537_v54  ;;  %844 = vmatpush.msra.mxu2 %v3537_v54 }
 0x2f2   :  { %769 = vmatpush.msra.mxu1 %v3387_v31 }
 0x2f4   :  { %v2896_v57 = vpop.eup %2895  ;;  %770 = vmatpush.msra.mxu1 %v3392_v32 }
 0x2f5   :  { %v2898_v58 = vpop.eup %2897  ;;  %v164_v59 = vmul.f32 %v2896_v57, %v162_v55  ;;  %vm169_vm9 = vweird.f32 %v2896_v57 }
 0x2f6   :  { %v236_v60 = vadd.f32 1.0, %v2898_v58  ;;  %vm170_vm11 = vmor %vm168_vm10, %vm169_vm9  ;;  %771 = vmatpush.msra.mxu1 %v3399_v33 }
 0x2f7   :  { %v165_v61 = vsub.f32 1.0, %v164_v59 }
 0x2f8   :  { %2899 = vrcp.f32 %v236_v60  ;;  %v248_v19 = vand.u32 2147483648, %v236_v60  ;;  %vm242_vm14 = vweird.f32 %v236_v60  ;;  %v246_v20 = vand.u32 2147483647, %v236_v60  ;;  %772 = vmatpush.msra.mxu1 %v3410_v36 }
 0x2f9   :  { %v166_v62 = vmul.f32 %v2896_v57, %v165_v61 }
 0x2fa   :  { %v249_v22 = vor.u32 1.1754944e-38, %v248_v19  ;;  %vm247_vm3 = vcmp.eq.f32.partialorder %v246_v20, 8.507059e+37  ;;  %773 = vmatpush.msra.mxu1 %v3417_v37 }
 0x2fb   :  { %v167_v0 = vadd.f32 %v2896_v57, %v166_v62 }
 0x2fc   :  { %774 = vmatpush.msra.mxu1 %v3422_v38 }
 0x2fd   :  { %v171_v11 = vsel %vm170_vm11, %v2896_v57, %v167_v0 }
 0x2fe   :  { %v2900_v63 = vpop.eup %2899  ;;  %v176_v15 = vsel %vm173_vm12, %v175_v12, %v171_v11  ;;  %775 = vmatpush.msra.mxu1 %v3429_v39 }
 0x2ff   :  { %v238_v10 = vmul.f32 %v2900_v63, %v236_v60  ;;  %vm243_vm13 = vweird.f32 %v2900_v63  ;;  %v179_v26 = vmul.f32 %v176_v15, %v3379_v29 }
 0x300   :  { %vm244_vm15 = vmor %vm242_vm14, %vm243_vm13  ;;  %776 = vmatpush.msra.mxu1 %v3438_v40 }
 0x301   :  { %v239_v13 = vsub.f32 1.0, %v238_v10 }
 0x303   :  { %v240_v17 = vmul.f32 %v2900_v63, %v239_v13 }
 0x305   :  { %v241_v18 = vadd.f32 %v2900_v63, %v240_v17 }
 0x307   :  { %v245_v21 = vsel %vm244_vm15, %v2900_v63, %v241_v18 }
 0x308   :  { %v250_v23 = vsel %vm247_vm3, %v249_v22, %v245_v21 }
 0x309   :  { %v253_v34 = vmul.f32 0.0, %v250_v23 }
 0x34f   :  { %v182_v14 = vpop.permute.xlu0 %181 }
 0x350   :  { %v184_v16 = vmul.f32 %v182_v14, %v176_v15 }
 0x352   :  { %186 = vrot.lane.b32.xlu2 %v184_v16, %s3240_s29 }
 0x35d   :  { %v256_v24 = vpop.permute.xlu1 %255 }
 0x35e   :  { %v258_v25 = vmul.f32 %v256_v24, %v250_v23 }
 0x360   :  { %260 = vrot.lane.b32.xlu0 %v258_v25, %s3240_s29 }
 0x368   :  { %270 = vrot.lane.b32.xlu0 %v3345_v5, %s3243_s11  ;;  %s2760_s11 = sshll.u32 %s4581_s10, 4  ;;  %s2761_s11 = int_to_ptr.hbm [resolvable:$true] %s2760_s11 }
 0x3ac   :  { %v187_v27 = vpop.permute.xlu2 %186 }
 0x3ad   :  { %v3473_v28 = vadd.f32 %v187_v27, %v179_v26 }
 0x3af   :  { %2901 = vtanh.f32 %v3473_v28 }
 0x3b5   :  { %v2902_v30 = vpop.eup %2901 }
 0x3b6   :  { %192 = vrot.lane.b32.xlu1 %v2902_v30, %s3239_s28 }
 0x3d2   :  { %v261_v35 = vpop.permute.xlu0 %260 }
 0x3d3   :  { %v3477_v41 = vadd.f32 %v261_v35, %v253_v34 }
 0x3d5   :  { %2903 = vtanh.f32 %v3477_v41 }
 0x3da   :  { %v271_v55 = vpop.permute.xlu0 %270 }
 0x3db   :  { %v2904_v42 = vpop.eup %2903 }
 0x3dc   :  { %266 = vrot.lane.b32.xlu2 %v2904_v42, %s3239_s28 }
 0x428   :  { %v193_v43 = vpop.permute.xlu1 %192 }
 0x429   :  { %v195_v44 = vmul.f32 %v193_v43, %v176_v15 }
 0x42b   :  { %338 = vrot.lane.b32.xlu2 %v195_v44, %s3240_s29  ;;  %274 = vrot.lane.b32.xlu1 %v195_v44, %s3242_s17 }
 0x436   :  { %v267_v29 = vpop.permute.xlu2 %266 }
 0x437   :  { %v269_v45 = vmul.f32 %v267_v29, %v250_v23 }
 0x439   :  { %342 = vrot.lane.b32.xlu0 %v269_v45, %s3239_s28  ;;  %406 = vrot.lane.b32.xlu1 %v269_v45, %s3240_s29 }
 0x485   :  { %v339_v58 = vpop.permute.xlu2 %338 }
 0x49d   :  { %v275_v56 = vpop.permute.xlu1 %274 }
 0x49e   :  { %v277_v57 = vsel %vm55_vm1, %v271_v55, %v275_v56 }
 0x49f   :  { %2778 = vmatmul.msk.f32.vlgmr.msra.gmra.mxu3 %vm62_vm2, %v277_v57 }
 0x4a0   :  { %633 = vmatpush.msra.mxu3 %v3488_v46 }
 0x4a2   :  { %634 = vmatpush.msra.mxu3 %v3495_v47 }
 0x4a4   :  { %635 = vmatpush.msra.mxu3 %v3500_v48 }
 0x4a6   :  { %636 = vmatpush.msra.mxu3 %v3507_v50 }
 0x4a8   :  { %637 = vmatpush.msra.mxu3 %v3514_v51 }
 0x4aa   :  { %638 = vmatpush.msra.mxu3 %v3521_v52 }
 0x4ab   :  { %v343_v59 = vpop.permute.xlu0 %342  ;;  %v407_v60 = vpop.permute.xlu1 %406 }
 0x4ac   :  { %v345_v61 = vsel %vm199_vm7, %v339_v58, %v343_v59  ;;  %v409_v62 = vsel %vm199_vm7, %v407_v60, 0.0  ;;  %639 = vmatpush.msra.mxu3 %v3528_v53 }
 0x4ad   :  { %2780 = vmatmul.msk.f32.vlgmr.msrb.gmra.mxu0 %vm209_vm8, %v345_v61  ;;  %2782 = vmatmul.msk.f32.vlgmr.msrb.gmra.mxu1 %vm209_vm8, %v409_v62 }
 0x4ae   :  { %640 = vmatpush.msra.mxu3 %v3537_v54  ;;  %2798 = vmatpush.msk.msrb.mxu0 %vm66_vm0, %v3317_v1 }
 0x4af   :  { %1041 = vmatpush.msrb.mxu1 %v3488_v46 }
 0x4b0   :  { %909 = vmatpush.msrb.mxu0 %v3322_v2 }
 0x4b1   :  { %1042 = vmatpush.msrb.mxu1 %v3495_v47 }
 0x4b2   :  { %910 = vmatpush.msrb.mxu0 %v3331_v3  ;;  %v3581_v3 = vld [vmem:[%s4577_s6] ss:$0 sm:$0xff] }
 0x4b3   :  { %1043 = vmatpush.msrb.mxu1 %v3500_v48 }
 0x4b4   :  { %911 = vmatpush.msrb.mxu0 %v3340_v4 }
 0x4b5   :  { %1044 = vmatpush.msrb.mxu1 %v3507_v50 }
 0x4b6   :  { %912 = vmatpush.msrb.mxu0 %v3353_v6 }
 0x4b7   :  { %1045 = vmatpush.msrb.mxu1 %v3514_v51 }
 0x4b9   :  { %1046 = vmatpush.msrb.mxu1 %v3521_v52 }
 0x4bb   :  { %1047 = vmatpush.msrb.mxu1 %v3528_v53 }
 0x4bd   :  { %1048 = vmatpush.msrb.mxu1 %v3537_v54 }
 0x522   :  { %v298_v1 = vpop.f32.mrf.mxu3 }
 0x523   :  { %v299_v2 = vadd.f32 %v3374_v8, %v298_v1 }
 0x525   :  { %2905 = vtanh.f32 %v299_v2  ;;  %v2779_v11 = vmul.f32 -1.442695, %v299_v2 }
 0x52a   :  { %v366_v4 = vpop.f32.mrf.mxu0  ;;  %v438_v63 = vpop.f32.mrf.mxu1 }
 0x52b   :  { %v2906_v6 = vpop.eup %2905  ;;  %v367_v0 = vadd.f32 %v3465_v49, %v366_v4  ;;  %v439_v7 = vadd.f32 %v3581_v3, %v438_v63 }
 0x52c   :  { %323 = vrot.lane.b32.xlu2 %v2906_v6, %s3239_s28 }
 0x52d   :  { %2907 = vtanh.f32 %v367_v0  ;;  %v2781_v17 = vmul.f32 -1.442695, %v367_v0  ;;  %v2783_v18 = vmul.f32 -1.442695, %v439_v7 }
 0x52e   :  { %2909 = vtanh.f32 %v439_v7 }
 0x52f   :  { %2911 = vpow2.f32 %v2779_v11 }
 0x533   :  { %v2908_v9 = vpop.eup %2907 }
 0x534   :  { %v2910_v10 = vpop.eup %2909  ;;  %391 = vrot.lane.b32.xlu0 %v2908_v9, %s3239_s28 }
 0x535   :  { %463 = vrot.lane.b32.xlu1 %v2910_v10, %s3239_s28  ;;  %v2912_v12 = vpop.eup %2911 }
 0x536   :  { %v304_v13 = vadd.f32 1.0, %v2912_v12 }
 0x538   :  { %2913 = vrcp.f32 %v304_v13  ;;  %v316_v21 = vand.u32 2147483648, %v304_v13  ;;  %vm310_vm5 = vweird.f32 %v304_v13  ;;  %v314_v22 = vand.u32 2147483647, %v304_v13 }
 0x539   :  { %2915 = vpow2.f32 %v2781_v17 }
 0x53a   :  { %2917 = vpow2.f32 %v2783_v18  ;;  %v317_v26 = vor.u32 1.1754944e-38, %v316_v21  ;;  %vm315_vm9 = vcmp.eq.f32.partialorder %v314_v22, 8.507059e+37 }
 0x53e   :  { %v2914_v14 = vpop.eup %2913 }
 0x53f   :  { %v306_v15 = vmul.f32 %v2914_v14, %v304_v13  ;;  %vm311_vm4 = vweird.f32 %v2914_v14  ;;  %v2916_v23 = vpop.eup %2915 }
 0x540   :  { %vm312_vm6 = vmor %vm310_vm5, %vm311_vm4  ;;  %v2918_v25 = vpop.eup %2917  ;;  %v372_v27 = vadd.f32 1.0, %v2916_v23 }
 0x541   :  { %v307_v16 = vsub.f32 1.0, %v306_v15  ;;  %v444_v35 = vadd.f32 1.0, %v2918_v25 }
 0x542   :  { %2919 = vrcp.f32 %v372_v27  ;;  %v384_v60 = vand.u32 2147483648, %v372_v27  ;;  %vm378_vm12 = vweird.f32 %v372_v27  ;;  %v382_v62 = vand.u32 2147483647, %v372_v27 }
 0x543   :  { %v308_v19 = vmul.f32 %v2914_v14, %v307_v16  ;;  %2921 = vrcp.f32 %v444_v35  ;;  %v456_v1 = vand.u32 2147483648, %v444_v35  ;;  %vm450_vm14 = vweird.f32 %v444_v35 }
 0x544   :  { %v454_v2 = vand.u32 2147483647, %v444_v35  ;;  %v385_v63 = vor.u32 1.1754944e-38, %v384_v60  ;;  %vm383_vm3 = vcmp.eq.f32.partialorder %v382_v62, 8.507059e+37 }
 0x545   :  { %v309_v20 = vadd.f32 %v2914_v14, %v308_v19  ;;  %v457_v0 = vor.u32 1.1754944e-38, %v456_v1 }
 0x546   :  { %vm455_vm4 = vcmp.eq.f32.partialorder %v454_v2, 8.507059e+37 }
 0x547   :  { %v313_v24 = vsel %vm312_vm6, %v2914_v14, %v309_v20 }
 0x548   :  { %v318_v34 = vsel %vm315_vm9, %v317_v26, %v313_v24  ;;  %v2920_v43 = vpop.eup %2919 }
 0x549   :  { %v2922_v44 = vpop.eup %2921  ;;  %v374_v29 = vmul.f32 %v2920_v43, %v372_v27  ;;  %vm379_vm10 = vweird.f32 %v2920_v43  ;;  %v321_v14 = vmul.f32 %v318_v34, %v3473_v28 }
 0x54a   :  { %v446_v45 = vmul.f32 %v2922_v44, %v444_v35  ;;  %vm451_vm11 = vweird.f32 %v2922_v44  ;;  %vm380_vm13 = vmor %vm378_vm12, %vm379_vm10 }
 0x54b   :  { %v375_v55 = vsub.f32 1.0, %v374_v29  ;;  %vm452_vm15 = vmor %vm450_vm14, %vm451_vm11 }
 0x54c   :  { %v447_v56 = vsub.f32 1.0, %v446_v45 }
 0x54d   :  { %v376_v57 = vmul.f32 %v2920_v43, %v375_v55 }
 0x54e   :  { %v448_v58 = vmul.f32 %v2922_v44, %v447_v56 }
 0x54f   :  { %v377_v59 = vadd.f32 %v2920_v43, %v376_v57 }
 0x550   :  { %v449_v61 = vadd.f32 %v2922_v44, %v448_v58 }
 0x551   :  { %v381_v4 = vsel %vm380_vm13, %v2920_v43, %v377_v59 }
 0x552   :  { %v453_v6 = vsel %vm452_vm15, %v2922_v44, %v449_v61  ;;  %v386_v9 = vsel %vm383_vm3, %v385_v63, %v381_v4 }
 0x553   :  { %v458_v12 = vsel %vm455_vm4, %v457_v0, %v453_v6  ;;  %v389_v18 = vmul.f32 %v386_v9, %v3477_v41 }
 0x554   :  { %v461_v20 = vmul.f32 0.0, %v458_v12 }
 0x586   :  { %v324_v30 = vpop.permute.xlu2 %323 }
 0x587   :  { %v326_v42 = vmul.f32 %v324_v30, %v318_v34 }
 0x589   :  { %328 = vrot.lane.b32.xlu2 %v326_v42, %s3240_s29 }
 0x5a6   :  { %v392_v7 = vpop.permute.xlu0 %391 }
 0x5a7   :  { %v394_v10 = vmul.f32 %v392_v7, %v386_v9  ;;  %v464_v11 = vpop.permute.xlu1 %463 }
 0x5a8   :  { %v466_v13 = vmul.f32 %v464_v11, %v458_v12 }
 0x5a9   :  { %396 = vrot.lane.b32.xlu0 %v394_v10, %s3240_s29 }
 0x5aa   :  { %468 = vrot.lane.b32.xlu1 %v466_v13, %s3240_s29 }
 0x5e3   :  { %v329_v15 = vpop.permute.xlu2 %328 }
 0x5e4   :  { %v3592_v16 = vadd.f32 %v329_v15, %v321_v14 }
 0x5e6   :  { %2923 = vtanh.f32 %v3592_v16 }
 0x5ec   :  { %v2924_v17 = vpop.eup %2923 }
 0x5ed   :  { %334 = vrot.lane.b32.xlu2 %v2924_v17, %s3239_s28 }
 0x5f5   :  { %478 = vrot.lane.b32.xlu2 %v3345_v5, %s3244_s12  ;;  %s3247_s12 = smov 122  }
 0x61b   :  { %v397_v19 = vpop.permute.xlu0 %396 }
 0x61c   :  { %v3598_v21 = vadd.f32 %v397_v19, %v389_v18  ;;  %v469_v22 = vpop.permute.xlu1 %468 }
 0x61d   :  { %v3600_v23 = vadd.f32 %v469_v22, %v461_v20 }
 0x61e   :  { %2925 = vtanh.f32 %v3598_v21 }
 0x61f   :  { %2927 = vtanh.f32 %v3600_v23 }
 0x624   :  { %v2926_v28 = vpop.eup %2925 }
 0x625   :  { %v2928_v24 = vpop.eup %2927  ;;  %402 = vrot.lane.b32.xlu0 %v2926_v28, %s3239_s28 }
 0x626   :  { %474 = vrot.lane.b32.xlu1 %v2928_v24, %s3239_s28 }
 0x647   :  { %v335_v25 = vpop.permute.xlu2 %334 }
 0x648   :  { %v337_v26 = vmul.f32 %v335_v25, %v318_v34 }
 0x64a   :  { %482 = vrot.lane.b32.xlu0 %v337_v26, %s3242_s17  ;;  %546 = vrot.lane.b32.xlu1 %v337_v26, %s3240_s29 }
 0x64f   :  { %v479_v42 = vpop.permute.xlu2 %478 }
 0x697   :  { %v403_v41 = vpop.permute.xlu0 %402 }
 0x698   :  { %v405_v27 = vmul.f32 %v403_v41, %v386_v9  ;;  %v475_v30 = vpop.permute.xlu1 %474 }
 0x699   :  { %v3608_v35 = vmul.f32 %v475_v30, %v458_v12 }
 0x69a   :  { %550 = vrot.lane.b32.xlu2 %v405_v27, %s3239_s28  ;;  %614 = vrot.lane.b32.xlu0 %v405_v27, %s3240_s29 }
 0x69b   :  { %618 = vrot.lane.b32.xlu1 %v3608_v35, %s3239_s28 }
 0x6bc   :  { %v483_v43 = vpop.permute.xlu0 %482  ;;  %v547_v44 = vpop.permute.xlu1 %546 }
 0x6bd   :  { %v485_v34 = vsel %vm55_vm1, %v479_v42, %v483_v43 }
 0x6be   :  { %2785 = vmatmul.msk.f32.vlgmr.msrb.gmra.mxu3 %vm62_vm2, %v485_v34 }
 0x6bf   :  { %973 = vmatpush.msrb.mxu3 %v3387_v31 }
 0x6c1   :  { %974 = vmatpush.msrb.mxu3 %v3392_v32 }
 0x6c3   :  { %975 = vmatpush.msrb.mxu3 %v3399_v33 }
 0x6c5   :  { %976 = vmatpush.msrb.mxu3 %v3410_v36 }
 0x6c7   :  { %977 = vmatpush.msrb.mxu3 %v3417_v37 }
 0x6c9   :  { %978 = vmatpush.msrb.mxu3 %v3422_v38 }
 0x6cb   :  { %979 = vmatpush.msrb.mxu3 %v3429_v39 }
 0x6cd   :  { %980 = vmatpush.msrb.mxu3 %v3438_v40 }
 0x6f4   :  { %v551_v29 = vpop.permute.xlu2 %550 }
 0x6f5   :  { %v553_v45 = vsel %vm199_vm7, %v547_v44, %v551_v29 }
 0x6f6   :  { %2787 = vmatmul.msk.f32.vlgmr.msrb.gmra.mxu2 %vm209_vm8, %v553_v45 }
 0x6f7   :  { %1177 = vmatpush.msrb.mxu2 %v3387_v31 }
 0x6f9   :  { %1178 = vmatpush.msrb.mxu2 %v3392_v32 }
 0x6fb   :  { %1179 = vmatpush.msrb.mxu2 %v3399_v33 }
 0x6fd   :  { %1180 = vmatpush.msrb.mxu2 %v3410_v36 }
 0x6ff   :  { %1181 = vmatpush.msrb.mxu2 %v3417_v37 }
 0x701   :  { %1182 = vmatpush.msrb.mxu2 %v3422_v38 }
 0x703   :  { %1183 = vmatpush.msrb.mxu2 %v3429_v39 }
 0x705   :  { %1184 = vmatpush.msrb.mxu2 %v3438_v40 }
 0x70c   :  { %v615_v55 = vpop.permute.xlu0 %614 }
 0x70d   :  { %v619_v56 = vpop.permute.xlu1 %618 }
 0x70e   :  { %v621_v57 = vsel %vm199_vm7, %v615_v55, %v619_v56 }
 0x70f   :  { %2789 = vmatmul.msk.f32.vlgmr.msra.gmra.mxu3 %vm209_vm8, %v621_v57 }
 0x710   :  { %1245 = vmatpush.msra.mxu3 %v3488_v46 }
 0x712   :  { %1246 = vmatpush.msra.mxu3 %v3495_v47 }
 0x714   :  { %1247 = vmatpush.msra.mxu3 %v3500_v48 }
 0x716   :  { %1248 = vmatpush.msra.mxu3 %v3507_v50 }
 0x718   :  { %1249 = vmatpush.msra.mxu3 %v3514_v51 }
 0x71a   :  { %1250 = vmatpush.msra.mxu3 %v3521_v52 }
 0x71c   :  { %1251 = vmatpush.msra.mxu3 %v3528_v53 }
 0x71e   :  { %1252 = vmatpush.msra.mxu3 %v3537_v54 }
 0x741   :  { %v506_v58 = vpop.f32.mrf.mxu3 }
 0x742   :  { %v507_v59 = vadd.f32 %v3374_v8, %v506_v58 }
 0x744   :  { %2929 = vtanh.f32 %v507_v59  ;;  %v2786_v61 = vmul.f32 -1.442695, %v507_v59 }
 0x746   :  { %2931 = vpow2.f32 %v2786_v61 }
 0x74a   :  { %v2930_v60 = vpop.eup %2929 }
 0x74b   :  { %531 = vrot.lane.b32.xlu2 %v2930_v60, %s3239_s28 }
 0x74c   :  { %v2932_v2 = vpop.eup %2931 }
 0x74d   :  { %v512_v63 = vadd.f32 1.0, %v2932_v2 }
 0x74f   :  { %v524_v13 = vand.u32 2147483648, %v512_v63  ;;  %vm518_vm6 = vweird.f32 %v512_v63  ;;  %v522_v14 = vand.u32 2147483647, %v512_v63 }
 0x751   :  { %v525_v17 = vor.u32 1.1754944e-38, %v524_v13  ;;  %vm523_vm10 = vcmp.eq.f32.partialorder %v522_v14, 8.507059e+37 }
 0x779   :  { %v574_v62 = vpop.f32.mrf.mxu2 }
 0x77a   :  { %v575_v1 = vadd.f32 %v3465_v49, %v574_v62 }
 0x77c   :  { %2933 = vtanh.f32 %v575_v1  ;;  %v2788_v22 = vmul.f32 -1.442695, %v575_v1 }
 0x77d   :  { %2935 = vrcp.f32 %v512_v63 }
 0x782   :  { %v2934_v4 = vpop.eup %2933 }
 0x783   :  { %599 = vrot.lane.b32.xlu0 %v2934_v4, %s3239_s28  ;;  %v2936_v6 = vpop.eup %2935 }
 0x784   :  { %v514_v7 = vmul.f32 %v2936_v6, %v512_v63  ;;  %vm519_vm5 = vweird.f32 %v2936_v6 }
 0x785   :  { %vm520_vm9 = vmor %vm518_vm6, %vm519_vm5 }
 0x786   :  { %v515_v9 = vsub.f32 1.0, %v514_v7 }
 0x788   :  { %v516_v10 = vmul.f32 %v2936_v6, %v515_v9 }
 0x78a   :  { %v517_v12 = vadd.f32 %v2936_v6, %v516_v10 }
 0x78c   :  { %v521_v15 = vsel %vm520_vm9, %v2936_v6, %v517_v12 }
 0x78d   :  { %v3650_v18 = vsel %vm523_vm10, %v525_v17, %v521_v15 }
 0x78e   :  { %v529_v62 = vmul.f32 %v3650_v18, %v3592_v16 }
 0x792   :  { %v642_v0 = vpop.f32.mrf.mxu3 }
 0x793   :  { %v643_v8 = vadd.f32 %v3581_v3, %v642_v0 }
 0x795   :  { %2937 = vtanh.f32 %v643_v8  ;;  %v2790_v26 = vmul.f32 -1.442695, %v643_v8 }
 0x796   :  { %2939 = vpow2.f32 %v2788_v22 }
 0x79b   :  { %v2938_v11 = vpop.eup %2937 }
 0x79c   :  { %667 = vrot.lane.b32.xlu1 %v2938_v11, %s3239_s28  ;;  %v2940_v28 = vpop.eup %2939 }
 0x79d   :  { %v580_v24 = vadd.f32 1.0, %v2940_v28 }
 0x79f   :  { %2941 = vrcp.f32 %v580_v24  ;;  %v592_v44 = vand.u32 2147483648, %v580_v24  ;;  %vm586_vm12 = vweird.f32 %v580_v24  ;;  %v590_v29 = vand.u32 2147483647, %v580_v24 }
 0x7a0   :  { %2943 = vpow2.f32 %v2790_v26  ;;  %v3683_v26 = vld [vmem:[%s4572_s1 + $0x20] sm:$0x1] }
 0x7a1   :  { %v593_v55 = vor.u32 1.1754944e-38, %v592_v44  ;;  %vm591_vm14 = vcmp.eq.f32.partialorder %v590_v29, 8.507059e+37 }
 0x7a5   :  { %v532_v19 = vpop.permute.xlu2 %531  ;;  %v2942_v25 = vpop.eup %2941 }
 0x7a6   :  { %v534_v20 = vmul.f32 %v532_v19, %v3650_v18  ;;  %v582_v41 = vmul.f32 %v2942_v25, %v580_v24  ;;  %v2944_v42 = vpop.eup %2943  ;;  %vm587_vm11 = vweird.f32 %v2942_v25 }
 0x7a7   :  { %v648_v43 = vadd.f32 1.0, %v2944_v42  ;;  %vm588_vm13 = vmor %vm586_vm12, %vm587_vm11  ;;  %v3708_v42 = vld [vmem:[%s4572_s1] sm:$0xff] }
 0x7a8   :  { %536 = vrot.lane.b32.xlu2 %v534_v20, %s3240_s29  ;;  %v583_v27 = vsub.f32 1.0, %v582_v41  ;;  %v3690_v41 = vld [vmem:[%s4572_s1 + $0x18] sm:$0xff] }
 0x7a9   :  { %2945 = vrcp.f32 %v648_v43  ;;  %v660_v6 = vand.u32 2147483648, %v648_v43  ;;  %vm654_vm3 = vweird.f32 %v648_v43  ;;  %v658_v0 = vand.u32 2147483647, %v648_v43 }
 0x7aa   :  { %v584_v30 = vmul.f32 %v2942_v25, %v583_v27  ;;  %v3696_v27 = vld [vmem:[%s4572_s1 + $0x10] sm:$0xff] }
 0x7ab   :  { %v661_v9 = vor.u32 1.1754944e-38, %v660_v6  ;;  %vm659_vm5 = vcmp.eq.f32.partialorder %v658_v0, 8.507059e+37 }
 0x7ac   :  { %v585_v34 = vadd.f32 %v2942_v25, %v584_v30  ;;  %v3702_v30 = vld [vmem:[%s4572_s1 + $0x8] sm:$0xff] }
 0x7ae   :  { %v589_v45 = vsel %vm588_vm13, %v2942_v25, %v585_v34 }
 0x7af   :  { %v594_v57 = vsel %vm591_vm14, %v593_v55, %v589_v45  ;;  %v2946_v59 = vpop.eup %2945 }
 0x7b0   :  { %v650_v60 = vmul.f32 %v2946_v59, %v648_v43  ;;  %vm655_vm15 = vweird.f32 %v2946_v59  ;;  %v597_v12 = vmul.f32 %v594_v57, %v3598_v21 }
 0x7b1   :  { %vm656_vm4 = vmor %vm654_vm3, %vm655_vm15 }
 0x7b2   :  { %v651_v61 = vsub.f32 1.0, %v650_v60 }
 0x7b4   :  { %v652_v4 = vmul.f32 %v2946_v59, %v651_v61 }
 0x7b6   :  { %v653_v63 = vadd.f32 %v2946_v59, %v652_v4 }
 0x7b8   :  { %v657_v8 = vsel %vm656_vm4, %v2946_v59, %v653_v63 }
 0x7b9   :  { %v662_v16 = vsel %vm659_vm5, %v661_v9, %v657_v8 }
 0x7ba   :  { %v665_v20 = vmul.f32 %v662_v16, %v3600_v23 }
 0x7f5   :  { %v600_v56 = vpop.permute.xlu0 %599 }
 0x7f6   :  { %v602_v58 = vmul.f32 %v600_v56, %v594_v57  ;;  %v3725_v56 = vld [vmem:[%s4573_s2] ss:$0 sm:$0xff] }
 0x7f8   :  { %604 = vrot.lane.b32.xlu0 %v602_v58, %s3240_s29 }
 0x802   :  { %v537_v1 = vpop.permute.xlu2 %536 }
 0x803   :  { %v3657_v2 = vadd.f32 %v537_v1, %v529_v62 }
 0x805   :  { %2947 = vtanh.f32 %v3657_v2 }
 0x80b   :  { %v2948_v7 = vpop.eup %2947 }
 0x80c   :  { %542 = vrot.lane.b32.xlu2 %v2948_v7, %s3239_s28 }
 0x80e   :  { %v668_v10 = vpop.permute.xlu1 %667 }
 0x80f   :  { %v670_v11 = vmul.f32 %v668_v10, %v662_v16 }
 0x811   :  { %672 = vrot.lane.b32.xlu1 %v670_v11, %s3240_s29 }
 0x814   :  { %682 = vrot.lane.b32.xlu2 %v3345_v5, %s3245_s13 }
 0x866   :  { %v543_v17 = vpop.permute.xlu2 %542 }
 0x867   :  { %v545_v19 = vmul.f32 %v543_v17, %v3650_v18 }
 0x86a   :  { %v605_v13 = vpop.permute.xlu0 %604 }
 0x86b   :  { %v3664_v14 = vadd.f32 %v605_v13, %v597_v12 }
 0x86d   :  { %2949 = vtanh.f32 %v3664_v14 }
 0x86e   :  { %v683_v18 = vpop.permute.xlu2 %682 }
 0x873   :  { %v2950_v15 = vpop.eup %2949 }
 0x874   :  { %610 = vrot.lane.b32.xlu0 %v2950_v15, %s3239_s28 }
 0x87c   :  { %686 = vrot.lane.b32.xlu0 %v545_v19, %s3242_s17 }
 0x883   :  { %v673_v22 = vpop.permute.xlu1 %672 }
 0x884   :  { %v3671_v28 = vadd.f32 %v673_v22, %v665_v20 }
 0x886   :  { %2951 = vtanh.f32 %v3671_v28 }
 0x88c   :  { %v2952_v5 = vpop.eup %2951 }
 0x88d   :  { %678 = vrot.lane.b32.xlu1 %v2952_v5, %s3239_s28 }
 0x895   :  { %750 = vrot.lane.b32.xlu1 %v545_v19, %s3240_s29 }
 0x8e6   :  { %v611_v21 = vpop.permute.xlu0 %610 }
 0x8e7   :  { %v613_v24 = vmul.f32 %v611_v21, %v594_v57 }
 0x8e9   :  { %818 = vrot.lane.b32.xlu0 %v613_v24, %s3240_s29  ;;  %754 = vrot.lane.b32.xlu2 %v613_v24, %s3239_s28 }
 0x8ee   :  { %v687_v25 = vpop.permute.xlu0 %686 }
 0x8ef   :  { %v689_v23 = vsel %vm55_vm1, %v683_v18, %v687_v25 }
 0x8f0   :  { %2792 = vmatmul.msk.f32.vlgmr.msra.gmra.mxu0 %vm62_vm2, %v689_v23 }
 0x8f1   :  { %2805 = vmatpush.msk.msra.mxu0 %vm66_vm0, %v3683_v26 }
 0x8f3   :  { %1113 = vmatpush.msra.mxu0 %v3690_v41 }
 0x8f5   :  { %1114 = vmatpush.msra.mxu0 %v3696_v27 }
 0x8f7   :  { %1115 = vmatpush.msra.mxu0 %v3702_v30 }
 0x8f9   :  { %1116 = vmatpush.msra.mxu0 %v3708_v42 }
 0x8ff   :  { %v679_v43 = vpop.permute.xlu1 %678 }
 0x900   :  { %v681_v34 = vmul.f32 %v679_v43, %v662_v16 }
 0x902   :  { %822 = vrot.lane.b32.xlu1 %v681_v34, %s3239_s28 }
 0x907   :  { %v751_v44 = vpop.permute.xlu1 %750 }
 0x943   :  { %v755_v29 = vpop.permute.xlu2 %754 }
 0x944   :  { %v757_v45 = vsel %vm199_vm7, %v751_v44, %v755_v29 }
 0x945   :  { %2794 = vmatmul.msk.f32.vlgmr.msra.gmra.mxu1 %vm209_vm8, %v757_v45 }
 0x946   :  { %1381 = vmatpush.msra.mxu1 %v3387_v31 }
 0x948   :  { %1382 = vmatpush.msra.mxu1 %v3392_v32 }
 0x94a   :  { %1383 = vmatpush.msra.mxu1 %v3399_v33 }
 0x94c   :  { %1384 = vmatpush.msra.mxu1 %v3410_v36 }
 0x94e   :  { %1385 = vmatpush.msra.mxu1 %v3417_v37 }
 0x950   :  { %1386 = vmatpush.msra.mxu1 %v3422_v38 }
 0x952   :  { %1387 = vmatpush.msra.mxu1 %v3429_v39 }
 0x954   :  { %1388 = vmatpush.msra.mxu1 %v3438_v40 }
 0x95b   :  { %v819_v32 = vpop.permute.xlu0 %818 }
 0x96d   :  { %v710_v55 = vpop.f32.mrf.mxu0 }
 0x96e   :  { %v711_v31 = vadd.f32 %v3725_v56, %v710_v55 }
 0x970   :  { %2953 = vtanh.f32 %v711_v31  ;;  %v2793_v38 = vmul.f32 -1.442695, %v711_v31 }
 0x972   :  { %2955 = vpow2.f32 %v2793_v38 }
 0x974   :  { %v3728_v33 = vpop.permute.xlu1 %822 }
 0x975   :  { %v825_v36 = vsel %vm199_vm7, %v819_v32, %v3728_v33 }
 0x976   :  { %v2954_v37 = vpop.eup %2953  ;;  %2796 = vmatmul.msk.f32.vlgmr.msra.gmra.mxu2 %vm209_vm8, %v825_v36 }
 0x977   :  { %735 = vrot.lane.b32.xlu2 %v2954_v37, %s3239_s28  ;;  %1449 = vmatpush.msra.mxu2 %v3488_v46 }
 0x978   :  { %v2956_v39 = vpop.eup %2955 }
 0x979   :  { %1450 = vmatpush.msra.mxu2 %v3495_v47  ;;  %v716_v40 = vadd.f32 1.0, %v2956_v39 }
 0x97b   :  { %1451 = vmatpush.msra.mxu2 %v3500_v48  ;;  %2957 = vrcp.f32 %v716_v40  ;;  %v728_v63 = vand.u32 2147483648, %v716_v40  ;;  %vm722_vm9 = vweird.f32 %v716_v40  ;;  %v726_v6 = vand.u32 2147483647, %v716_v40 }
 0x97d   :  { %1452 = vmatpush.msra.mxu2 %v3507_v50  ;;  %v729_v7 = vor.u32 1.1754944e-38, %v728_v63  ;;  %vm727_vm11 = vcmp.eq.f32.partialorder %v726_v6, 8.507059e+37 }
 0x97f   :  { %1453 = vmatpush.msra.mxu2 %v3514_v51 }
 0x981   :  { %1454 = vmatpush.msra.mxu2 %v3521_v52  ;;  %v2958_v57 = vpop.eup %2957 }
 0x982   :  { %v718_v58 = vmul.f32 %v2958_v57, %v716_v40  ;;  %vm723_vm6 = vweird.f32 %v2958_v57 }
 0x983   :  { %1455 = vmatpush.msra.mxu2 %v3528_v53  ;;  %vm724_vm10 = vmor %vm722_vm9, %vm723_vm6 }
 0x984   :  { %v719_v60 = vsub.f32 1.0, %v718_v58 }
 0x985   :  { %1456 = vmatpush.msra.mxu2 %v3537_v54 }
 0x986   :  { %v720_v62 = vmul.f32 %v2958_v57, %v719_v60 }
 0x988   :  { %v721_v1 = vadd.f32 %v2958_v57, %v720_v62 }
 0x98a   :  { %v725_v0 = vsel %vm724_vm10, %v2958_v57, %v721_v1 }
 0x98b   :  { %v730_v9 = vsel %vm727_vm11, %v729_v7, %v725_v0 }
 0x98c   :  { %v733_v20 = vmul.f32 %v730_v9, %v3657_v2 }
 0x9c2   :  { %v778_v59 = vpop.f32.mrf.mxu1 }
 0x9c3   :  { %v779_v61 = vadd.f32 %v3465_v49, %v778_v59 }
 0x9c5   :  { %2959 = vtanh.f32 %v779_v61  ;;  %v2795_v12 = vmul.f32 -1.442695, %v779_v61 }
 0x9cb   :  { %v2960_v4 = vpop.eup %2959 }
 0x9cc   :  { %803 = vrot.lane.b32.xlu0 %v2960_v4, %s3239_s28 }
 0x9d1   :  { %v736_v8 = vpop.permute.xlu2 %735 }
 0x9d2   :  { %v738_v10 = vmul.f32 %v736_v8, %v730_v9 }
 0x9d4   :  { %740 = vrot.lane.b32.xlu2 %v738_v10, %s3240_s29 }
 0x9f9   :  { %v846_v49 = vpop.f32.mrf.mxu2 }
 0x9fa   :  { %v847_v16 = vadd.f32 %v3581_v3, %v846_v49 }
 0x9fc   :  { %2961 = vtanh.f32 %v847_v16  ;;  %v2797_v55 = vmul.f32 -1.442695, %v847_v16 }
 0x9fd   :  { %2963 = vpow2.f32 %v2795_v12 }
 0xa02   :  { %v2962_v11 = vpop.eup %2961 }
 0xa03   :  { %871 = vrot.lane.b32.xlu1 %v2962_v11, %s3239_s28  ;;  %v2964_v13 = vpop.eup %2963 }
 0xa04   :  { %v784_v15 = vadd.f32 1.0, %v2964_v13 }
 0xa06   :  { %2965 = vrcp.f32 %v784_v15  ;;  %v796_v23 = vand.u32 2147483648, %v784_v15  ;;  %vm790_vm13 = vweird.f32 %v784_v15  ;;  %v794_v43 = vand.u32 2147483647, %v784_v15 }
 0xa08   :  { %v797_v44 = vor.u32 1.1754944e-38, %v796_v23  ;;  %vm795_vm15 = vcmp.eq.f32.partialorder %v794_v43, 8.507059e+37 }
 0xa0c   :  { %v2966_v17 = vpop.eup %2965 }
 0xa0d   :  { %v786_v19 = vmul.f32 %v2966_v17, %v784_v15  ;;  %vm791_vm12 = vweird.f32 %v2966_v17 }
 0xa0e   :  { %vm792_vm14 = vmor %vm790_vm13, %vm791_vm12 }
 0xa0f   :  { %v787_v21 = vsub.f32 1.0, %v786_v19 }
 0xa11   :  { %v788_v24 = vmul.f32 %v2966_v17, %v787_v21 }
 0xa13   :  { %v789_v25 = vadd.f32 %v2966_v17, %v788_v24 }
 0xa15   :  { %v793_v34 = vsel %vm792_vm14, %v2966_v17, %v789_v25 }
 0xa16   :  { %v798_v29 = vsel %vm795_vm15, %v797_v44, %v793_v34 }
 0xa17   :  { %v801_v6 = vmul.f32 %v798_v29, %v3664_v14  ;;  %v3769_v14 = vld [vmem:[%s4571_s0] sm:$0x3] }
 0xa2e   :  { %v741_v22 = vpop.permute.xlu2 %740 }
 0xa2f   :  { %v3748_v5 = vadd.f32 %v741_v22, %v733_v20 }
 0xa31   :  { %2967 = vtanh.f32 %v3748_v5 }
 0xa32   :  { %2969 = vpow2.f32 %v2797_v55 }
 0xa37   :  { %v2968_v18 = vpop.eup %2967 }
 0xa38   :  { %746 = vrot.lane.b32.xlu2 %v2968_v18, %s3239_s28  ;;  %v2970_v31 = vpop.eup %2969 }
 0xa39   :  { %v852_v32 = vadd.f32 1.0, %v2970_v31 }
 0xa3b   :  { %2971 = vrcp.f32 %v852_v32  ;;  %v864_v57 = vand.u32 2147483648, %v852_v32  ;;  %vm858_vm4 = vweird.f32 %v852_v32  ;;  %v862_v58 = vand.u32 2147483647, %v852_v32 }
 0xa3d   :  { %v865_v60 = vor.u32 1.1754944e-38, %v864_v57  ;;  %vm863_vm6 = vcmp.eq.f32.partialorder %v862_v58, 8.507059e+37 }
 0xa3e   :  { %v804_v2 = vpop.permute.xlu0 %803 }
 0xa3f   :  { %v806_v45 = vmul.f32 %v804_v2, %v798_v29 }
 0xa41   :  { %808 = vrot.lane.b32.xlu0 %v806_v45, %s3240_s29  ;;  %v2972_v36 = vpop.eup %2971 }
 0xa42   :  { %v854_v37 = vmul.f32 %v2972_v36, %v852_v32  ;;  %vm859_vm3 = vweird.f32 %v2972_v36 }
 0xa43   :  { %vm860_vm5 = vmor %vm858_vm4, %vm859_vm3 }
 0xa44   :  { %v855_v38 = vsub.f32 1.0, %v854_v37 }
 0xa46   :  { %v856_v39 = vmul.f32 %v2972_v36, %v855_v38 }
 0xa48   :  { %v857_v40 = vadd.f32 %v2972_v36, %v856_v39 }
 0xa4a   :  { %v861_v59 = vsel %vm860_vm5, %v2972_v36, %v857_v40 }
 0xa4b   :  { %v866_v62 = vsel %vm863_vm6, %v865_v60, %v861_v59 }
 0xa4c   :  { %v869_v10 = vmul.f32 %v866_v62, %v3671_v28 }
 0xa75   :  { %v872_v61 = vpop.permute.xlu1 %871 }
 0xa76   :  { %v874_v1 = vmul.f32 %v872_v61, %v866_v62 }
 0xa78   :  { %876 = vrot.lane.b32.xlu1 %v874_v1, %s3240_s29 }
 0xa92   :  { %v747_v4 = vpop.permute.xlu2 %746 }
 0xa93   :  { %v749_v63 = vmul.f32 %v747_v4, %v730_v9 }
 0xa95   :  { %954 = vrot.lane.b32.xlu2 %v749_v63, %s3240_s29 }
 0xa9d   :  { %890 = vrot.lane.b32.xlu2 %v749_v63, %s3242_s17 }
 0xab3   :  { %v809_v0 = vpop.permute.xlu0 %808 }
 0xab4   :  { %v3757_v7 = vadd.f32 %v809_v0, %v801_v6 }
 0xab6   :  { %2973 = vtanh.f32 %v3757_v7 }
 0xabc   :  { %v2974_v8 = vpop.eup %2973 }
 0xabd   :  { %814 = vrot.lane.b32.xlu0 %v2974_v8, %s3239_s28 }
 0xaea   :  { %v877_v49 = vpop.permute.xlu1 %876 }
 0xaeb   :  { %v3762_v16 = vadd.f32 %v877_v49, %v869_v10 }
 0xaed   :  { %2975 = vtanh.f32 %v3762_v16 }
 0xaef   :  { %v955_v28 = vpop.permute.xlu2 %954 }
 0xaf3   :  { %v2976_v9 = vpop.eup %2975 }
 0xaf4   :  { %882 = vrot.lane.b32.xlu1 %v2976_v9, %s3239_s28 }
 0xaf7   :  { %v891_v17 = vpop.permute.xlu2 %890 }
 0xafc   :  { %886 = vrot.lane.b32.xlu1 %v3769_v14, %s3246_s30 }
 0xb2f   :  { %v815_v11 = vpop.permute.xlu0 %814 }
 0xb30   :  { %v817_v12 = vmul.f32 %v815_v11, %v798_v29 }
 0xb32   :  { %958 = vrot.lane.b32.xlu0 %v817_v12, %s3239_s28 }
 0xb3a   :  { %1022 = vrot.lane.b32.xlu0 %v817_v12, %s3240_s29 }
 0xb66   :  { %v883_v13 = vpop.permute.xlu1 %882 }
 0xb67   :  { %v3774_v15 = vmul.f32 %v883_v13, %v866_v62 }
 0xb69   :  { %1026 = vrot.lane.b32.xlu1 %v3774_v15, %s3239_s28 }
 0xb6e   :  { %v887_v19 = vpop.permute.xlu1 %886 }
 0xb6f   :  { %v893_v20 = vsel %vm55_vm1, %v887_v19, %v891_v17 }
 0xb70   :  { %2799 = vmatmul.msk.f32.vlgmr.msrb.gmra.mxu0 %vm62_vm2, %v893_v20 }
 0xb71   :  { %2812 = vmatpush.msk.msrb.mxu0 %vm66_vm0, %v3683_v26 }
 0xb73   :  { %1317 = vmatpush.msrb.mxu0 %v3690_v41 }
 0xb75   :  { %1318 = vmatpush.msrb.mxu0 %v3696_v27 }
 0xb77   :  { %1319 = vmatpush.msrb.mxu0 %v3702_v30 }
 0xb79   :  { %1320 = vmatpush.msrb.mxu0 %v3708_v42 }
 0xba4   :  { %v959_v22 = vpop.permute.xlu0 %958 }
 0xba5   :  { %v961_v21 = vsel %vm199_vm7, %v955_v28, %v959_v22 }
 0xba6   :  { %2801 = vmatmul.msk.f32.vlgmr.msrb.gmra.mxu3 %vm209_vm8, %v961_v21 }
 0xba7   :  { %1586 = vmatpush.msrb.mxu3 %v3488_v46 }
 0xba9   :  { %1587 = vmatpush.msrb.mxu3 %v3495_v47 }
 0xbab   :  { %1588 = vmatpush.msrb.mxu3 %v3500_v48 }
 0xbac   :  { %v1023_v24 = vpop.permute.xlu0 %1022 }
 0xbad   :  { %1589 = vmatpush.msrb.mxu3 %v3507_v50 }
 0xbaf   :  { %1590 = vmatpush.msrb.mxu3 %v3514_v51 }
 0xbb1   :  { %1591 = vmatpush.msrb.mxu3 %v3521_v52 }
 0xbb3   :  { %1592 = vmatpush.msrb.mxu3 %v3528_v53 }
 0xbb5   :  { %1593 = vmatpush.msrb.mxu3 %v3537_v54 }
 0xbdb   :  { %v1027_v18 = vpop.permute.xlu1 %1026 }
 0xbdc   :  { %v1029_v25 = vsel %vm199_vm7, %v1023_v24, %v1027_v18 }
 0xbdd   :  { %2803 = vmatmul.msk.f32.vlgmr.msrb.gmra.mxu1 %vm209_vm8, %v1029_v25 }
 0xbde   :  { %1655 = vmatpush.msrb.mxu1 %v3488_v46 }
 0xbe0   :  { %1656 = vmatpush.msrb.mxu1 %v3495_v47 }
 0xbe2   :  { %1657 = vmatpush.msrb.mxu1 %v3500_v48  ;;  %v3811_v48 = vld [vmem:[%s4575_s4] ss:$0 sm:$0xff] }
 0xbe4   :  { %1658 = vmatpush.msrb.mxu1 %v3507_v50 }
 0xbe6   :  { %1659 = vmatpush.msrb.mxu1 %v3514_v51 }
 0xbe8   :  { %1660 = vmatpush.msrb.mxu1 %v3521_v52 }
 0xbea   :  { %1661 = vmatpush.msrb.mxu1 %v3528_v53 }
 0xbec   :  { %1662 = vmatpush.msrb.mxu1 %v3537_v54 }
 0xbed   :  { %v914_v23 = vpop.f32.mrf.mxu0 }
 0xbee   :  { %v915_v43 = vadd.f32 %v3725_v56, %v914_v23 }
 0xbf0   :  { %2977 = vtanh.f32 %v915_v43  ;;  %v2800_v46 = vmul.f32 -1.442695, %v915_v43 }
 0xbf2   :  { %2979 = vpow2.f32 %v2800_v46 }
 0xbf6   :  { %v2978_v34 = vpop.eup %2977 }
 0xbf7   :  { %939 = vrot.lane.b32.xlu2 %v2978_v34, %s3239_s28 }
 0xbf8   :  { %v2980_v51 = vpop.eup %2979 }
 0xbf9   :  { %v920_v52 = vadd.f32 1.0, %v2980_v51 }
 0xbfb   :  { %v932_v55 = vand.u32 2147483648, %v920_v52  ;;  %vm926_vm10 = vweird.f32 %v920_v52  ;;  %v930_v31 = vand.u32 2147483647, %v920_v52 }
 0xbfd   :  { %v933_v36 = vor.u32 1.1754944e-38, %v932_v55  ;;  %vm931_vm12 = vcmp.eq.f32.partialorder %v930_v31, 8.507059e+37 }
 0xc29   :  { %v982_v47 = vpop.f32.mrf.mxu3 }
 0xc2a   :  { %v983_v50 = vadd.f32 %v3811_v48, %v982_v47 }
 0xc2c   :  { %2981 = vtanh.f32 %v983_v50  ;;  %v2802_v59 = vmul.f32 -1.442695, %v983_v50 }
 0xc2d   :  { %2983 = vrcp.f32 %v920_v52 }
 0xc32   :  { %v2982_v53 = vpop.eup %2981 }
 0xc33   :  { %1007 = vrot.lane.b32.xlu0 %v2982_v53, %s3239_s28  ;;  %v2984_v54 = vpop.eup %2983 }
 0xc34   :  { %v922_v44 = vmul.f32 %v2984_v54, %v920_v52  ;;  %vm927_vm9 = vweird.f32 %v2984_v54 }
 0xc35   :  { %vm928_vm11 = vmor %vm926_vm10, %vm927_vm9 }
 0xc36   :  { %v923_v2 = vsub.f32 1.0, %v922_v44 }
 0xc38   :  { %v924_v29 = vmul.f32 %v2984_v54, %v923_v2 }
 0xc3a   :  { %v925_v45 = vadd.f32 %v2984_v54, %v924_v29 }
 0xc3c   :  { %v929_v32 = vsel %vm928_vm11, %v2984_v54, %v925_v45 }
 0xc3d   :  { %v934_v38 = vsel %vm931_vm12, %v933_v36, %v929_v32 }
 0xc3e   :  { %v937_v28 = vmul.f32 %v934_v38, %v3748_v5 }
 0xc51   :  { %v940_v37 = vpop.permute.xlu2 %939 }
 0xc52   :  { %v942_v39 = vmul.f32 %v940_v37, %v934_v38 }
 0xc54   :  { %944 = vrot.lane.b32.xlu2 %v942_v39, %s3240_s29 }
 0xc5a   :  { %v1050_v40 = vpop.f32.mrf.mxu1 }
 0xc5b   :  { %v1051_v57 = vadd.f32 %v3581_v3, %v1050_v40 }
 0xc5d   :  { %2985 = vtanh.f32 %v1051_v57  ;;  %v2804_v12 = vmul.f32 -1.442695, %v1051_v57 }
 0xc5e   :  { %2987 = vpow2.f32 %v2802_v59 }
 0xc63   :  { %v2986_v58 = vpop.eup %2985 }
 0xc64   :  { %1075 = vrot.lane.b32.xlu1 %v2986_v58, %s3239_s28  ;;  %v2988_v60 = vpop.eup %2987 }
 0xc65   :  { %v988_v61 = vadd.f32 1.0, %v2988_v60 }
 0xc67   :  { %2989 = vrcp.f32 %v988_v61  ;;  %v1000_v0 = vand.u32 2147483648, %v988_v61  ;;  %vm994_vm14 = vweird.f32 %v988_v61  ;;  %v998_v8 = vand.u32 2147483647, %v988_v61 }
 0xc68   :  { %2991 = vpow2.f32 %v2804_v12 }
 0xc69   :  { %v1001_v10 = vor.u32 1.1754944e-38, %v1000_v0  ;;  %vm999_vm3 = vcmp.eq.f32.partialorder %v998_v8, 8.507059e+37  ;;  %v3887_v0 = vld [vmem:[%s4574_s3 + $0x8] sm:$0xff] }
 0xc6d   :  { %v2990_v62 = vpop.eup %2989 }
 0xc6e   :  { %v990_v1 = vmul.f32 %v2990_v62, %v988_v61  ;;  %vm995_vm13 = vweird.f32 %v2990_v62  ;;  %v2992_v19 = vpop.eup %2991  ;;  %v3851_v61 = vld [vmem:[%s4574_s3 + $0x38] sm:$0xff] }
 0xc6f   :  { %vm996_vm15 = vmor %vm994_vm14, %vm995_vm13  ;;  %v1056_v20 = vadd.f32 1.0, %v2992_v19 }
 0xc70   :  { %v991_v4 = vsub.f32 1.0, %v990_v1  ;;  %v3863_v1 = vld [vmem:[%s4574_s3 + $0x28] sm:$0xff] }
 0xc71   :  { %v1068_v43 = vand.u32 2147483648, %v1056_v20  ;;  %vm1062_vm5 = vweird.f32 %v1056_v20  ;;  %v1066_v5 = vand.u32 2147483647, %v1056_v20 }
 0xc72   :  { %v992_v63 = vmul.f32 %v2990_v62, %v991_v4  ;;  %v3869_v4 = vld [vmem:[%s4574_s3 + $0x20] sm:$0xff] }
 0xc73   :  { %v1069_v46 = vor.u32 1.1754944e-38, %v1068_v43  ;;  %vm1067_vm9 = vcmp.eq.f32.partialorder %v1066_v5, 8.507059e+37 }
 0xc74   :  { %v993_v6 = vadd.f32 %v2990_v62, %v992_v63  ;;  %v3875_v63 = vld [vmem:[%s4574_s3 + $0x18] sm:$0xff] }
 0xc76   :  { %v997_v3 = vsel %vm996_vm15, %v2990_v62, %v993_v6  ;;  %v3857_v62 = vld [vmem:[%s4574_s3 + $0x30] sm:$0xff] }
 0xc77   :  { %v1002_v49 = vsel %vm999_vm3, %v1001_v10, %v997_v3  ;;  %v3881_v6 = vld [vmem:[%s4574_s3 + $0x10] sm:$0xff]  ;;  %v3893_v3 = vld [vmem:[%s4574_s3] sm:$0xff] }
 0xc78   :  { %v1005_v54 = vmul.f32 %v1002_v49, %v3757_v7 }
 0xca5   :  { %v1008_v9 = vpop.permute.xlu0 %1007 }
 0xca6   :  { %v1010_v11 = vmul.f32 %v1008_v9, %v1002_v49 }
 0xca8   :  { %1012 = vrot.lane.b32.xlu0 %v1010_v11, %s3240_s29 }
 0xcae   :  { %v945_v13 = vpop.permute.xlu2 %944 }
 0xcaf   :  { %v3820_v17 = vadd.f32 %v945_v13, %v937_v28 }
 0xcb1   :  { %2993 = vtanh.f32 %v3820_v17 }
 0xcb2   :  { %2995 = vrcp.f32 %v1056_v20 }
 0xcb7   :  { %v2994_v22 = vpop.eup %2993 }
 0xcb8   :  { %950 = vrot.lane.b32.xlu2 %v2994_v22, %s3239_s28  ;;  %v2996_v21 = vpop.eup %2995 }
 0xcb9   :  { %v1058_v24 = vmul.f32 %v2996_v21, %v1056_v20  ;;  %vm1063_vm4 = vweird.f32 %v2996_v21  ;;  %v3905_v20 = vld [vmem:[%s4577_s6] ss:$0 sm:$0xff] }
 0xcba   :  { %vm1064_vm6 = vmor %vm1062_vm5, %vm1063_vm4 }
 0xcbb   :  { %v1059_v18 = vsub.f32 1.0, %v1058_v24 }
 0xcbd   :  { %v1060_v25 = vmul.f32 %v2996_v21, %v1059_v18 }
 0xcbf   :  { %v1061_v23 = vadd.f32 %v2996_v21, %v1060_v25 }
 0xcc1   :  { %v1065_v34 = vsel %vm1064_vm6, %v2996_v21, %v1061_v23 }
 0xcc2   :  { %v1070_v50 = vsel %vm1067_vm9, %v1069_v46, %v1065_v34 }
 0xcc3   :  { %v1073_v45 = vmul.f32 %v1070_v50, %v3762_v16 }
 0xcd6   :  { %v1076_v47 = vpop.permute.xlu1 %1075 }
 0xcd7   :  { %v1078_v51 = vmul.f32 %v1076_v47, %v1070_v50 }
 0xcd9   :  { %1080 = vrot.lane.b32.xlu1 %v1078_v51, %s3240_s29 }
 0xd12   :  { %v951_v52 = vpop.permute.xlu2 %950 }
 0xd13   :  { %v953_v53 = vmul.f32 %v951_v52, %v934_v38 }
 0xd15   :  { %1158 = vrot.lane.b32.xlu2 %v953_v53, %s3240_s29 }
 0xd1a   :  { %v1013_v44 = vpop.permute.xlu0 %1012 }
 0xd1b   :  { %v3827_v2 = vadd.f32 %v1013_v44, %v1005_v54 }
 0xd1d   :  { %2997 = vtanh.f32 %v3827_v2 }
 0xd23   :  { %v2998_v29 = vpop.eup %2997 }
 0xd24   :  { %1018 = vrot.lane.b32.xlu0 %v2998_v29, %s3239_s28 }
 0xd4b   :  { %v1081_v55 = vpop.permute.xlu1 %1080 }
 0xd4c   :  { %v3832_v31 = vadd.f32 %v1081_v55, %v1073_v45 }
 0xd4e   :  { %2999 = vtanh.f32 %v3832_v31 }
 0xd54   :  { %v3000_v32 = vpop.eup %2999 }
 0xd55   :  { %1086 = vrot.lane.b32.xlu1 %v3000_v32, %s3239_s28 }
 0xd6f   :  { %v1159_v38 = vpop.permute.xlu2 %1158 }
 0xd96   :  { %v1019_v36 = vpop.permute.xlu0 %1018 }
 0xd97   :  { %v1021_v7 = vmul.f32 %v1019_v36, %v1002_v49 }
 0xd99   :  { %1162 = vrot.lane.b32.xlu0 %v1021_v7, %s3239_s28  ;;  %1226 = vrot.lane.b32.xlu1 %v1021_v7, %s3240_s29 }
 0xda1   :  { %1090 = vrot.lane.b32.xlu0 %v3769_v14, %s3247_s12  ;;  %1094 = vrot.lane.b32.xlu1 %v953_v53, %s3242_s17  ;;  %s3248_s12 = smov 121  }
 0xdc7   :  { %v1087_v16 = vpop.permute.xlu1 %1086 }
 0xdc8   :  { %v3840_v37 = vmul.f32 %v1087_v16, %v1070_v50 }
 0xdca   :  { %1230 = vrot.lane.b32.xlu2 %v3840_v37, %s3239_s28 }
 0xe0b   :  { %v1163_v39 = vpop.permute.xlu0 %1162  ;;  %v1227_v40 = vpop.permute.xlu1 %1226 }
 0xe0c   :  { %v1165_v57 = vsel %vm199_vm7, %v1159_v38, %v1163_v39 }
 0xe0d   :  { %2808 = vmatmul.msk.f32.vlgmr.msrb.gmra.mxu2 %vm209_vm8, %v1165_v57 }
 0xe13   :  { %v1091_v58 = vpop.permute.xlu0 %1090  ;;  %v1095_v59 = vpop.permute.xlu1 %1094 }
 0xe14   :  { %v1097_v60 = vsel %vm55_vm1, %v1091_v58, %v1095_v59 }
 0xe15   :  { %2806 = vmatmul.msk.f32.vlgmr.msra.gmra.mxu0 %vm62_vm2, %v1097_v60 }
 0xe16   :  { %1518 = vmatpush.msra.mxu0 %v3851_v61 }
 0xe18   :  { %1519 = vmatpush.msra.mxu0 %v3857_v62 }
 0xe1a   :  { %1520 = vmatpush.msra.mxu0 %v3863_v1 }
 0xe1c   :  { %1521 = vmatpush.msra.mxu0 %v3869_v4 }
 0xe1e   :  { %1522 = vmatpush.msra.mxu0 %v3875_v63 }
 0xe20   :  { %1523 = vmatpush.msra.mxu0 %v3881_v6 }
 0xe22   :  { %1524 = vmatpush.msra.mxu0 %v3887_v0 }
 0xe24   :  { %v1231_v8 = vpop.permute.xlu2 %1230  ;;  %1525 = vmatpush.msra.mxu0 %v3893_v3 }
 0xe25   :  { %v1233_v10 = vsel %vm199_vm7, %v1227_v40, %v1231_v8 }
 0xe26   :  { %2810 = vmatmul.msk.f32.vlgmr.msra.gmra.mxu3 %vm209_vm8, %v1233_v10 }
 0xe90   :  { %v1186_v49 = vpop.f32.mrf.mxu2 }
 0xe91   :  { %v1187_v9 = vadd.f32 %v3811_v48, %v1186_v49 }
 0xe92   :  { %v1118_v11 = vpop.f32.mrf.mxu0 }
 0xe93   :  { %3001 = vtanh.f32 %v1187_v9  ;;  %v1119_v12 = vadd.f32 %v3725_v56, %v1118_v11  ;;  %v2809_v24 = vmul.f32 -1.442695, %v1187_v9 }
 0xe95   :  { %3003 = vtanh.f32 %v1119_v12  ;;  %v2807_v5 = vmul.f32 -1.442695, %v1119_v12 }
 0xe99   :  { %v3002_v28 = vpop.eup %3001 }
 0xe9a   :  { %1211 = vrot.lane.b32.xlu2 %v3002_v28, %s3239_s28 }
 0xe9b   :  { %v3004_v13 = vpop.eup %3003 }
 0xe9c   :  { %1143 = vrot.lane.b32.xlu1 %v3004_v13, %s3239_s28 }
 0xea9   :  { %v1254_v19 = vpop.f32.mrf.mxu3 }
 0xeaa   :  { %v1255_v22 = vadd.f32 %v3905_v20, %v1254_v19 }
 0xeac   :  { %3005 = vtanh.f32 %v1255_v22  ;;  %v2811_v32 = vmul.f32 -1.442695, %v1255_v22 }
 0xead   :  { %3007 = vpow2.f32 %v2809_v24 }
 0xeb2   :  { %v3006_v21 = vpop.eup %3005 }
 0xeb3   :  { %1279 = vrot.lane.b32.xlu0 %v3006_v21, %s3239_s28  ;;  %v3008_v18 = vpop.eup %3007 }
 0xeb4   :  { %v1192_v25 = vadd.f32 1.0, %v3008_v18 }
 0xeb6   :  { %3009 = vrcp.f32 %v1192_v25  ;;  %v1204_v51 = vand.u32 2147483648, %v1192_v25  ;;  %vm1198_vm11 = vweird.f32 %v1192_v25  ;;  %v1202_v53 = vand.u32 2147483647, %v1192_v25 }
 0xeb7   :  { %3011 = vpow2.f32 %v2807_v5 }
 0xeb8   :  { %v1205_v44 = vor.u32 1.1754944e-38, %v1204_v51  ;;  %vm1203_vm13 = vcmp.eq.f32.partialorder %v1202_v53, 8.507059e+37 }
 0xebc   :  { %v3010_v23 = vpop.eup %3009 }
 0xebd   :  { %v1194_v43 = vmul.f32 %v3010_v23, %v1192_v25  ;;  %v3012_v47 = vpop.eup %3011  ;;  %vm1199_vm10 = vweird.f32 %v3010_v23 }
 0xebe   :  { %v1124_v52 = vadd.f32 1.0, %v3012_v47  ;;  %vm1200_vm12 = vmor %vm1198_vm11, %vm1199_vm10 }
 0xebf   :  { %v1195_v34 = vsub.f32 1.0, %v1194_v43 }
 0xec0   :  { %3013 = vrcp.f32 %v1124_v52  ;;  %v1136_v58 = vand.u32 2147483648, %v1124_v52  ;;  %vm1130_vm15 = vweird.f32 %v1124_v52  ;;  %v1134_v59 = vand.u32 2147483647, %v1124_v52 }
 0xec1   :  { %v1196_v46 = vmul.f32 %v3010_v23, %v1195_v34  ;;  %3015 = vpow2.f32 %v2811_v32 }
 0xec2   :  { %v1137_v8 = vor.u32 1.1754944e-38, %v1136_v58  ;;  %vm1135_vm4 = vcmp.eq.f32.partialorder %v1134_v59, 8.507059e+37 }
 0xec3   :  { %v1197_v50 = vadd.f32 %v3010_v23, %v1196_v46 }
 0xec5   :  { %v1201_v54 = vsel %vm1200_vm12, %v3010_v23, %v1197_v50 }
 0xec6   :  { %v1206_v29 = vsel %vm1203_vm13, %v1205_v44, %v1201_v54  ;;  %v3014_v36 = vpop.eup %3013 }
 0xec7   :  { %v1126_v7 = vmul.f32 %v3014_v36, %v1124_v52  ;;  %v3016_v38 = vpop.eup %3015  ;;  %vm1131_vm14 = vweird.f32 %v3014_v36  ;;  %v1209_v5 = vmul.f32 %v1206_v29, %v3827_v2 }
 0xec8   :  { %v1260_v40 = vadd.f32 1.0, %v3016_v38  ;;  %vm1132_vm3 = vmor %vm1130_vm15, %vm1131_vm14 }
 0xec9   :  { %v1127_v16 = vsub.f32 1.0, %v1126_v7 }
 0xeca   :  { %3017 = vrcp.f32 %v1260_v40  ;;  %v1272_v22 = vand.u32 2147483648, %v1260_v40  ;;  %vm1266_vm6 = vweird.f32 %v1260_v40  ;;  %v1270_v21 = vand.u32 2147483647, %v1260_v40 }
 0xecb   :  { %v1128_v39 = vmul.f32 %v3014_v36, %v1127_v16 }
 0xecc   :  { %v1273_v18 = vor.u32 1.1754944e-38, %v1272_v22  ;;  %vm1271_vm10 = vcmp.eq.f32.partialorder %v1270_v21, 8.507059e+37 }
 0xecd   :  { %v1129_v57 = vadd.f32 %v3014_v36, %v1128_v39 }
 0xecf   :  { %v1133_v60 = vsel %vm1132_vm3, %v3014_v36, %v1129_v57 }
 0xed0   :  { %v3018_v10 = vpop.eup %3017  ;;  %v1138_v9 = vsel %vm1135_vm4, %v1137_v8, %v1133_v60 }
 0xed1   :  { %v1262_v12 = vmul.f32 %v3018_v10, %v1260_v40  ;;  %vm1267_vm5 = vweird.f32 %v3018_v10  ;;  %v1141_v50 = vmul.f32 %v1138_v9, %v3820_v17 }
 0xed2   :  { %vm1268_vm9 = vmor %vm1266_vm6, %vm1267_vm5 }
 0xed3   :  { %v1263_v28 = vsub.f32 1.0, %v1262_v12 }
 0xed5   :  { %v1264_v13 = vmul.f32 %v3018_v10, %v1263_v28 }
 0xed7   :  { %v1265_v19 = vadd.f32 %v3018_v10, %v1264_v13 }
 0xed9   :  { %v1269_v24 = vsel %vm1268_vm9, %v3018_v10, %v1265_v19 }
 0xeda   :  { %v1274_v23 = vsel %vm1271_vm10, %v1273_v18, %v1269_v24 }
 0xedb   :  { %v1277_v2 = vmul.f32 %v1274_v23, %v3832_v31 }
 0xef4   :  { %v1212_v45 = vpop.permute.xlu2 %1211 }
 0xef5   :  { %v1214_v55 = vmul.f32 %v1212_v45, %v1206_v29 }
 0xef7   :  { %1216 = vrot.lane.b32.xlu2 %v1214_v55, %s3240_s29 }
 0xf0e   :  { %v1144_v49 = vpop.permute.xlu1 %1143 }
 0xf0f   :  { %v1146_v11 = vmul.f32 %v1144_v49, %v1138_v9 }
 0xf11   :  { %1148 = vrot.lane.b32.xlu1 %v1146_v11, %s3240_s29 }
 0xf25   :  { %v1280_v25 = vpop.permute.xlu0 %1279 }
 0xf26   :  { %v1282_v43 = vmul.f32 %v1280_v25, %v1274_v23 }
 0xf28   :  { %1284 = vrot.lane.b32.xlu0 %v1282_v43, %s3240_s29 }
 0xf51   :  { %v1217_v34 = vpop.permute.xlu2 %1216 }
 0xf52   :  { %v3913_v46 = vadd.f32 %v1217_v34, %v1209_v5 }
 0xf54   :  { %3019 = vtanh.f32 %v3913_v46 }
 0xf5a   :  { %v3020_v47 = vpop.eup %3019 }
 0xf5b   :  { %1222 = vrot.lane.b32.xlu2 %v3020_v47, %s3239_s28 }
 0xf83   :  { %v1149_v51 = vpop.permute.xlu1 %1148 }
 0xf84   :  { %v3918_v52 = vadd.f32 %v1149_v51, %v1141_v50 }
 0xf86   :  { %3021 = vtanh.f32 %v3918_v52 }
 0xf8c   :  { %v3022_v53 = vpop.eup %3021 }
 0xf8d   :  { %1154 = vrot.lane.b32.xlu1 %v3022_v53, %s3239_s28 }
 0xf9a   :  { %v1285_v54 = vpop.permute.xlu0 %1284 }
 0xf9b   :  { %v3923_v44 = vadd.f32 %v1285_v54, %v1277_v2 }
 0xf9d   :  { %3023 = vtanh.f32 %v3923_v44 }
 0xfa3   :  { %v3024_v45 = vpop.eup %3023 }
 0xfa4   :  { %1290 = vrot.lane.b32.xlu0 %v3024_v45, %s3239_s28 }
 0xfb5   :  { %v1223_v55 = vpop.permute.xlu2 %1222 }
 0xfb6   :  { %v1225_v17 = vmul.f32 %v1223_v55, %v1206_v29 }
 0xfb8   :  { %1430 = vrot.lane.b32.xlu2 %v1225_v17, %s3240_s29 }
 0xfc0   :  { %1366 = vrot.lane.b32.xlu2 %v1225_v17, %s3239_s28 }
 0xfff   :  { %v1155_v32 = vpop.permute.xlu1 %1154 }
0x1000   :  { %v1157_v36 = vmul.f32 %v1155_v32, %v1138_v9 }
0x1002   :  { %1362 = vrot.lane.b32.xlu1 %v1157_v36, %s3240_s29 }
0x100a   :  { %1298 = vrot.lane.b32.xlu1 %v1157_v36, %s3242_s17 }
0x1012   :  { %v1431_v29 = vpop.permute.xlu2 %1430 }
0x1016   :  { %v1291_v31 = vpop.permute.xlu0 %1290 }
0x1017   :  { %v3931_v7 = vmul.f32 %v1291_v31, %v1274_v23 }
0x1019   :  { %1434 = vrot.lane.b32.xlu0 %v3931_v7, %s3239_s28 }
0x101a   :  { %v1367_v16 = vpop.permute.xlu2 %1366 }
0x1021   :  { %1294 = vrot.lane.b32.xlu0 %v3769_v14, %s3248_s12 }
0x1074   :  { %v1363_v38 = vpop.permute.xlu1 %1362 }
0x1075   :  { %v1369_v39 = vsel %vm199_vm7, %v1363_v38, %v1367_v16 }
0x1076   :  { %2815 = vmatmul.msk.f32.vlgmr.msra.gmra.mxu1 %vm209_vm8, %v1369_v39 }
0x1077   :  { %2826 = vmatpush.msk.msra.mxu1 %vm66_vm0, %v3683_v26 }
0x1079   :  { %1847 = vmatpush.msra.mxu1 %v3690_v41 }
0x107b   :  { %1848 = vmatpush.msra.mxu1 %v3696_v27 }
0x107c   :  { %v1299_v57 = vpop.permute.xlu1 %1298 }
0x107d   :  { %1849 = vmatpush.msra.mxu1 %v3702_v30 }
0x107f   :  { %1850 = vmatpush.msra.mxu1 %v3708_v42 }
0x108b   :  { %v1435_v40 = vpop.permute.xlu0 %1434 }
0x108c   :  { %v1437_v14 = vsel %vm199_vm7, %v1431_v29, %v1435_v40 }
0x108d   :  { %2817 = vmatmul.msk.f32.vlgmr.msra.gmra.mxu2 %vm209_vm8, %v1437_v14 }
0x1093   :  { %v1295_v58 = vpop.permute.xlu0 %1294 }
0x1094   :  { %v1301_v59 = vsel %vm55_vm1, %v1295_v58, %v1299_v57 }
0x1095   :  { %2813 = vmatmul.msk.f32.vlgmr.msrb.gmra.mxu0 %vm62_vm2, %v1301_v59 }
0x10f3   :  { %v1390_v26 = vpop.f32.mrf.mxu1 }
0x10f4   :  { %v1391_v41 = vadd.f32 %v3811_v48, %v1390_v26 }
0x10f6   :  { %3025 = vtanh.f32 %v1391_v41  ;;  %v2816_v9 = vmul.f32 -1.442695, %v1391_v41 }
0x10fc   :  { %v3026_v27 = vpop.eup %3025 }
0x10fd   :  { %1415 = vrot.lane.b32.xlu2 %v3026_v27, %s3239_s28 }
0x1110   :  { %v1458_v30 = vpop.f32.mrf.mxu2 }
0x1111   :  { %v1459_v42 = vadd.f32 %v3905_v20, %v1458_v30 }
0x1112   :  { %v1322_v60 = vpop.f32.mrf.mxu0 }
0x1113   :  { %3027 = vtanh.f32 %v1459_v42  ;;  %v1323_v8 = vadd.f32 %v3725_v56, %v1322_v60  ;;  %v2818_v34 = vmul.f32 -1.442695, %v1459_v42 }
0x1115   :  { %3029 = vtanh.f32 %v1323_v8  ;;  %v2814_v47 = vmul.f32 -1.442695, %v1323_v8 }
0x1116   :  { %3031 = vpow2.f32 %v2816_v9 }
0x1119   :  { %v3028_v10 = vpop.eup %3027 }
0x111a   :  { %1483 = vrot.lane.b32.xlu0 %v3028_v10, %s3239_s28 }
0x111b   :  { %v3030_v49 = vpop.eup %3029 }
0x111c   :  { %1347 = vrot.lane.b32.xlu1 %v3030_v49, %s3239_s28  ;;  %v3032_v11 = vpop.eup %3031 }
0x111d   :  { %v1396_v12 = vadd.f32 1.0, %v3032_v11 }
0x111f   :  { %3033 = vrcp.f32 %v1396_v12  ;;  %v1408_v24 = vand.u32 2147483648, %v1396_v12  ;;  %vm1402_vm12 = vweird.f32 %v1396_v12  ;;  %v1406_v56 = vand.u32 2147483647, %v1396_v12 }
0x1120   :  { %3035 = vpow2.f32 %v2818_v34 }
0x1121   :  { %v1409_v25 = vor.u32 1.1754944e-38, %v1408_v24  ;;  %vm1407_vm14 = vcmp.eq.f32.partialorder %v1406_v56, 8.507059e+37  ;;  %3037 = vpow2.f32 %v2814_v47 }
0x1125   :  { %v3034_v28 = vpop.eup %3033 }
0x1126   :  { %v1398_v13 = vmul.f32 %v3034_v28, %v1396_v12  ;;  %vm1403_vm11 = vweird.f32 %v3034_v28  ;;  %v3036_v50 = vpop.eup %3035 }
0x1127   :  { %vm1404_vm13 = vmor %vm1402_vm12, %vm1403_vm11  ;;  %v3038_v51 = vpop.eup %3037  ;;  %v1464_v53 = vadd.f32 1.0, %v3036_v50 }
0x1128   :  { %v1399_v19 = vsub.f32 1.0, %v1398_v13  ;;  %v1328_v2 = vadd.f32 1.0, %v3038_v51 }
0x1129   :  { %3039 = vrcp.f32 %v1464_v53  ;;  %v1476_v38 = vand.u32 2147483648, %v1464_v53  ;;  %vm1470_vm3 = vweird.f32 %v1464_v53  ;;  %v1474_v39 = vand.u32 2147483647, %v1464_v53 }
0x112a   :  { %v1400_v22 = vmul.f32 %v3034_v28, %v1399_v19  ;;  %3041 = vrcp.f32 %v1328_v2  ;;  %v1340_v57 = vand.u32 2147483648, %v1328_v2  ;;  %vm1334_vm6 = vweird.f32 %v1328_v2 }
0x112b   :  { %v1477_v58 = vor.u32 1.1754944e-38, %v1476_v38  ;;  %v1338_v59 = vand.u32 2147483647, %v1328_v2  ;;  %vm1475_vm9 = vcmp.eq.f32.partialorder %v1474_v39, 8.507059e+37 }
0x112c   :  { %v1401_v21 = vadd.f32 %v3034_v28, %v1400_v22  ;;  %v1341_v42 = vor.u32 1.1754944e-38, %v1340_v57 }
0x112d   :  { %vm1339_vm11 = vcmp.eq.f32.partialorder %v1338_v59, 8.507059e+37 }
0x112e   :  { %v1405_v18 = vsel %vm1404_vm13, %v3034_v28, %v1401_v21 }
0x112f   :  { %v3954_v43 = vsel %vm1407_vm14, %v1409_v25, %v1405_v18  ;;  %v3040_v54 = vpop.eup %3039 }
0x1130   :  { %v3042_v45 = vpop.eup %3041  ;;  %v1466_v55 = vmul.f32 %v3040_v54, %v1464_v53  ;;  %vm1471_vm15 = vweird.f32 %v3040_v54  ;;  %v1413_v49 = vmul.f32 %v3954_v43, %v3913_v46 }
0x1131   :  { %v1330_v17 = vmul.f32 %v3042_v45, %v1328_v2  ;;  %vm1472_vm4 = vmor %vm1470_vm3, %vm1471_vm15  ;;  %vm1335_vm5 = vweird.f32 %v3042_v45 }
0x1132   :  { %v1467_v32 = vsub.f32 1.0, %v1466_v55  ;;  %vm1336_vm10 = vmor %vm1334_vm6, %vm1335_vm5 }
0x1133   :  { %v1331_v36 = vsub.f32 1.0, %v1330_v17 }
0x1134   :  { %v1468_v31 = vmul.f32 %v3040_v54, %v1467_v32 }
0x1135   :  { %v1332_v29 = vmul.f32 %v3042_v45, %v1331_v36 }
0x1136   :  { %v1469_v16 = vadd.f32 %v3040_v54, %v1468_v31 }
0x1137   :  { %v1333_v40 = vadd.f32 %v3042_v45, %v1332_v29 }
0x1138   :  { %v1473_v14 = vsel %vm1472_vm4, %v3040_v54, %v1469_v16 }
0x1139   :  { %v1478_v26 = vsel %vm1475_vm9, %v1477_v58, %v1473_v14  ;;  %v1337_v27 = vsel %vm1336_vm10, %v3042_v45, %v1333_v40 }
0x113a   :  { %v1342_v8 = vsel %vm1339_vm11, %v1341_v42, %v1337_v27  ;;  %v1481_v28 = vmul.f32 %v1478_v26, %v3923_v44 }
0x113b   :  { %v1345_v22 = vmul.f32 %v1342_v8, %v3918_v52 }
0x1157   :  { %v1416_v23 = vpop.permute.xlu2 %1415 }
0x1158   :  { %v1418_v5 = vmul.f32 %v1416_v23, %v3954_v43 }
0x115a   :  { %1420 = vrot.lane.b32.xlu2 %v1418_v5, %s3240_s29 }
0x118c   :  { %v1484_v41 = vpop.permute.xlu0 %1483 }
0x118d   :  { %v1486_v30 = vmul.f32 %v1484_v41, %v1478_v26 }
0x118e   :  { %v1348_v60 = vpop.permute.xlu1 %1347 }
0x118f   :  { %1488 = vrot.lane.b32.xlu0 %v1486_v30, %s3240_s29  ;;  %v1350_v10 = vmul.f32 %v1348_v60, %v1342_v8 }
0x1191   :  { %1352 = vrot.lane.b32.xlu1 %v1350_v10, %s3240_s29 }
0x11b4   :  { %v1421_v9 = vpop.permute.xlu2 %1420 }
0x11b5   :  { %v3962_v11 = vadd.f32 %v1421_v9, %v1413_v49 }
0x11b7   :  { %3043 = vtanh.f32 %v3962_v11 }
0x11bd   :  { %v3044_v12 = vpop.eup %3043 }
0x11be   :  { %1426 = vrot.lane.b32.xlu2 %v3044_v12, %s3239_s28 }
0x1201   :  { %v1489_v13 = vpop.permute.xlu0 %1488 }
0x1202   :  { %v3967_v19 = vadd.f32 %v1489_v13, %v1481_v28 }
0x1203   :  { %v1353_v21 = vpop.permute.xlu1 %1352 }
0x1204   :  { %3045 = vtanh.f32 %v3967_v19  ;;  %v3971_v24 = vadd.f32 %v1353_v21, %v1345_v22 }
0x1206   :  { %3047 = vtanh.f32 %v3971_v24 }
0x120a   :  { %v3046_v46 = vpop.eup %3045 }
0x120b   :  { %1494 = vrot.lane.b32.xlu0 %v3046_v46, %s3239_s28 }
0x120c   :  { %v3048_v56 = vpop.eup %3047 }
0x120d   :  { %1358 = vrot.lane.b32.xlu1 %v3048_v56, %s3239_s28 }
0x1218   :  { %v1427_v18 = vpop.permute.xlu2 %1426 }
0x1219   :  { %v1429_v44 = vmul.f32 %v1427_v18, %v3954_v43 }
0x121b   :  { %1567 = vrot.lane.b32.xlu2 %v1429_v44, %s3240_s29 }
0x1223   :  { %1503 = vrot.lane.b32.xlu2 %v1429_v44, %s3239_s28 }
0x1275   :  { %v1568_v34 = vpop.permute.xlu2 %1567 }
0x127d   :  { %v1495_v52 = vpop.permute.xlu0 %1494  ;;  %v1504_v50 = vpop.permute.xlu2 %1503 }
0x127e   :  { %v1497_v25 = vmul.f32 %v1495_v52, %v1478_v26 }
0x127f   :  { %v1359_v23 = vpop.permute.xlu1 %1358 }
0x1280   :  { %1571 = vrot.lane.b32.xlu0 %v1497_v25, %s3239_s28  ;;  %v3980_v5 = vmul.f32 %v1359_v23, %v1342_v8 }
0x1282   :  { %1499 = vrot.lane.b32.xlu1 %v3980_v5, %s3240_s29 }
0x12f2   :  { %v3984_v47 = vpop.permute.xlu0 %1571 }
0x12f3   :  { %v1574_v43 = vsel %vm199_vm7, %v1568_v34, %v3984_v47 }
0x12f4   :  { %2821 = vmatmul.msk.f32.vlgmr.msrb.gmra.mxu3 %vm209_vm8, %v1574_v43  ;;  %v1500_v51 = vpop.permute.xlu1 %1499 }
0x12f5   :  { %v1506_v53 = vsel %vm199_vm7, %v1500_v51, %v1504_v50 }
0x12f6   :  { %2819 = vmatmul.msk.f32.vlgmr.msra.gmra.mxu0 %vm209_vm8, %v1506_v53 }
0x1373   :  { %v1527_v2 = vpop.f32.mrf.mxu0 }
0x1374   :  { %v1528_v54 = vadd.f32 %v3811_v48, %v1527_v2 }
0x1376   :  { %3049 = vtanh.f32 %v1528_v54  ;;  %v2820_v36 = vmul.f32 -1.442695, %v1528_v54 }
0x1377   :  { %v1595_v45 = vpop.f32.mrf.mxu3 }
0x1378   :  { %v1596_v55 = vadd.f32 %v3905_v20, %v1595_v45 }
0x137a   :  { %3051 = vtanh.f32 %v1596_v55  ;;  %v2822_v31 = vmul.f32 -1.442695, %v1596_v55 }
0x137b   :  { %3053 = vpow2.f32 %v2820_v36  ;;  %v4029_v36 = vld [vmem:[%s4576_s5 + $0x28] sm:$0xff] }
0x137c   :  { %v3050_v17 = vpop.eup %3049  ;;  %3055 = vpow2.f32 %v2822_v31  ;;  %v4035_v31 = vld [vmem:[%s4576_s5 + $0x20] sm:$0xff] }
0x137d   :  { %1552 = vrot.lane.b32.xlu0 %v3050_v17, %s3239_s28  ;;  %v4017_v17 = vld [vmem:[%s4576_s5 + $0x38] sm:$0xff] }
0x1380   :  { %v3052_v32 = vpop.eup %3051 }
0x1381   :  { %1620 = vrot.lane.b32.xlu1 %v3052_v32, %s3239_s28  ;;  %v3054_v29 = vpop.eup %3053  ;;  %v4023_v32 = vld [vmem:[%s4576_s5 + $0x30] sm:$0xff] }
0x1382   :  { %v3056_v16 = vpop.eup %3055  ;;  %v1533_v38 = vadd.f32 1.0, %v3054_v29  ;;  %v4041_v29 = vld [vmem:[%s4576_s5 + $0x18] sm:$0xff] }
0x1383   :  { %v1601_v39 = vadd.f32 1.0, %v3056_v16  ;;  %v4047_v16 = vld [vmem:[%s4576_s5 + $0x10] sm:$0xff] }
0x1384   :  { %3057 = vrcp.f32 %v1533_v38  ;;  %v1545_v30 = vand.u32 2147483648, %v1533_v38  ;;  %vm1539_vm13 = vweird.f32 %v1533_v38  ;;  %v1543_v42 = vand.u32 2147483647, %v1533_v38 }
0x1385   :  { %3059 = vrcp.f32 %v1601_v39  ;;  %v1613_v10 = vand.u32 2147483648, %v1601_v39  ;;  %vm1607_vm3 = vweird.f32 %v1601_v39  ;;  %v1611_v9 = vand.u32 2147483647, %v1601_v39 }
0x1386   :  { %v1546_v49 = vor.u32 1.1754944e-38, %v1545_v30  ;;  %vm1544_vm4 = vcmp.eq.f32.partialorder %v1543_v42, 8.507059e+37 }
0x1387   :  { %v1614_v21 = vor.u32 1.1754944e-38, %v1613_v10  ;;  %vm1612_vm6 = vcmp.eq.f32.partialorder %v1611_v9, 8.507059e+37 }
0x138a   :  { %v3058_v48 = vpop.eup %3057 }
0x138b   :  { %v3060_v40 = vpop.eup %3059  ;;  %v1535_v14 = vmul.f32 %v3058_v48, %v1533_v38  ;;  %vm1540_vm12 = vweird.f32 %v3058_v48  ;;  %v4053_v38 = vld [vmem:[%s4576_s5 + $0x8] sm:$0xff] }
0x138c   :  { %v1603_v57 = vmul.f32 %v3060_v40, %v1601_v39  ;;  %vm1541_vm14 = vmor %vm1539_vm13, %vm1540_vm12  ;;  %vm1608_vm15 = vweird.f32 %v3060_v40  ;;  %v4059_v39 = vld [vmem:[%s4576_s5] sm:$0xff] }
0x138d   :  { %v1536_v58 = vsub.f32 1.0, %v1535_v14  ;;  %vm1609_vm5 = vmor %vm1607_vm3, %vm1608_vm15 }
0x138e   :  { %v1604_v59 = vsub.f32 1.0, %v1603_v57 }
0x138f   :  { %v1537_v26 = vmul.f32 %v3058_v48, %v1536_v58 }
0x1390   :  { %v1605_v41 = vmul.f32 %v3060_v40, %v1604_v59 }
0x1391   :  { %v1538_v27 = vadd.f32 %v3058_v48, %v1537_v26 }
0x1392   :  { %v1606_v60 = vadd.f32 %v3060_v40, %v1605_v41 }
0x1393   :  { %v1542_v8 = vsel %vm1541_vm14, %v3058_v48, %v1538_v27 }
0x1394   :  { %v1547_v28 = vsel %vm1544_vm4, %v1546_v49, %v1542_v8  ;;  %v1610_v13 = vsel %vm1609_vm5, %v3060_v40, %v1606_v60 }
0x1395   :  { %v1615_v46 = vsel %vm1612_vm6, %v1614_v21, %v1610_v13  ;;  %v1550_v44 = vmul.f32 %v1547_v28, %v3962_v11 }
0x1396   :  { %v1618_v34 = vmul.f32 %v1615_v46, %v3967_v19 }
0x13ef   :  { %v1553_v12 = vpop.permute.xlu0 %1552 }
0x13f0   :  { %v1555_v22 = vmul.f32 %v1553_v12, %v1547_v28 }
0x13f2   :  { %1557 = vrot.lane.b32.xlu2 %v1555_v22, %s3240_s29 }
0x13f3   :  { %v1621_v56 = vpop.permute.xlu1 %1620 }
0x13f4   :  { %v1623_v18 = vmul.f32 %v1621_v56, %v1615_v46  ;;  %v4074_v56 = vld [vmem:[%s4578_s7 + $0x18] sm:$0xff] }
0x13f5   :  { %1820 = vmatpush.msra.mxu3 %v4074_v56 }
0x13f6   :  { %1625 = vrot.lane.b32.xlu0 %v1623_v18, %s3240_s29  ;;  %v4079_v18 = vld [vmem:[%s4578_s7 + $0x10] sm:$0xff] }
0x13f7   :  { %1821 = vmatpush.msra.mxu3 %v4079_v18 }
0x144c   :  { %v1558_v52 = vpop.permute.xlu2 %1557 }
0x144d   :  { %v3998_v25 = vadd.f32 %v1558_v52, %v1550_v44  ;;  %v4091_v44 = vld [vmem:[%s4578_s7] sm:$0xff] }
0x144f   :  { %3061 = vtanh.f32 %v3998_v25 }
0x1455   :  { %v3062_v23 = vpop.eup %3061 }
0x1456   :  { %1563 = vrot.lane.b32.xlu1 %v3062_v23, %s3239_s28 }
0x1468   :  { %v1626_v43 = vpop.permute.xlu0 %1625 }
0x1469   :  { %v1628_v50 = vadd.f32 %v1626_v43, %v1618_v34  ;;  %v4112_v43 = vld [vmem:[#allocation2] ss:$0 sm:$0xff] }
0x146b   :  { %3063 = vtanh.f32 %v1628_v50 }
0x1471   :  { %v3064_v51 = vpop.eup %3063 }
0x1472   :  { %1631 = vrot.lane.b32.xlu2 %v3064_v51, %s3239_s28 }
0x14c8   :  { %v1564_v53 = vpop.permute.xlu1 %1563 }
0x14c9   :  { %v4004_v2 = vmul.f32 %v1564_v53, %v1547_v28 }
0x14cb   :  { %1636 = vrot.lane.b32.xlu0 %v4004_v2, %s3240_s29 }
0x14cc   :  { %v1632_v11 = vpop.permute.xlu2 %1631 }
0x14cd   :  { %v4008_v54 = vmul.f32 %v1632_v11, %v1615_v46 }
0x14cf   :  { %1640 = vrot.lane.b32.xlu1 %v4008_v54, %s3239_s28 }
0x153d   :  { %v1637_v45 = vpop.permute.xlu0 %1636 }
0x1541   :  { %v1641_v19 = vpop.permute.xlu1 %1640 }
0x1542   :  { %v1643_v55 = vsel %vm199_vm7, %v1637_v45, %v1641_v19  ;;  %v4128_v19 = vld [vmem:[%s4573_s2] ss:$0 sm:$0xff] }
0x1543   :  { %2823 = vmatmul.msk.f32.vlgmr.msrb.gmra.mxu1 %vm209_vm8, %v1643_v55 }
0x1544   :  { %1979 = vmatpush.msrb.mxu1 %v4017_v17 }
0x1546   :  { %1980 = vmatpush.msrb.mxu1 %v4023_v32 }
0x1548   :  { %1981 = vmatpush.msrb.mxu1 %v4029_v36 }
0x154a   :  { %1982 = vmatpush.msrb.mxu1 %v4035_v31 }
0x154c   :  { %1983 = vmatpush.msrb.mxu1 %v4041_v29 }
0x154e   :  { %1984 = vmatpush.msrb.mxu1 %v4047_v16 }
0x1550   :  { %1985 = vmatpush.msrb.mxu1 %v4053_v38 }
0x1552   :  { %1986 = vmatpush.msrb.mxu1 %v4059_v39 }
0x15c0   :  { %v1664_v48 = vpop.f32.mrf.mxu1 }
0x15c1   :  { %v1665_v40 = vadd.f32 %v3905_v20, %v1664_v48 }
0x15c3   :  { %3065 = vtanh.f32 %v1665_v40  ;;  %v2824_v57 = vmul.f32 -1.442695, %v1665_v40 }
0x15c5   :  { %3067 = vpow2.f32 %v2824_v57 }
0x15c9   :  { %v3066_v14 = vpop.eup %3065 }
0x15ca   :  { %1689 = vrot.lane.b32.xlu2 %v3066_v14, %s3239_s28 }
0x15cb   :  { %v3068_v58 = vpop.eup %3067 }
0x15cc   :  { %v1670_v59 = vadd.f32 1.0, %v3068_v58 }
0x15ce   :  { %3069 = vrcp.f32 %v1670_v59  ;;  %v1682_v60 = vand.u32 2147483648, %v1670_v59  ;;  %vm1676_vm10 = vweird.f32 %v1670_v59  ;;  %v1680_v8 = vand.u32 2147483647, %v1670_v59 }
0x15d0   :  { %v1683_v49 = vor.u32 1.1754944e-38, %v1682_v60  ;;  %vm1681_vm12 = vcmp.eq.f32.partialorder %v1680_v8, 8.507059e+37 }
0x15d4   :  { %v3070_v26 = vpop.eup %3069 }
0x15d5   :  { %v1672_v41 = vmul.f32 %v3070_v26, %v1670_v59  ;;  %vm1677_vm9 = vweird.f32 %v3070_v26 }
0x15d6   :  { %vm1678_vm11 = vmor %vm1676_vm10, %vm1677_vm9 }
0x15d7   :  { %v1673_v27 = vsub.f32 1.0, %v1672_v41 }
0x15d9   :  { %v1674_v30 = vmul.f32 %v3070_v26, %v1673_v27 }
0x15db   :  { %v1675_v42 = vadd.f32 %v3070_v26, %v1674_v30 }
0x15dd   :  { %v1679_v10 = vsel %vm1678_vm11, %v3070_v26, %v1675_v42 }
0x15de   :  { %v1684_v12 = vsel %vm1681_vm12, %v1683_v49, %v1679_v10 }
0x15df   :  { %v1687_v13 = vmul.f32 %v1684_v12, %v1628_v50 }
0x1624   :  { %v1690_v9 = vpop.permute.xlu2 %1689 }
0x1625   :  { %v1692_v28 = vmul.f32 %v1690_v9, %v1684_v12 }
0x1627   :  { %1694 = vrot.lane.b32.xlu0 %v1692_v28, %s3240_s29 }
0x162f   :  { %1828 = vrot.lane.b32.xlu0 %v3980_v5, %s3242_s17  ;;  %v4085_v5 = vld [vmem:[%s4578_s7 + $0x8] sm:$0xff] }
0x1630   :  { %1822 = vmatpush.msra.mxu3 %v4085_v5 }
0x1632   :  { %1823 = vmatpush.msra.mxu3 %v4091_v44 }
0x1634   :  { %1911 = vmatpush.msrb.mxu3 %v3851_v61 }
0x1636   :  { %1912 = vmatpush.msrb.mxu3 %v3857_v62 }
0x1638   :  { %1913 = vmatpush.msrb.mxu3 %v3863_v1 }
0x163a   :  { %1914 = vmatpush.msrb.mxu3 %v3869_v4 }
0x163c   :  { %1915 = vmatpush.msrb.mxu3 %v3875_v63 }
0x163e   :  { %1916 = vmatpush.msrb.mxu3 %v3881_v6 }
0x1640   :  { %1917 = vmatpush.msrb.mxu3 %v3887_v0 }
0x1642   :  { %1918 = vmatpush.msrb.mxu3 %v3893_v3 }
0x1699   :  { %v1695_v22 = vpop.permute.xlu0 %1694 }
0x169a   :  { %v4067_v21 = vadd.f32 %v1695_v22, %v1687_v13 }
0x169c   :  { %3071 = vtanh.f32 %v4067_v21 }
0x16a1   :  { %v1829_v53 = vpop.permute.xlu0 %1828 }
0x16a2   :  { %v3072_v46 = vpop.eup %3071 }
0x16a3   :  { %1700 = vrot.lane.b32.xlu1 %v3072_v46, %s3239_s28 }
0x1715   :  { %v1701_v52 = vpop.permute.xlu1 %1700 }
0x1716   :  { %v4103_v23 = vmul.f32 %v1701_v52, %v1684_v12 }
0x1718   :  { %1804 = vrot.lane.b32.xlu2 %v4103_v23, %s3240_s29 }
0x1772   :  { %v1805_v34 = vpop.permute.xlu2 %1804 }
0x1773   :  { %2825 = vmatmul.msk.f32.vlgmr.msra.gmra.mxu3 %vm199_vm7, %v1805_v34 }
0x1774   :  { %2045 = vmatpush.msra.mxu3 %v4074_v56 }
0x1776   :  { %2046 = vmatpush.msra.mxu3 %v4079_v18 }
0x1778   :  { %2047 = vmatpush.msra.mxu3 %v4085_v5 }
0x177a   :  { %2048 = vmatpush.msra.mxu3 %v4091_v44 }
0x17f6   :  { %v1825_v50 = vpop.f32.mrf.mxu3 }
0x17f7   :  { %v1826_v51 = vadd.f32 %v4112_v43, %v1825_v50 }
0x17f9   :  { %v1831_v11 = vsel %vm55_vm1, %v1826_v51, %v1829_v53  ;;  %v4153_v51 = vld [vmem:[%s4575_s4] ss:$0 sm:$0xff] }
0x17fa   :  { %2827 = vmatmul.msk.f32.vlgmr.msra.gmra.mxu1 %vm62_vm2, %v1831_v11 }
0x17fb   :  { %2204 = vmatpush.msra.mxu1 %v4017_v17 }
0x17fd   :  { %2205 = vmatpush.msra.mxu1 %v4023_v32 }
0x17ff   :  { %2206 = vmatpush.msra.mxu1 %v4029_v36 }
0x1801   :  { %2207 = vmatpush.msra.mxu1 %v4035_v31 }
0x1803   :  { %2208 = vmatpush.msra.mxu1 %v4041_v29 }
0x1805   :  { %2209 = vmatpush.msra.mxu1 %v4047_v16 }
0x1807   :  { %2210 = vmatpush.msra.mxu1 %v4053_v38 }
0x1809   :  { %2211 = vmatpush.msra.mxu1 %v4059_v39 }
0x1877   :  { %v1852_v45 = vpop.f32.mrf.mxu1 }
0x1878   :  { %v1853_v55 = vadd.f32 %v4128_v19, %v1852_v45 }
0x187a   :  { %3073 = vtanh.f32 %v1853_v55  ;;  %v2828_v40 = vmul.f32 -1.442695, %v1853_v55 }
0x187c   :  { %3075 = vpow2.f32 %v2828_v40 }
0x1880   :  { %v3074_v48 = vpop.eup %3073 }
0x1881   :  { %1877 = vrot.lane.b32.xlu1 %v3074_v48, %s3239_s28 }
0x1882   :  { %v3076_v14 = vpop.eup %3075 }
0x1883   :  { %v1858_v57 = vadd.f32 1.0, %v3076_v14 }
0x1885   :  { %3077 = vrcp.f32 %v1858_v57  ;;  %v1870_v30 = vand.u32 2147483648, %v1858_v57  ;;  %vm1864_vm14 = vweird.f32 %v1858_v57  ;;  %v1868_v42 = vand.u32 2147483647, %v1858_v57 }
0x1887   :  { %v1871_v8 = vor.u32 1.1754944e-38, %v1870_v30  ;;  %vm1869_vm3 = vcmp.eq.f32.partialorder %v1868_v42, 8.507059e+37 }
0x188b   :  { %v3078_v58 = vpop.eup %3077 }
0x188c   :  { %v1860_v59 = vmul.f32 %v3078_v58, %v1858_v57  ;;  %vm1865_vm13 = vweird.f32 %v3078_v58 }
0x188d   :  { %vm1866_vm15 = vmor %vm1864_vm14, %vm1865_vm13  ;;  %vm1718_vm14 = vcmask 785408  }
0x188e   :  { %v1861_v26 = vsub.f32 1.0, %v1860_v59 }
0x1890   :  { %v1862_v41 = vmul.f32 %v3078_v58, %v1861_v26 }
0x1892   :  { %v1863_v27 = vadd.f32 %v3078_v58, %v1862_v41 }
0x1894   :  { %v1867_v60 = vsel %vm1866_vm15, %v3078_v58, %v1863_v27 }
0x1895   :  { %v1872_v49 = vsel %vm1869_vm3, %v1871_v8, %v1867_v60 }
0x1896   :  { %v1875_v12 = vmul.f32 %v1872_v49, %v3971_v24 }
0x18f3   :  { %v1878_v10 = vpop.permute.xlu1 %1877 }
0x18f4   :  { %v1880_v9 = vmul.f32 %v1878_v10, %v1872_v49 }
0x18f6   :  { %1882 = vrot.lane.b32.xlu2 %v1880_v9, %s3240_s29 }
0x18fe   :  { %1896 = vrot.lane.b32.xlu2 %v4004_v2, %s3239_s28 }
0x1950   :  { %v1883_v28 = vpop.permute.xlu2 %1882 }
0x1951   :  { %v4136_v13 = vadd.f32 %v1883_v28, %v1875_v12 }
0x1953   :  { %3079 = vtanh.f32 %v4136_v13 }
0x1958   :  { %v1897_v34 = vpop.permute.xlu2 %1896 }
0x1959   :  { %v3080_v22 = vpop.eup %3079 }
0x195a   :  { %1888 = vrot.lane.b32.xlu0 %v3080_v22, %s3239_s28 }
0x19cc   :  { %v1889_v46 = vpop.permute.xlu0 %1888 }
0x19cd   :  { %v4140_v52 = vmul.f32 %v1889_v46, %v1872_v49 }
0x19cf   :  { %1893 = vrot.lane.b32.xlu1 %v4140_v52, %s3240_s29 }
0x1a41   :  { %v1894_v50 = vpop.permute.xlu1 %1893 }
0x1a42   :  { %v1899_v2 = vsel %vm199_vm7, %v1894_v50, %v1897_v34 }
0x1a43   :  { %2829 = vmatmul.msk.f32.vlgmr.msrb.gmra.mxu3 %vm209_vm8, %v1899_v2 }
0x1a44   :  { %2270 = vmatpush.msrb.mxu3 %v4074_v56 }
0x1a46   :  { %2271 = vmatpush.msrb.mxu3 %v4079_v18 }
0x1a48   :  { %2272 = vmatpush.msrb.mxu3 %v4085_v5 }
0x1a4a   :  { %2273 = vmatpush.msrb.mxu3 %v4091_v44 }
0x1ac6   :  { %v1920_v24 = vpop.f32.mrf.mxu3 }
0x1ac7   :  { %v1921_v53 = vadd.f32 %v4153_v51, %v1920_v24 }
0x1ac9   :  { %3081 = vtanh.f32 %v1921_v53  ;;  %v2830_v45 = vmul.f32 -1.442695, %v1921_v53 }
0x1acb   :  { %3083 = vpow2.f32 %v2830_v45 }
0x1acf   :  { %v3082_v11 = vpop.eup %3081 }
0x1ad0   :  { %1945 = vrot.lane.b32.xlu0 %v3082_v11, %s3239_s28 }
0x1ad1   :  { %v3084_v55 = vpop.eup %3083 }
0x1ad2   :  { %v1926_v48 = vadd.f32 1.0, %v3084_v55 }
0x1ad4   :  { %3085 = vrcp.f32 %v1926_v48  ;;  %v1938_v26 = vand.u32 2147483648, %v1926_v48  ;;  %vm1932_vm5 = vweird.f32 %v1926_v48  ;;  %v1936_v41 = vand.u32 2147483647, %v1926_v48 }
0x1ad6   :  { %v1939_v30 = vor.u32 1.1754944e-38, %v1938_v26  ;;  %vm1937_vm9 = vcmp.eq.f32.partialorder %v1936_v41, 8.507059e+37  ;;  %v1733_v26 = vld [vmem:[%s4580_s9 + $0x50] sm:$0xff]  ;;  %v1732_v41 = vld [vmem:[%s4580_s9 + $0x48] sm:$0xff] }
0x1ada   :  { %v3086_v40 = vpop.eup %3085 }
0x1adb   :  { %v1928_v14 = vmul.f32 %v3086_v40, %v1926_v48  ;;  %vm1933_vm4 = vweird.f32 %v3086_v40 }
0x1adc   :  { %vm1934_vm6 = vmor %vm1932_vm5, %vm1933_vm4 }
0x1add   :  { %v1929_v57 = vsub.f32 1.0, %v1928_v14  ;;  %v1738_v14 = vld [vmem:[%s4580_s9 + $0x78] sm:$0xff] }
0x1ade   :  { %1759 = vmatpush.msrb.mxu2 %v1738_v14 }
0x1adf   :  { %v1930_v58 = vmul.f32 %v3086_v40, %v1929_v57  ;;  %v1737_v57 = vld [vmem:[%s4580_s9 + $0x70] sm:$0xff] }
0x1ae0   :  { %1760 = vmatpush.msrb.mxu2 %v1737_v57 }
0x1ae1   :  { %v1931_v59 = vadd.f32 %v3086_v40, %v1930_v58  ;;  %v1736_v58 = vld [vmem:[%s4580_s9 + $0x68] sm:$0xff] }
0x1ae2   :  { %1761 = vmatpush.msrb.mxu2 %v1736_v58 }
0x1ae3   :  { %v1935_v27 = vsel %vm1934_vm6, %v3086_v40, %v1931_v59  ;;  %v1735_v59 = vld [vmem:[%s4580_s9 + $0x60] sm:$0xff] }
0x1ae4   :  { %v1940_v60 = vsel %vm1937_vm9, %v1939_v30, %v1935_v27  ;;  %1762 = vmatpush.msrb.mxu2 %v1735_v59  ;;  %v1731_v27 = vld [vmem:[%s4580_s9 + $0x40] sm:$0xff] }
0x1ae5   :  { %v1943_v10 = vmul.f32 %v1940_v60, %v3998_v25 }
0x1b42   :  { %v1946_v42 = vpop.permute.xlu0 %1945 }
0x1b43   :  { %v1948_v8 = vmul.f32 %v1946_v42, %v1940_v60 }
0x1b45   :  { %1950 = vrot.lane.b32.xlu1 %v1948_v8, %s3240_s29 }
0x1b4d   :  { %1964 = vrot.lane.b32.xlu1 %v4103_v23, %s3239_s28 }
0x1bb7   :  { %v1951_v49 = vpop.permute.xlu1 %1950 }
0x1bb8   :  { %v4161_v9 = vadd.f32 %v1951_v49, %v1943_v10  ;;  %v1729_v10 = vld [vmem:[%s4580_s9 + $0x30] sm:$0xff] }
0x1bba   :  { %3087 = vtanh.f32 %v4161_v9 }
0x1bbf   :  { %v1965_v46 = vpop.permute.xlu1 %1964 }
0x1bc0   :  { %v3088_v12 = vpop.eup %3087 }
0x1bc1   :  { %1956 = vrot.lane.b32.xlu2 %v3088_v12, %s3239_s28  ;;  %v1727_v12 = vld [vmem:[%s4580_s9 + $0x20] sm:$0xff] }
0x1c1b   :  { %v1957_v28 = vpop.permute.xlu2 %1956 }
0x1c1c   :  { %v4165_v22 = vmul.f32 %v1957_v28, %v1940_v60  ;;  %v1730_v60 = vld [vmem:[%s4580_s9 + $0x38] sm:$0xff] }
0x1c1d   :  { %v1726_v28 = vld [vmem:[%s4580_s9 + $0x18] sm:$0xff] }
0x1c1e   :  { %1961 = vrot.lane.b32.xlu0 %v4165_v22, %s3240_s29 }
0x1c90   :  { %v1962_v34 = vpop.permute.xlu0 %1961 }
0x1c91   :  { %v1967_v50 = vsel %vm199_vm7, %v1962_v34, %v1965_v46  ;;  %v1725_v46 = vld [vmem:[%s4580_s9 + $0x10] sm:$0xff]  ;;  %v1724_v34 = vld [vmem:[%s4580_s9 + $0x8] sm:$0xff] }
0x1c92   :  { %2831 = vmatmul.msk.f32.vlgmr.msrb.gmra.mxu1 %vm209_vm8, %v1967_v50  ;;  %v3196_v50 = vld [vmem:[%s4572_s1 + $0x20] sm:$0x1] }
0x1c93   :  { %2586 = vmatpush.msrb.mxu1 %v3851_v61 }
0x1c95   :  { %2587 = vmatpush.msrb.mxu1 %v3857_v62 }
0x1c97   :  { %2588 = vmatpush.msrb.mxu1 %v3863_v1 }
0x1c99   :  { %2589 = vmatpush.msrb.mxu1 %v3869_v4 }
0x1c9b   :  { %2590 = vmatpush.msrb.mxu1 %v3875_v63 }
0x1c9d   :  { %2591 = vmatpush.msrb.mxu1 %v3881_v6 }
0x1c9f   :  { %2592 = vmatpush.msrb.mxu1 %v3887_v0 }
0x1ca1   :  { %2593 = vmatpush.msrb.mxu1 %v3893_v3 }
0x1d0f   :  { %v1988_v25 = vpop.f32.mrf.mxu1 }
0x1d10   :  { %v1989_v2 = vadd.f32 %v3905_v20, %v1988_v25  ;;  %v3197_v25 = vld [vmem:[%s4572_s1 + $0x18] sm:$0xff] }
0x1d12   :  { %3089 = vtanh.f32 %v1989_v2  ;;  %v2832_v61 = vmul.f32 -1.442695, %v1989_v2  ;;  %v3198_v2 = vld [vmem:[%s4572_s1 + $0x10] sm:$0xff] }
0x1d14   :  { %3091 = vpow2.f32 %v2832_v61  ;;  %v3200_v61 = vld [vmem:[%s4572_s1] sm:$0xff] }
0x1d18   :  { %v3090_v24 = vpop.eup %3089 }
0x1d19   :  { %2013 = vrot.lane.b32.xlu2 %v3090_v24, %s3239_s28  ;;  %v3199_v24 = vld [vmem:[%s4572_s1 + $0x8] sm:$0xff] }
0x1d1a   :  { %v3092_v62 = vpop.eup %3091 }
0x1d1b   :  { %v1994_v1 = vadd.f32 1.0, %v3092_v62 }
0x1d1d   :  { %3093 = vrcp.f32 %v1994_v1  ;;  %v2006_v0 = vand.u32 2147483648, %v1994_v1  ;;  %vm2000_vm11 = vweird.f32 %v1994_v1  ;;  %v2004_v3 = vand.u32 2147483647, %v1994_v1 }
0x1d1f   :  { %v2007_v45 = vor.u32 1.1754944e-38, %v2006_v0  ;;  %vm2005_vm13 = vcmp.eq.f32.partialorder %v2004_v3, 8.507059e+37  ;;  %v4289_v3 = vld [vmem:[%s4574_s3 + $0x20] sm:$0xff] }
0x1d23   :  { %v3094_v4 = vpop.eup %3093 }
0x1d24   :  { %v1996_v63 = vmul.f32 %v3094_v4, %v1994_v1  ;;  %vm2001_vm10 = vweird.f32 %v3094_v4 }
0x1d25   :  { %vm2002_vm12 = vmor %vm2000_vm11, %vm2001_vm10 }
0x1d26   :  { %v1997_v53 = vsub.f32 1.0, %v1996_v63 }
0x1d28   :  { %v1998_v6 = vmul.f32 %v3094_v4, %v1997_v53 }
0x1d2a   :  { %v1999_v11 = vadd.f32 %v3094_v4, %v1998_v6 }
0x1d2c   :  { %v2003_v20 = vsel %vm2002_vm12, %v3094_v4, %v1999_v11 }
0x1d2d   :  { %v2008_v48 = vsel %vm2005_vm13, %v2007_v45, %v2003_v20  ;;  %v4295_v20 = vld [vmem:[%s4574_s3 + $0x18] sm:$0xff]  ;;  %v4301_v45 = vld [vmem:[%s4574_s3 + $0x10] sm:$0xff] }
0x1d2e   :  { %v2011_v30 = vmul.f32 %v2008_v48, %v4067_v21  ;;  %v1728_v21 = vld [vmem:[%s4580_s9 + $0x28] sm:$0xff] }
0x1d73   :  { %v2014_v55 = vpop.permute.xlu2 %2013 }
0x1d74   :  { %v2016_v40 = vmul.f32 %v2014_v55, %v2008_v48  ;;  %v4307_v55 = vld [vmem:[%s4574_s3 + $0x8] sm:$0xff] }
0x1d76   :  { %2018 = vrot.lane.b32.xlu0 %v2016_v40, %s3240_s29 }
0x1d7e   :  { %1704 = vrot.lane.b32.xlu0 %v3608_v35, %s3240_s29  ;;  %v1734_v35 = vld [vmem:[%s4580_s9 + $0x58] sm:$0xff] }
0x1d7f   :  { %1763 = vmatpush.msrb.mxu2 %v1734_v35 }
0x1d81   :  { %1764 = vmatpush.msrb.mxu2 %v1733_v26 }
0x1d83   :  { %1765 = vmatpush.msrb.mxu2 %v1732_v41 }
0x1d85   :  { %1766 = vmatpush.msrb.mxu2 %v1731_v27 }
0x1d87   :  { %1767 = vmatpush.msrb.mxu2 %v1730_v60 }
0x1d89   :  { %1768 = vmatpush.msrb.mxu2 %v1729_v10 }
0x1d8b   :  { %1769 = vmatpush.msrb.mxu2 %v1728_v21  ;;  %v1754_v21 = vld [vmem:[%s4580_s9 + $0xf8] sm:$0xff] }
0x1d8c   :  { %1779 = vmatpush.msrb.mxu0 %v1754_v21 }
0x1d8d   :  { %1770 = vmatpush.msrb.mxu2 %v1727_v12 }
0x1d8f   :  { %1771 = vmatpush.msrb.mxu2 %v1726_v28 }
0x1d91   :  { %1772 = vmatpush.msrb.mxu2 %v1725_v46  ;;  %v1750_v46 = vld [vmem:[%s4580_s9 + $0xd8] sm:$0xff] }
0x1d93   :  { %1773 = vmatpush.msrb.mxu2 %v1724_v34  ;;  %v1749_v34 = vld [vmem:[%s4580_s9 + $0xd0] sm:$0xff] }
0x1de8   :  { %v2019_v42 = vpop.permute.xlu0 %2018 }
0x1de9   :  { %v4212_v8 = vadd.f32 %v2019_v42, %v2011_v30 }
0x1deb   :  { %3095 = vtanh.f32 %v4212_v8 }
0x1df0   :  { %v1705_v4 = vpop.permute.xlu0 %1704 }
0x1df1   :  { %v3096_v49 = vpop.eup %3095  ;;  %v1716_v63 = vsel %vm199_vm7, %v1705_v4, %v3728_v33  ;;  %v4271_v33 = vld [vmem:[%s4574_s3 + $0x38] sm:$0xff] }
0x1df2   :  { %2024 = vrot.lane.b32.xlu1 %v3096_v49, %s3239_s28  ;;  %v1753_v49 = vld [vmem:[%s4580_s9 + $0xf0] sm:$0xff]  ;;  %v1746_v4 = vld [vmem:[%s4580_s9 + $0xb8] sm:$0xff] }
0x1df3   :  { %1780 = vmatpush.msrb.mxu0 %v1753_v49 }
0x1dfa   :  { %1707 = vrot.lane.b32.xlu1 %v3774_v15, %s3249_s21  ;;  %v1723_v15 = vld [vmem:[%s4580_s9] sm:$0xff] }
0x1dfb   :  { %1774 = vmatpush.msrb.mxu2 %v1723_v15 }
0x1dfd   :  { %2834 = vmatpush.msk.msra.mxu2 %vm66_vm0, %v3196_v50 }
0x1dff   :  { %2072 = vmatpush.msra.mxu2 %v3197_v25 }
0x1e01   :  { %2073 = vmatpush.msra.mxu2 %v3198_v2 }
0x1e03   :  { %2074 = vmatpush.msra.mxu2 %v3199_v24 }
0x1e05   :  { %2075 = vmatpush.msra.mxu2 %v3200_v61 }
0x1e64   :  { %v2025_v62 = vpop.permute.xlu1 %2024 }
0x1e65   :  { %v4255_v1 = vmul.f32 %v2025_v62, %v2008_v48  ;;  %v4313_v48 = vld [vmem:[%s4574_s3] sm:$0xff] }
0x1e67   :  { %2029 = vrot.lane.b32.xlu2 %v4255_v1, %s3240_s29 }
0x1e6c   :  { %v1708_v53 = vpop.permute.xlu1 %1707 }
0x1e6d   :  { %v1717_v6 = vsel %vm209_vm8, %v1716_v63, %v1708_v53 }
0x1e6e   :  { %v1719_v11 = vsel %vm1718_vm14, %v1717_v6, %v3840_v37  ;;  %v4277_v37 = vld [vmem:[%s4574_s3 + $0x30] sm:$0xff] }
0x1e6f   :  { %2053 = vrot.lane.b32.xlu2 %v4140_v52, %s3242_s17  ;;  %1775 = vmatmul.f32.vlgmr.msrb.gmra.mxu2 %v1719_v11  ;;  %v4283_v52 = vld [vmem:[%s4574_s3 + $0x28] sm:$0xff]  ;;  %v1745_v6 = vld [vmem:[%s4580_s9 + $0xb0] sm:$0xff] }
0x1e70   :  { %2842 = vmatpush.msk.msrb.mxu2 %vm66_vm0, %v3196_v50 }
0x1e72   :  { %2297 = vmatpush.msrb.mxu2 %v3197_v25 }
0x1e74   :  { %2298 = vmatpush.msrb.mxu2 %v3198_v2 }
0x1e76   :  { %2299 = vmatpush.msrb.mxu2 %v3199_v24 }
0x1e78   :  { %2300 = vmatpush.msrb.mxu2 %v3200_v61 }
0x1ec1   :  { %v2030_v0 = vpop.permute.xlu2 %2029 }
0x1ec2   :  { %2833 = vmatmul.msk.f32.vlgmr.msra.gmra.mxu3 %vm199_vm7, %v2030_v0  ;;  %v1744_v0 = vld [vmem:[%s4580_s9 + $0xa8] sm:$0xff] }
0x1ec3   :  { %2361 = vmatpush.msra.mxu3 %v4271_v33 }
0x1ec5   :  { %2362 = vmatpush.msra.mxu3 %v4277_v37 }
0x1ec7   :  { %2363 = vmatpush.msra.mxu3 %v4283_v52 }
0x1ec9   :  { %2364 = vmatpush.msra.mxu3 %v4289_v3  ;;  %v2054_v57 = vpop.permute.xlu2 %2053 }
0x1ecb   :  { %2365 = vmatpush.msra.mxu3 %v4295_v20 }
0x1ecd   :  { %2366 = vmatpush.msra.mxu3 %v4301_v45 }
0x1ecf   :  { %2367 = vmatpush.msra.mxu3 %v4307_v55 }
0x1ed1   :  { %2368 = vmatpush.msra.mxu3 %v4313_v48 }
0x1ef2   :  { %v4323_v59 = vpop.f32.mrf.mxu2 }
0x1f45   :  { %v2050_v40 = vpop.f32.mrf.mxu3 }
0x1f46   :  { %v4317_v14 = vadd.f32 %v4112_v43, %v2050_v40  ;;  %v1743_v40 = vld [vmem:[%s4580_s9 + $0xa0] sm:$0xff] }
0x1f48   :  { %v2056_v58 = vsel %vm55_vm1, %v4317_v14, %v2054_v57  ;;  %v1742_v57 = vld [vmem:[%s4580_s9 + $0x98] sm:$0xff] }
0x1f49   :  { %2835 = vmatmul.msk.f32.vlgmr.msra.gmra.mxu2 %vm62_vm2, %v2056_v58  ;;  %v1741_v58 = vld [vmem:[%s4580_s9 + $0x90] sm:$0xff] }
0x1f4a   :  { %2850 = vmatpush.msk.msra.mxu2 %vm66_vm0, %v3196_v50 }
0x1f4c   :  { %2522 = vmatpush.msra.mxu2 %v3197_v25  ;;  %v1748_v25 = vld [vmem:[%s4580_s9 + $0xc8] sm:$0xff] }
0x1f4e   :  { %2523 = vmatpush.msra.mxu2 %v3198_v2 }
0x1f50   :  { %2524 = vmatpush.msra.mxu2 %v3199_v24  ;;  %v1747_v24 = vld [vmem:[%s4580_s9 + $0xc0] sm:$0xff] }
0x1f52   :  { %2525 = vmatpush.msra.mxu2 %v3200_v61 }
0x1fcc   :  { %v2077_v35 = vpop.f32.mrf.mxu2 }
0x1fcd   :  { %v2078_v26 = vadd.f32 %v4128_v19, %v2077_v35  ;;  %v1740_v35 = vld [vmem:[%s4580_s9 + $0x88] sm:$0xff] }
0x1fcf   :  { %3097 = vtanh.f32 %v2078_v26  ;;  %v2836_v27 = vmul.f32 -1.442695, %v2078_v26 }
0x1fd1   :  { %3099 = vpow2.f32 %v2836_v27 }
0x1fd5   :  { %v3098_v41 = vpop.eup %3097 }
0x1fd6   :  { %2102 = vrot.lane.b32.xlu0 %v3098_v41, %s3239_s28 }
0x1fd7   :  { %v3100_v30 = vpop.eup %3099 }
0x1fd8   :  { %v2083_v42 = vadd.f32 1.0, %v3100_v30 }
0x1fda   :  { %3101 = vrcp.f32 %v2083_v42  ;;  %v2095_v50 = vand.u32 2147483648, %v2083_v42  ;;  %vm2089_vm15 = vweird.f32 %v2083_v42  ;;  %v2093_v2 = vand.u32 2147483647, %v2083_v42 }
0x1fdc   :  { %v2096_v62 = vor.u32 1.1754944e-38, %v2095_v50  ;;  %vm2094_vm4 = vcmp.eq.f32.partialorder %v2093_v2, 8.507059e+37 }
0x1fde   :  { %1710 = vrot.lane.b32.xlu0 %v3931_v7, %s3240_s29  ;;  %v1752_v7 = vld [vmem:[%s4580_s9 + $0xe8] sm:$0xff] }
0x1fdf   :  { %1781 = vmatpush.msrb.mxu0 %v1752_v7 }
0x1fe0   :  { %v3102_v60 = vpop.eup %3101 }
0x1fe1   :  { %v2085_v10 = vmul.f32 %v3102_v60, %v2083_v42  ;;  %vm2090_vm0 = vweird.f32 %v3102_v60 }
0x1fe2   :  { %vm2091_vm3 = vmor %vm2089_vm15, %vm2090_vm0 }
0x1fe3   :  { %v2086_v12 = vsub.f32 1.0, %v2085_v10 }
0x1fe5   :  { %v2087_v28 = vmul.f32 %v3102_v60, %v2086_v12 }
0x1fe6   :  { %2121 = vrot.lane.b32.xlu0 %v4165_v22, %s3239_s28  ;;  %v1751_v22 = vld [vmem:[%s4580_s9 + $0xe0] sm:$0xff] }
0x1fe7   :  { %1782 = vmatpush.msrb.mxu0 %v1751_v22  ;;  %v2088_v15 = vadd.f32 %v3102_v60, %v2087_v28 }
0x1fe9   :  { %1783 = vmatpush.msrb.mxu0 %v1750_v46  ;;  %v2092_v61 = vsel %vm2091_vm3, %v3102_v60, %v2088_v15 }
0x1fea   :  { %v2097_v53 = vsel %vm2094_vm4, %v2096_v62, %v2092_v61 }
0x1feb   :  { %1784 = vmatpush.msrb.mxu0 %v1749_v34  ;;  %v2100_v26 = vmul.f32 %v2097_v53, %v4136_v13 }
0x1fed   :  { %1785 = vmatpush.msrb.mxu0 %v1748_v25 }
0x1fef   :  { %1786 = vmatpush.msrb.mxu0 %v1747_v24 }
0x1ff1   :  { %1787 = vmatpush.msrb.mxu0 %v1746_v4 }
0x1ff3   :  { %1788 = vmatpush.msrb.mxu0 %v1745_v6 }
0x1ff5   :  { %1789 = vmatpush.msrb.mxu0 %v1744_v0 }
0x1ff7   :  { %1790 = vmatpush.msrb.mxu0 %v1743_v40 }
0x1ff9   :  { %1791 = vmatpush.msrb.mxu0 %v1742_v57 }
0x1ffb   :  { %1792 = vmatpush.msrb.mxu0 %v1741_v58  ;;  %v4439_v58 = vld [vmem:[%s4577_s6] ss:$0 sm:$0xff] }
0x1ffd   :  { %1793 = vmatpush.msrb.mxu0 %v1740_v35 }
0x2048   :  { %v2103_v63 = vpop.permute.xlu0 %2102 }
0x2049   :  { %v2105_v11 = vmul.f32 %v2103_v63, %v2097_v53 }
0x204b   :  { %2107 = vrot.lane.b32.xlu1 %v2105_v11, %s3240_s29 }
0x2053   :  { %1713 = vrot.lane.b32.xlu1 %v4008_v54, %s3249_s21  ;;  %v1739_v54 = vld [vmem:[%s4580_s9 + $0x80] sm:$0xff] }
0x2054   :  { %1794 = vmatpush.msrb.mxu0 %v1739_v54 }
0x2056   :  { %2136 = vmatpush.msra.mxu0 %v4271_v33  ;;  %v1711_v33 = vpop.permute.xlu0 %1710 }
0x2058   :  { %2137 = vmatpush.msra.mxu0 %v4277_v37  ;;  %v1720_v37 = vsel %vm199_vm7, %v1711_v33, %v3984_v47 }
0x205a   :  { %2138 = vmatpush.msra.mxu0 %v4283_v52 }
0x205c   :  { %2139 = vmatpush.msra.mxu0 %v4289_v3 }
0x205e   :  { %2140 = vmatpush.msra.mxu0 %v4295_v20 }
0x2060   :  { %2141 = vmatpush.msra.mxu0 %v4301_v45 }
0x2062   :  { %2142 = vmatpush.msra.mxu0 %v4307_v55 }
0x2064   :  { %2143 = vmatpush.msra.mxu0 %v4313_v48 }
0x20bd   :  { %v2108_v41 = vpop.permute.xlu1 %2107 }
0x20be   :  { %v4391_v27 = vadd.f32 %v2108_v41, %v2100_v26 }
0x20c0   :  { %3103 = vtanh.f32 %v4391_v27 }
0x20c5   :  { %v1714_v52 = vpop.permute.xlu1 %1713 }
0x20c6   :  { %v3104_v3 = vpop.eup %3103  ;;  %v1721_v20 = vsel %vm209_vm8, %v1720_v37, %v1714_v52 }
0x20c7   :  { %2113 = vrot.lane.b32.xlu2 %v3104_v3, %s3239_s28  ;;  %v1722_v45 = vsel %vm1718_vm14, %v1721_v20, %v4103_v23  ;;  %v2122_v23 = vpop.permute.xlu0 %2121 }
0x20c8   :  { %1795 = vmatmul.f32.vlgmr.msrb.gmra.mxu0 %v1722_v45 }
0x20c9   :  { %2429 = vmatpush.msrb.mxu0 %v4017_v17 }
0x20cb   :  { %2430 = vmatpush.msrb.mxu0 %v4023_v32 }
0x20cd   :  { %2431 = vmatpush.msrb.mxu0 %v4029_v36 }
0x20cf   :  { %2432 = vmatpush.msrb.mxu0 %v4035_v31 }
0x20d1   :  { %2433 = vmatpush.msrb.mxu0 %v4041_v29 }
0x20d3   :  { %2434 = vmatpush.msrb.mxu0 %v4047_v16 }
0x20d5   :  { %2435 = vmatpush.msrb.mxu0 %v4053_v38 }
0x20d7   :  { %2436 = vmatpush.msrb.mxu0 %v4059_v39 }
0x2121   :  { %v2114_v47 = vpop.permute.xlu2 %2113 }
0x2122   :  { %v4408_v13 = vmul.f32 %v2114_v47, %v2097_v53 }
0x2124   :  { %2118 = vrot.lane.b32.xlu2 %v4408_v13, %s3240_s29 }
0x2145   :  { %v4418_v30 = vpop.f32.mrf.mxu0 }
0x217e   :  { %v2119_v55 = vpop.permute.xlu2 %2118 }
0x217f   :  { %v2124_v48 = vsel %vm199_vm7, %v2119_v55, %v2122_v23 }
0x2180   :  { %2837 = vmatmul.msk.f32.vlgmr.msra.gmra.mxu0 %vm209_vm8, %v2124_v48 }
0x2181   :  { %2495 = vmatpush.msra.mxu0 %v4074_v56 }
0x2183   :  { %2496 = vmatpush.msra.mxu0 %v4079_v18 }
0x2185   :  { %2497 = vmatpush.msra.mxu0 %v4085_v5 }
0x2187   :  { %2498 = vmatpush.msra.mxu0 %v4091_v44 }
0x21fd   :  { %v2145_v42 = vpop.f32.mrf.mxu0 }
0x21fe   :  { %v2146_v60 = vadd.f32 %v4153_v51, %v2145_v42 }
0x2200   :  { %3105 = vtanh.f32 %v2146_v60  ;;  %v2838_v21 = vmul.f32 -1.442695, %v2146_v60 }
0x2202   :  { %3107 = vpow2.f32 %v2838_v21 }
0x2206   :  { %v3106_v10 = vpop.eup %3105 }
0x2207   :  { %2170 = vrot.lane.b32.xlu1 %v3106_v10, %s3239_s28 }
0x2208   :  { %v3108_v49 = vpop.eup %3107 }
0x2209   :  { %v2151_v12 = vadd.f32 1.0, %v3108_v49 }
0x220b   :  { %3109 = vrcp.f32 %v2151_v12  ;;  %v2163_v15 = vand.u32 2147483648, %v2151_v12  ;;  %vm2157_vm6 = vweird.f32 %v2151_v12  ;;  %v2161_v50 = vand.u32 2147483647, %v2151_v12 }
0x220d   :  { %v2164_v2 = vor.u32 1.1754944e-38, %v2163_v15  ;;  %vm2162_vm10 = vcmp.eq.f32.partialorder %v2161_v50, 8.507059e+37 }
0x2211   :  { %v3110_v7 = vpop.eup %3109 }
0x2212   :  { %v2153_v22 = vmul.f32 %v3110_v7, %v2151_v12  ;;  %vm2158_vm5 = vweird.f32 %v3110_v7 }
0x2213   :  { %vm2159_vm9 = vmor %vm2157_vm6, %vm2158_vm5 }
0x2214   :  { %v2154_v28 = vsub.f32 1.0, %v2153_v22 }
0x2216   :  { %v2155_v46 = vmul.f32 %v3110_v7, %v2154_v28 }
0x2218   :  { %v2156_v34 = vadd.f32 %v3110_v7, %v2155_v46 }
0x221a   :  { %v2160_v25 = vsel %vm2159_vm9, %v3110_v7, %v2156_v34 }
0x221b   :  { %v2165_v61 = vsel %vm2162_vm10, %v2164_v2, %v2160_v25 }
0x221c   :  { %v2168_v4 = vmul.f32 %v2165_v61, %v4161_v9 }
0x2279   :  { %v2171_v24 = vpop.permute.xlu1 %2170 }
0x227a   :  { %v2173_v62 = vmul.f32 %v2171_v24, %v2165_v61 }
0x227c   :  { %2175 = vrot.lane.b32.xlu2 %v2173_v62, %s3240_s29 }
0x2284   :  { %2189 = vrot.lane.b32.xlu2 %v4255_v1, %s3239_s28 }
0x22d6   :  { %v2176_v63 = vpop.permute.xlu2 %2175 }
0x22d7   :  { %v4426_v53 = vadd.f32 %v2176_v63, %v2168_v4 }
0x22d9   :  { %3111 = vtanh.f32 %v4426_v53 }
0x22de   :  { %v2190_v40 = vpop.permute.xlu2 %2189 }
0x22df   :  { %v3112_v6 = vpop.eup %3111 }
0x22e0   :  { %2181 = vrot.lane.b32.xlu0 %v3112_v6, %s3239_s28 }
0x2352   :  { %v2182_v11 = vpop.permute.xlu0 %2181 }
0x2353   :  { %v4430_v0 = vmul.f32 %v2182_v11, %v2165_v61 }
0x2355   :  { %2186 = vrot.lane.b32.xlu1 %v4430_v0, %s3240_s29 }
0x23c7   :  { %v2187_v57 = vpop.permute.xlu1 %2186 }
0x23c8   :  { %v2192_v1 = vsel %vm199_vm7, %v2187_v57, %v2190_v40 }
0x23c9   :  { %2839 = vmatmul.msk.f32.vlgmr.msra.gmra.mxu1 %vm209_vm8, %v2192_v1 }
0x2446   :  { %v2213_v9 = vpop.f32.mrf.mxu1 }
0x2447   :  { %v2214_v35 = vadd.f32 %v4439_v58, %v2213_v9 }
0x2449   :  { %3113 = vtanh.f32 %v2214_v35  ;;  %v2840_v26 = vmul.f32 -1.442695, %v2214_v35 }
0x244b   :  { %3115 = vpow2.f32 %v2840_v26 }
0x244f   :  { %v3114_v54 = vpop.eup %3113 }
0x2450   :  { %2238 = vrot.lane.b32.xlu0 %v3114_v54, %s3239_s28 }
0x2451   :  { %v3116_v41 = vpop.eup %3115 }
0x2452   :  { %v2219_v33 = vadd.f32 1.0, %v3116_v41 }
0x2454   :  { %3117 = vrcp.f32 %v2219_v33  ;;  %v2231_v47 = vand.u32 2147483648, %v2219_v33  ;;  %vm2225_vm12 = vweird.f32 %v2219_v33  ;;  %v2229_v23 = vand.u32 2147483647, %v2219_v33 }
0x2456   :  { %v2232_v48 = vor.u32 1.1754944e-38, %v2231_v47  ;;  %vm2230_vm14 = vcmp.eq.f32.partialorder %v2229_v23, 8.507059e+37 }
0x245a   :  { %v3118_v37 = vpop.eup %3117 }
0x245b   :  { %v2221_v52 = vmul.f32 %v3118_v37, %v2219_v33  ;;  %vm2226_vm11 = vweird.f32 %v3118_v37 }
0x245c   :  { %vm2227_vm13 = vmor %vm2225_vm12, %vm2226_vm11 }
0x245d   :  { %v2222_v3 = vsub.f32 1.0, %v2221_v52 }
0x245f   :  { %v2223_v20 = vmul.f32 %v3118_v37, %v2222_v3 }
0x2461   :  { %v2224_v45 = vadd.f32 %v3118_v37, %v2223_v20 }
0x2463   :  { %v2228_v55 = vsel %vm2227_vm13, %v3118_v37, %v2224_v45 }
0x2464   :  { %v2233_v60 = vsel %vm2230_vm14, %v2232_v48, %v2228_v55 }
0x2465   :  { %v2236_v21 = vmul.f32 %v2233_v60, %v4212_v8 }
0x24c2   :  { %v2239_v42 = vpop.permute.xlu0 %2238 }
0x24c3   :  { %v2241_v10 = vmul.f32 %v2239_v42, %v2233_v60 }
0x24c5   :  { %2243 = vrot.lane.b32.xlu1 %v2241_v10, %s3240_s29 }
0x24cd   :  { %2278 = vrot.lane.b32.xlu1 %v4408_v13, %s3242_s17 }
0x2537   :  { %v2244_v49 = vpop.permute.xlu1 %2243 }
0x2538   :  { %v4447_v12 = vadd.f32 %v2244_v49, %v2236_v21 }
0x253a   :  { %3119 = vtanh.f32 %v4447_v12 }
0x253f   :  { %v2279_v34 = vpop.permute.xlu1 %2278 }
0x2540   :  { %v3120_v7 = vpop.eup %3119 }
0x2541   :  { %2249 = vrot.lane.b32.xlu2 %v3120_v7, %s3239_s28 }
0x259b   :  { %v2250_v22 = vpop.permute.xlu2 %2249 }
0x259c   :  { %v4451_v28 = vmul.f32 %v2250_v22, %v2233_v60 }
0x259e   :  { %2254 = vrot.lane.b32.xlu0 %v4451_v28, %s3240_s29 }
0x2610   :  { %v2255_v46 = vpop.permute.xlu0 %2254 }
0x2611   :  { %2841 = vmatmul.msk.f32.vlgmr.msrb.gmra.mxu3 %vm199_vm7, %v2255_v46 }
0x2612   :  { %2654 = vmatpush.msrb.mxu3 %v4017_v17 }
0x2614   :  { %2655 = vmatpush.msrb.mxu3 %v4023_v32 }
0x2616   :  { %2656 = vmatpush.msrb.mxu3 %v4029_v36 }
0x2618   :  { %2657 = vmatpush.msrb.mxu3 %v4035_v31 }
0x261a   :  { %2658 = vmatpush.msrb.mxu3 %v4041_v29 }
0x261c   :  { %2659 = vmatpush.msrb.mxu3 %v4047_v16 }
0x261e   :  { %2660 = vmatpush.msrb.mxu3 %v4053_v38 }
0x2620   :  { %2661 = vmatpush.msrb.mxu3 %v4059_v39 }
0x2694   :  { %v2275_v8 = vpop.f32.mrf.mxu3 }
0x2695   :  { %v4465_v13 = vadd.f32 %v4112_v43, %v2275_v8 }
0x2697   :  { %v2281_v17 = vsel %vm55_vm1, %v4465_v13, %v2279_v34 }
0x2698   :  { %2843 = vmatmul.msk.f32.vlgmr.msrb.gmra.mxu2 %vm62_vm2, %v2281_v17 }
0x2699   :  { %2720 = vmatpush.msrb.mxu2 %v4074_v56 }
0x269b   :  { %2721 = vmatpush.msrb.mxu2 %v4079_v18 }
0x269d   :  { %2722 = vmatpush.msrb.mxu2 %v4085_v5 }
0x269f   :  { %2723 = vmatpush.msrb.mxu2 %v4091_v44 }
0x271b   :  { %v2302_v32 = vpop.f32.mrf.mxu2 }
0x271c   :  { %v2303_v36 = vadd.f32 %v4128_v19, %v2302_v32 }
0x271e   :  { %3121 = vtanh.f32 %v2303_v36  ;;  %v2844_v29 = vmul.f32 -1.442695, %v2303_v36 }
0x2720   :  { %3123 = vpow2.f32 %v2844_v29 }
0x2724   :  { %v3122_v31 = vpop.eup %3121 }
0x2725   :  { %2327 = vrot.lane.b32.xlu2 %v3122_v31, %s3239_s28 }
0x2726   :  { %v3124_v16 = vpop.eup %3123 }
0x2727   :  { %v2308_v38 = vadd.f32 1.0, %v3124_v16 }
0x2729   :  { %3125 = vrcp.f32 %v2308_v38  ;;  %v2320_v5 = vand.u32 2147483648, %v2308_v38  ;;  %vm2314_vm15 = vweird.f32 %v2308_v38  ;;  %v2318_v44 = vand.u32 2147483647, %v2308_v38 }
0x272b   :  { %v2321_v50 = vor.u32 1.1754944e-38, %v2320_v5  ;;  %vm2319_vm4 = vcmp.eq.f32.partialorder %v2318_v44, 8.507059e+37 }
0x272f   :  { %v3126_v39 = vpop.eup %3125 }
0x2730   :  { %v2310_v56 = vmul.f32 %v3126_v39, %v2308_v38  ;;  %vm2315_vm0 = vweird.f32 %v3126_v39 }
0x2731   :  { %vm2316_vm3 = vmor %vm2314_vm15, %vm2315_vm0 }
0x2732   :  { %v2311_v43 = vsub.f32 1.0, %v2310_v56 }
0x2734   :  { %v2312_v18 = vmul.f32 %v3126_v39, %v2311_v43 }
0x2736   :  { %v2313_v15 = vadd.f32 %v3126_v39, %v2312_v18 }
0x2738   :  { %v2317_v19 = vsel %vm2316_vm3, %v3126_v39, %v2313_v15 }
0x2739   :  { %v2322_v2 = vsel %vm2319_vm4, %v2321_v50, %v2317_v19 }
0x273a   :  { %v2325_v61 = vmul.f32 %v2322_v2, %v4391_v27 }
0x277f   :  { %v2328_v25 = vpop.permute.xlu2 %2327 }
0x2780   :  { %v2330_v24 = vmul.f32 %v2328_v25, %v2322_v2 }
0x2782   :  { %2332 = vrot.lane.b32.xlu0 %v2330_v24, %s3240_s29 }
0x278a   :  { %2346 = vrot.lane.b32.xlu0 %v4430_v0, %s3239_s28 }
0x27f4   :  { %v2333_v62 = vpop.permute.xlu0 %2332 }
0x27f5   :  { %v4480_v4 = vadd.f32 %v2333_v62, %v2325_v61 }
0x27f7   :  { %3127 = vtanh.f32 %v4480_v4 }
0x27fc   :  { %v2347_v40 = vpop.permute.xlu0 %2346 }
0x27fd   :  { %v3128_v63 = vpop.eup %3127 }
0x27fe   :  { %2338 = vrot.lane.b32.xlu1 %v3128_v63, %s3239_s28 }
0x2870   :  { %v2339_v6 = vpop.permute.xlu1 %2338 }
0x2871   :  { %v4484_v11 = vmul.f32 %v2339_v6, %v2322_v2 }
0x2873   :  { %2343 = vrot.lane.b32.xlu2 %v4484_v11, %s3240_s29 }
0x28cd   :  { %v2344_v57 = vpop.permute.xlu2 %2343 }
0x28ce   :  { %v2349_v0 = vsel %vm199_vm7, %v2344_v57, %v2347_v40 }
0x28cf   :  { %2845 = vmatmul.msk.f32.vlgmr.msra.gmra.mxu3 %vm209_vm8, %v2349_v0 }
0x2952   :  { %v2370_v27 = vpop.f32.mrf.mxu3 }
0x2953   :  { %v2371_v1 = vadd.f32 %v4153_v51, %v2370_v27  ;;  %v3211_v27 = vld [vmem:[%s4573_s2] ss:$0 sm:$0xff] }
0x2955   :  { %3129 = vtanh.f32 %v2371_v1  ;;  %v2846_v35 = vmul.f32 -1.442695, %v2371_v1 }
0x2957   :  { %3131 = vpow2.f32 %v2846_v35 }
0x295b   :  { %v3130_v9 = vpop.eup %3129 }
0x295c   :  { %2395 = vrot.lane.b32.xlu1 %v3130_v9, %s3239_s28 }
0x295d   :  { %v3132_v54 = vpop.eup %3131 }
0x295e   :  { %v2376_v26 = vadd.f32 1.0, %v3132_v54 }
0x2960   :  { %3133 = vrcp.f32 %v2376_v26  ;;  %v2388_v20 = vand.u32 2147483648, %v2376_v26  ;;  %vm2382_vm6 = vweird.f32 %v2376_v26  ;;  %v2386_v45 = vand.u32 2147483647, %v2376_v26 }
0x2962   :  { %v2389_v47 = vor.u32 1.1754944e-38, %v2388_v20  ;;  %vm2387_vm10 = vcmp.eq.f32.partialorder %v2386_v45, 8.507059e+37 }
0x2966   :  { %v3134_v41 = vpop.eup %3133 }
0x2967   :  { %v2378_v33 = vmul.f32 %v3134_v41, %v2376_v26  ;;  %vm2383_vm5 = vweird.f32 %v3134_v41 }
0x2968   :  { %vm2384_vm9 = vmor %vm2382_vm6, %vm2383_vm5 }
0x2969   :  { %v2379_v37 = vsub.f32 1.0, %v2378_v33 }
0x296b   :  { %v2380_v52 = vmul.f32 %v3134_v41, %v2379_v37 }
0x296d   :  { %v2381_v3 = vadd.f32 %v3134_v41, %v2380_v52 }
0x296f   :  { %v2385_v51 = vsel %vm2384_vm9, %v3134_v41, %v2381_v3 }
0x2970   :  { %v2390_v55 = vsel %vm2387_vm10, %v2389_v47, %v2385_v51 }
0x2971   :  { %v2393_v42 = vmul.f32 %v2390_v55, %v4426_v53 }
0x29ce   :  { %v2396_v23 = vpop.permute.xlu1 %2395 }
0x29cf   :  { %v2398_v48 = vmul.f32 %v2396_v23, %v2390_v55 }
0x29d1   :  { %2400 = vrot.lane.b32.xlu2 %v2398_v48, %s3240_s29 }
0x29d9   :  { %2414 = vrot.lane.b32.xlu2 %v4451_v28, %s3239_s28 }
0x2a2b   :  { %v2401_v60 = vpop.permute.xlu2 %2400 }
0x2a2c   :  { %v4496_v10 = vadd.f32 %v2401_v60, %v2393_v42 }
0x2a2e   :  { %3135 = vtanh.f32 %v4496_v10 }
0x2a33   :  { %v2415_v22 = vpop.permute.xlu2 %2414 }
0x2a34   :  { %v3136_v21 = vpop.eup %3135 }
0x2a35   :  { %2406 = vrot.lane.b32.xlu0 %v3136_v21, %s3239_s28 }
0x2aa7   :  { %v2407_v49 = vpop.permute.xlu0 %2406 }
0x2aa8   :  { %v4500_v7 = vmul.f32 %v2407_v49, %v2390_v55 }
0x2aaa   :  { %2411 = vrot.lane.b32.xlu1 %v4500_v7, %s3240_s29 }
0x2b1c   :  { %v2412_v46 = vpop.permute.xlu1 %2411 }
0x2b1d   :  { %v2417_v28 = vsel %vm199_vm7, %v2412_v46, %v2415_v22 }
0x2b1e   :  { %2847 = vmatmul.msk.f32.vlgmr.msrb.gmra.mxu0 %vm209_vm8, %v2417_v28 }
0x2b9b   :  { %v2438_v53 = vpop.f32.mrf.mxu0 }
0x2b9c   :  { %v2439_v8 = vadd.f32 %v4439_v58, %v2438_v53 }
0x2b9e   :  { %3137 = vtanh.f32 %v2439_v8  ;;  %v2848_v17 = vmul.f32 -1.442695, %v2439_v8 }
0x2ba0   :  { %3139 = vpow2.f32 %v2848_v17 }
0x2ba4   :  { %v3138_v34 = vpop.eup %3137 }
0x2ba5   :  { %2463 = vrot.lane.b32.xlu0 %v3138_v34, %s3239_s28 }
0x2ba6   :  { %v3140_v32 = vpop.eup %3139 }
0x2ba7   :  { %v2444_v36 = vadd.f32 1.0, %v3140_v32 }
0x2ba9   :  { %3141 = vrcp.f32 %v2444_v36  ;;  %v2456_v56 = vand.u32 2147483648, %v2444_v36  ;;  %vm2450_vm12 = vweird.f32 %v2444_v36  ;;  %v2454_v43 = vand.u32 2147483647, %v2444_v36 }
0x2bab   :  { %v2457_v15 = vor.u32 1.1754944e-38, %v2456_v56  ;;  %vm2455_vm14 = vcmp.eq.f32.partialorder %v2454_v43, 8.507059e+37 }
0x2baf   :  { %v3142_v31 = vpop.eup %3141 }
0x2bb0   :  { %v2446_v29 = vmul.f32 %v3142_v31, %v2444_v36  ;;  %vm2451_vm11 = vweird.f32 %v3142_v31 }
0x2bb1   :  { %vm2452_vm13 = vmor %vm2450_vm12, %vm2451_vm11 }
0x2bb2   :  { %v2447_v16 = vsub.f32 1.0, %v2446_v29 }
0x2bb4   :  { %v2448_v38 = vmul.f32 %v3142_v31, %v2447_v16 }
0x2bb6   :  { %v2449_v39 = vadd.f32 %v3142_v31, %v2448_v38 }
0x2bb8   :  { %v2453_v18 = vsel %vm2452_vm13, %v3142_v31, %v2449_v39  ;;  %vm2741_vm13 = vcmask 15360  }
0x2bb9   :  { %v2458_v44 = vsel %vm2455_vm14, %v2457_v15, %v2453_v18  ;;  %vm2743_vm14 = vcmask 23552  }
0x2bba   :  { %v2461_v50 = vmul.f32 %v2458_v44, %v4447_v12 }
0x2c17   :  { %v2464_v5 = vpop.permute.xlu0 %2463 }
0x2c18   :  { %v2466_v19 = vmul.f32 %v2464_v5, %v2458_v44 }
0x2c1a   :  { %2468 = vrot.lane.b32.xlu1 %v2466_v19, %s3240_s29 }
0x2c22   :  { %2503 = vrot.lane.b32.xlu1 %v4484_v11, %s3242_s17  ;;  %v4521_v11 = vld [vmem:[#allocation2] ss:$0 sm:$0xff] }
0x2c8c   :  { %v2469_v25 = vpop.permute.xlu1 %2468 }
0x2c8d   :  { %v4512_v2 = vadd.f32 %v2469_v25, %v2461_v50 }
0x2c8f   :  { %3143 = vtanh.f32 %v4512_v2 }
0x2c94   :  { %v2504_v40 = vpop.permute.xlu1 %2503 }
0x2c95   :  { %v3144_v24 = vpop.eup %3143 }
0x2c96   :  { %2474 = vrot.lane.b32.xlu2 %v3144_v24, %s3239_s28 }
0x2cf0   :  { %v2475_v61 = vpop.permute.xlu2 %2474 }
0x2cf1   :  { %v4516_v62 = vmul.f32 %v2475_v61, %v2458_v44 }
0x2cf3   :  { %2479 = vrot.lane.b32.xlu0 %v4516_v62, %s3240_s29 }
0x2d65   :  { %v2480_v63 = vpop.permute.xlu0 %2479 }
0x2d66   :  { %2849 = vmatmul.msk.f32.vlgmr.msra.gmra.mxu0 %vm199_vm7, %v2480_v63 }
0x2de3   :  { %v2500_v6 = vpop.f32.mrf.mxu0 }
0x2de4   :  { %v4524_v12 = vadd.f32 %v4521_v11, %v2500_v6 }
0x2de6   :  { %v2506_v57 = vsel %vm55_vm1, %v4524_v12, %v2504_v40 }
0x2de7   :  { %2851 = vmatmul.msk.f32.vlgmr.msra.gmra.mxu2 %vm62_vm2, %v2506_v57 }
0x2e6a   :  { %v2527_v0 = vpop.f32.mrf.mxu2 }
0x2e6b   :  { %v2528_v1 = vadd.f32 %v3211_v27, %v2527_v0 }
0x2e6d   :  { %3145 = vtanh.f32 %v2528_v1  ;;  %v2852_v35 = vmul.f32 -1.442695, %v2528_v1 }
0x2e6f   :  { %3147 = vpow2.f32 %v2852_v35 }
0x2e73   :  { %v3146_v9 = vpop.eup %3145 }
0x2e74   :  { %2552 = vrot.lane.b32.xlu2 %v3146_v9, %s3239_s28 }
0x2e75   :  { %v3148_v54 = vpop.eup %3147 }
0x2e76   :  { %v2533_v26 = vadd.f32 1.0, %v3148_v54 }
0x2e78   :  { %3149 = vrcp.f32 %v2533_v26  ;;  %v2545_v20 = vand.u32 2147483648, %v2533_v26  ;;  %vm2539_vm0 = vweird.f32 %v2533_v26  ;;  %v2543_v45 = vand.u32 2147483647, %v2533_v26 }
0x2e7a   :  { %v2546_v47 = vor.u32 1.1754944e-38, %v2545_v20  ;;  %vm2544_vm3 = vcmp.eq.f32.partialorder %v2543_v45, 8.507059e+37 }
0x2e7e   :  { %v3150_v41 = vpop.eup %3149 }
0x2e7f   :  { %v2535_v33 = vmul.f32 %v3150_v41, %v2533_v26  ;;  %vm2540_vm2 = vweird.f32 %v3150_v41 }
0x2e80   :  { %vm2541_vm15 = vmor %vm2539_vm0, %vm2540_vm2  ;;  %vm2751_vm2 = vcmask 91136  }
0x2e81   :  { %v2536_v37 = vsub.f32 1.0, %v2535_v33 }
0x2e83   :  { %v2537_v52 = vmul.f32 %v3150_v41, %v2536_v37 }
0x2e85   :  { %v2538_v3 = vadd.f32 %v3150_v41, %v2537_v52 }
0x2e87   :  { %v2542_v51 = vsel %vm2541_vm15, %v3150_v41, %v2538_v3  ;;  %v3250_v41 = vmov 0  }
0x2e88   :  { %v2547_v55 = vsel %vm2544_vm3, %v2546_v47, %v2542_v51  ;;  %2875 = vset.pattern.permute.xlu1 %v3250_v41  ;;  %2876 = vset.pattern.permute.xlu0 %v3250_v41 }
0x2e89   :  { %v2550_v42 = vmul.f32 %v2547_v55, %v4480_v4  ;;  %v3212_v4 = vld [vmem:[%s4575_s4] ss:$0 sm:$0xff]  ;;  %s3251_s4 = smov 1  }
0x2ece   :  { %v2553_v23 = vpop.permute.xlu2 %2552 }
0x2ecf   :  { %v2555_v48 = vmul.f32 %v2553_v23, %v2547_v55 }
0x2ed1   :  { %2557 = vrot.lane.b32.xlu0 %v2555_v48, %s3240_s29 }
0x2ed9   :  { %2571 = vrot.lane.b32.xlu0 %v4500_v7, %s3239_s28 }
0x2f43   :  { %v2558_v60 = vpop.permute.xlu0 %2557 }
0x2f44   :  { %v2560_v21 = vadd.f32 %v2558_v60, %v2550_v42 }
0x2f46   :  { %3151 = vtanh.f32 %v2560_v21 }
0x2f4b   :  { %v2572_v28 = vpop.permute.xlu0 %2571 }
0x2f4c   :  { %v3152_v49 = vpop.eup %3151 }
0x2f4d   :  { %2563 = vrot.lane.b32.xlu1 %v3152_v49, %s3239_s28 }
0x2fbf   :  { %v2564_v22 = vpop.permute.xlu1 %2563 }
0x2fc0   :  { %v2566_v46 = vmul.f32 %v2564_v22, %v2547_v55 }
0x2fc2   :  { %2568 = vrot.lane.b32.xlu2 %v2566_v46, %s3240_s29 }
0x301c   :  { %v2569_v53 = vpop.permute.xlu2 %2568 }
0x301d   :  { %v2574_v8 = vsel %vm199_vm7, %v2569_v53, %v2572_v28 }
0x301e   :  { %2853 = vmatmul.msk.f32.vlgmr.msrb.gmra.mxu1 %vm209_vm8, %v2574_v8 }
0x309b   :  { %v2595_v34 = vpop.f32.mrf.mxu1 }
0x309c   :  { %v2596_v7 = vadd.f32 %v3212_v4, %v2595_v34 }
0x309e   :  { %3153 = vtanh.f32 %v2596_v7  ;;  %v2854_v32 = vmul.f32 -1.442695, %v2596_v7 }
0x30a0   :  { %3155 = vpow2.f32 %v2854_v32 }
0x30a4   :  { %v3154_v17 = vpop.eup %3153 }
0x30a5   :  { %2620 = vrot.lane.b32.xlu1 %v3154_v17, %s3239_s28 }
0x30a6   :  { %v3156_v36 = vpop.eup %3155 }
0x30a7   :  { %v2601_v31 = vadd.f32 1.0, %v3156_v36 }
0x30a9   :  { %3157 = vrcp.f32 %v2601_v31  ;;  %v2613_v43 = vand.u32 2147483648, %v2601_v31  ;;  %vm2607_vm5 = vweird.f32 %v2601_v31  ;;  %v2611_v18 = vand.u32 2147483647, %v2601_v31 }
0x30ab   :  { %v2614_v5 = vor.u32 1.1754944e-38, %v2613_v43  ;;  %vm2612_vm9 = vcmp.eq.f32.partialorder %v2611_v18, 8.507059e+37 }
0x30af   :  { %v3158_v29 = vpop.eup %3157 }
0x30b0   :  { %v2603_v16 = vmul.f32 %v3158_v29, %v2601_v31  ;;  %vm2608_vm4 = vweird.f32 %v3158_v29 }
0x30b1   :  { %vm2609_vm6 = vmor %vm2607_vm5, %vm2608_vm4 }
0x30b2   :  { %v2604_v38 = vsub.f32 1.0, %v2603_v16 }
0x30b4   :  { %v2605_v39 = vmul.f32 %v3158_v29, %v2604_v38 }
0x30b6   :  { %v2606_v56 = vadd.f32 %v3158_v29, %v2605_v39 }
0x30b8   :  { %v2610_v15 = vsel %vm2609_vm6, %v3158_v29, %v2606_v56 }
0x30b9   :  { %v2615_v19 = vsel %vm2612_vm9, %v2614_v5, %v2610_v15 }
0x30ba   :  { %v2618_v25 = vmul.f32 %v2615_v19, %v4496_v10 }
0x3117   :  { %v2621_v44 = vpop.permute.xlu1 %2620 }
0x3118   :  { %v2623_v50 = vmul.f32 %v2621_v44, %v2615_v19 }
0x311a   :  { %2625 = vrot.lane.b32.xlu2 %v2623_v50, %s3240_s29 }
0x3122   :  { %2639 = vrot.lane.b32.xlu2 %v4516_v62, %s3239_s28 }
0x3174   :  { %v2626_v24 = vpop.permute.xlu2 %2625 }
0x3175   :  { %v2628_v61 = vadd.f32 %v2626_v24, %v2618_v25 }
0x3177   :  { %3159 = vtanh.f32 %v2628_v61 }
0x317c   :  { %v2640_v57 = vpop.permute.xlu2 %2639 }
0x317d   :  { %v3160_v63 = vpop.eup %3159 }
0x317e   :  { %2631 = vrot.lane.b32.xlu0 %v3160_v63, %s3239_s28 }
0x31f0   :  { %v2632_v6 = vpop.permute.xlu0 %2631 }
0x31f1   :  { %v2634_v40 = vmul.f32 %v2632_v6, %v2615_v19 }
0x31f3   :  { %2636 = vrot.lane.b32.xlu1 %v2634_v40, %s3240_s29 }
0x3265   :  { %v2637_v0 = vpop.permute.xlu1 %2636 }
0x3266   :  { %v2642_v27 = vsel %vm199_vm7, %v2637_v0, %v2640_v57 }
0x3267   :  { %2855 = vmatmul.msk.f32.vlgmr.msrb.gmra.mxu3 %vm209_vm8, %v2642_v27 }
0x32ea   :  { %v2663_v1 = vpop.f32.mrf.mxu3 }
0x32eb   :  { %v2664_v62 = vadd.f32 %v4439_v58, %v2663_v1 }
0x32ed   :  { %3161 = vtanh.f32 %v2664_v62  ;;  %v2856_v9 = vmul.f32 -1.442695, %v2664_v62 }
0x32ef   :  { %3163 = vpow2.f32 %v2856_v9 }
0x32f3   :  { %v3162_v10 = vpop.eup %3161 }
0x32f4   :  { %2688 = vrot.lane.b32.xlu0 %v3162_v10, %s3239_s28 }
0x32f5   :  { %v3164_v35 = vpop.eup %3163 }
0x32f6   :  { %v2669_v54 = vadd.f32 1.0, %v3164_v35 }
0x32f8   :  { %3165 = vrcp.f32 %v2669_v54  ;;  %v2681_v20 = vand.u32 2147483648, %v2669_v54  ;;  %vm2675_vm10 = vweird.f32 %v2669_v54  ;;  %v2679_v58 = vand.u32 2147483647, %v2669_v54 }
0x32fa   :  { %v2682_v51 = vor.u32 1.1754944e-38, %v2681_v20  ;;  %vm2680_vm12 = vcmp.eq.f32.partialorder %v2679_v58, 8.507059e+37 }
0x32fe   :  { %v3166_v26 = vpop.eup %3165 }
0x32ff   :  { %v2671_v33 = vmul.f32 %v3166_v26, %v2669_v54  ;;  %vm2676_vm8 = vweird.f32 %v3166_v26 }
0x3300   :  { %vm2677_vm11 = vmor %vm2675_vm10, %vm2676_vm8 }
0x3301   :  { %v2672_v37 = vsub.f32 1.0, %v2671_v33 }
0x3303   :  { %v2673_v52 = vmul.f32 %v3166_v26, %v2672_v37 }
0x3305   :  { %v2674_v3 = vadd.f32 %v3166_v26, %v2673_v52 }
0x3307   :  { %v2678_v45 = vsel %vm2677_vm11, %v3166_v26, %v2674_v3 }
0x3308   :  { %v2683_v23 = vsel %vm2680_vm12, %v2682_v51, %v2678_v45 }
0x3309   :  { %v2686_v48 = vmul.f32 %v2683_v23, %v4512_v2 }
0x3366   :  { %v2689_v47 = vpop.permute.xlu0 %2688 }
0x3367   :  { %v2691_v55 = vmul.f32 %v2689_v47, %v2683_v23 }
0x3369   :  { %2693 = vrot.lane.b32.xlu1 %v2691_v55, %s3240_s29 }
0x3371   :  { %2729 = vrot.lane.b32.xlu1 %v4465_v13, %s3251_s4 }
0x3379   :  { %1756 = vperm.xlu1 %2875, %v4521_v11  }
0x33db   :  { %v2694_v42 = vpop.permute.xlu1 %2693 }
0x33dc   :  { %v2696_v60 = vadd.f32 %v2694_v42, %v2686_v48 }
0x33de   :  { %3167 = vtanh.f32 %v2696_v60 }
0x33e3   :  { %v2730_v2 = vpop.permute.xlu1 %2729 }
0x33e4   :  { %v3168_v21 = vpop.eup %3167  ;;  %v2740_v8 = vsel %vm55_vm1, %v4317_v14, %v2730_v2 }
0x33e5   :  { %2699 = vrot.lane.b32.xlu2 %v3168_v21, %s3239_s28  ;;  %s3254_s28 = smov 8  }
0x33eb   :  { %v1757_v7 = vpop.permute.xlu1 %1756 }
0x33ec   :  { %v1777_v17 = vadd.f32 %v4323_v59, %v1757_v7 }
0x33ed   :  { %2733 = vrot.lane.b32.xlu2 %v4524_v12, %s3252_s26 }
0x343f   :  { %v2700_v49 = vpop.permute.xlu2 %2699 }
0x3440   :  { %v2702_v22 = vmul.f32 %v2700_v49, %v2683_v23 }
0x3442   :  { %2704 = vrot.lane.b32.xlu0 %v2702_v22, %s3240_s29  ;;  %s3255_s29 = smov [#allocation3]  }
0x3443   :  { %s2758_s30 = sshll.u32 %s3255_s29, 4  ;;  %s2759_s30 = int_to_ptr.vmem [resolvable:$true] %s2758_s30 }
0x3447   :  { %v2734_v53 = vpop.permute.xlu2 %2733 }
0x3448   :  { %v2742_v12 = vsel %vm2741_vm13, %v2740_v8, %v2734_v53 }
0x34b4   :  { %v2705_v46 = vpop.permute.xlu0 %2704 }
0x34b5   :  { %2857 = vmatmul.msk.f32.vlgmr.msrb.gmra.mxu2 %vm199_vm7, %v2705_v46  ;;  %vm2749_vm7 = vcmask 64512  }
0x3538   :  { %v2725_v13 = vpop.f32.mrf.mxu2 }
0x3539   :  { %v2726_v28 = vadd.f32 %v4521_v11, %v2725_v13  ;;  %v1797_v11 = vadd.f32 %v4418_v30, %v1777_v17 }
0x353b   :  { %2737 = vrot.lane.b32.xlu0 %v2726_v28, %s3253_s27 }
0x35ad   :  { %v2738_v34 = vpop.permute.xlu0 %2737 }
0x35ae   :  { %v2744_v4 = vsel %vm2743_vm14, %v2742_v12, %v2738_v34 }
0x35af   :  { %2746 = vrot.lane.b32.xlu2 %v2744_v4, %s3254_s28 }
0x3609   :  { %v2747_v32 = vpop.permute.xlu2 %2746 }
0x360a   :  { %v2750_v14 = vsel %vm2749_vm7, %v1797_v11, %v2747_v32 }
0x360b   :  { %2752 = vst.msk [vmem:[#allocation3] sm:$0x3] %vm2751_vm2, %v2750_v14 }
0x360c   :  { %2763 = dma.vmem_to_hbm [thread:$0]  %s2759_s30, 32, %s2761_s11, [#allocation4]  }
0x360d   :  { %3237 = dma.done.wait [#allocation4], 32  }
0x360e   :  { %3238 = vsyncadd [#allocation4], 4294967264 }
0x360f   :  { %2768 = vsyncpa [#allocation4], 1 }

</bundles_post_ra>
